<compile_context>
chip_gen: v7x
topology: tpu7x:2x2x1
jax: 0.10.0
libtpu: 0.0.40
codegen_flags: <defaults>
</compile_context>

<pallas_src>
import functools

import jax
import jax.numpy as jnp
from jax.experimental import pallas as pl
from jax.experimental.pallas import tpu as pltpu


def _eci_kernel(x_ref, m_ref, w_ref, cb_ref, gamma_ref, beta_ref,
                w1_ref, b1_ref, w2_ref, b2_ref, alpha_ref, o_ref,
                *, num_layers, batch, length, lpad, eps):
    blp = batch * lpad
    inv_n = 1.0 / float(batch * length)

    m_prev = m_ref[0:1, :]   # 1.0 where t >= 1     (guards the +1 roll wrap)
    m_next = m_ref[1:2, :]   # 1.0 where t <= L-2   (guards the -1 roll wrap)
    valid = m_ref[2:3, :]    # 1.0 where t <  L     (real positions)

    x = x_ref[...]           # (C, B*Lp), pad lanes exactly zero
    out = x

    for l in range(num_layers):            # unrolled at trace time (small NL)
        # k=3 conv taps via lane rolls; masks stop cross-batch / pad leakage.
        xm1 = pltpu.roll(out, 1, 1) * m_prev
        xp1 = pltpu.roll(out, blp - 1, 1) * m_next
        stacked = jnp.concatenate([xm1, out, xp1], axis=0)         # (3C, B*Lp)

        # Grouped conv == one block-diagonal (C, 3C) matmul on the MXU.
        conv = jnp.dot(w_ref[l], stacked,
                       preferred_element_type=jnp.float32) + cb_ref[l]

        # BatchNorm1d (training-mode biased stats over the B*L valid lanes),
        # two-pass variance, affine folded into per-channel scale/shift.
        mean = jnp.sum(conv * valid, axis=1, keepdims=True) * inv_n   # (C, 1)
        cen = (conv - mean) * valid
        var = jnp.sum(cen * cen, axis=1, keepdims=True) * inv_n       # (C, 1)
        scale = gamma_ref[l] * jax.lax.rsqrt(var + eps)               # (C, 1)
        shift = beta_ref[l] - mean * scale                            # (C, 1)
        out = jnp.maximum(conv * scale + shift, 0.0) * valid          # pads stay 0

    # SE block: per-batch mean pool (pads are zero, so plain lane sums / L).
    pooled = [jnp.sum(out[:, b * lpad:(b + 1) * lpad], axis=1, keepdims=True)
              for b in range(batch)]
    s = jnp.concatenate(pooled, axis=1) * (1.0 / float(length))       # (C, B)
    h = jnp.maximum(
        jnp.dot(w1_ref[...], s, preferred_element_type=jnp.float32) + b1_ref[...],
        0.0)                                                          # (Cr, B)
    se = jax.nn.sigmoid(
        jnp.dot(w2_ref[...], h, preferred_element_type=jnp.float32) + b2_ref[...])
    gate = jax.nn.sigmoid(alpha_ref[0])

    # Gated residual, written with ONE lane-dense full-block store.
    se_lanes = jnp.concatenate(
        [jnp.broadcast_to(se[:, b:b + 1], (se.shape[0], lpad))
         for b in range(batch)], axis=1)                              # (C, B*Lp)
    o_ref[...] = x + gate * (out * se_lanes)


def enhanced_channel_interaction(x_bcl, params, *, groups=4, num_layers=8,
                                 eps=1e-5):
    """x_bcl: (B, C, L) float32, PyTorch NCW layout."""
    wg, cb, gamma, beta, w1, b1, w2, b2, alpha = params
    B, C, L = x_bcl.shape
    G = min(groups, C)
    Cg = C // G
    Cr = w1.shape[0]
    NL = wg.shape[0]

    # Pad L to a multiple of 128 so every batch row is lane-tile aligned.
    Lp = ((L + 127) // 128) * 128
    BLp = B * Lp

    # glue: NCW -> (C, B, Lp) zero-padded -> (C, B*Lp)
    x_cbl = jnp.transpose(x_bcl, (1, 0, 2)).astype(jnp.float32)
    x_cbl = jnp.pad(x_cbl, ((0, 0), (0, 0), (0, Lp - L)))
    x2 = x_cbl.reshape(C, BLp)

    # Hoisted loop-invariant masks: [t>=1, t<=L-2, t<L] per lane.
    t = jnp.arange(BLp, dtype=jnp.int32) % Lp
    masks = jnp.stack([(t >= 1).astype(jnp.float32),
                       (t <= L - 2).astype(jnp.float32),
                       (t < L).astype(jnp.float32)], axis=0)          # (3, B*Lp)

    # Fused block-diagonal conv weights (host-side, once):
    #   wblk[l, o, k*C + j] = wg[l, o, j % Cg, k] if j is in o's group else 0
    grp = jnp.arange(C) // Cg
    same_group = grp[:, None] == grp[None, :]                          # (C, C)
    dense = jnp.where(same_group[None, :, :, None],
                      wg[:, :, jnp.arange(C) % Cg, :], 0.0)            # (NL,C,C,3)
    wblk = jnp.concatenate([dense[..., 0], dense[..., 1], dense[..., 2]],
                           axis=-1)                                    # (NL,C,3C)

    # Size the scoped-VMEM request from the actual resident buffers plus a
    # generous live-temporary allowance; never ask for the full physical VMEM.
    resident = 4 * (2 * C * BLp                 # x + out
                    + 8 * BLp                   # masks (sublane-padded)
                    + NL * C * (3 * C)          # fused conv weights
                    + 3 * NL * C * 128          # cb/gamma/beta (lane-padded)
                    + (Cr + C) * 128 + 2 * Cr * C)
    temporaries = 4 * (9 * C * BLp)             # rolls / stacked operand / conv
    try:
        phys = pltpu.get_tpu_info().vmem_capacity_bytes
    except Exception:
        phys = 64 * 1024 * 1024                 # conservative: v7x per-core VMEM
    cap = max(phys - 16 * 1024 * 1024, 32 * 1024 * 1024)
    vmem_limit = int(min(max(2 * (resident + temporaries), 16 * 1024 * 1024),
                         cap))

    full_vmem = pl.BlockSpec(memory_space=pltpu.MemorySpace.VMEM)
    kernel = functools.partial(_eci_kernel, num_layers=NL, batch=B,
                               length=L, lpad=Lp, eps=eps)

    out2 = pl.pallas_call(
        kernel,
        out_shape=jax.ShapeDtypeStruct((C, BLp), jnp.float32),
        in_specs=[full_vmem,                                       # x
                  full_vmem,                                       # masks
                  full_vmem,                                       # block-diag conv W
                  full_vmem, full_vmem, full_vmem,                 # conv bias, BN gamma/beta
                  full_vmem, full_vmem, full_vmem, full_vmem,      # SE w1, b1, w2, b2
                  pl.BlockSpec(memory_space=pltpu.MemorySpace.SMEM)],  # alpha
        out_specs=full_vmem,
        compiler_params=pltpu.CompilerParams(vmem_limit_bytes=vmem_limit),
    )(x2, masks, wblk, cb, gamma, beta, w1, b1, w2, b2, alpha)

    # glue: (C, B*Lp) -> (B, C, L)
    return jnp.transpose(out2.reshape(C, B, Lp)[:, :, :L], (1, 0, 2))


def init_params(key, num_channels, *, groups=4, num_layers=8):
    """Deterministic synthetic init matching the module's parameter shapes."""
    C = num_channels
    G = min(groups, C)
    Cg = C // G
    Cr = max(C // 16, 1)
    k0, k1, k2 = jax.random.split(key, 3)

    # grouped Conv1d weights, PyTorch shape per layer: (C_out, C_in/G, 3)
    std = (2.0 / (Cg * 3)) ** 0.5
    wg = jax.random.normal(k0, (num_layers, C, Cg, 3), jnp.float32) * std
    cb = jnp.zeros((num_layers, C, 1), jnp.float32)     # conv bias: constant_(0)
    gamma = jnp.ones((num_layers, C, 1), jnp.float32)   # BN default weight
    beta = jnp.zeros((num_layers, C, 1), jnp.float32)   # BN default bias
    w1 = jax.random.normal(k1, (Cr, C), jnp.float32) * (2.0 / C) ** 0.5
    b1 = jnp.zeros((Cr, 1), jnp.float32)
    w2 = jax.random.normal(k2, (C, Cr), jnp.float32) * (2.0 / max(Cr, 1)) ** 0.5
    b2 = jnp.zeros((C, 1), jnp.float32)
    alpha = jnp.zeros((1,), jnp.float32)                # nn.Parameter(zeros(1))
    return wg, cb, gamma, beta, w1, b1, w2, b2, alpha


def reference_forward(x, params, *, groups=4, eps=1e-5):
    """Pure-JAX reference of the PyTorch forward (NCW layout, training-mode BN)."""
    wg, cb, gamma, beta, w1, b1, w2, b2, alpha = params
    B, C, L = x.shape
    NL = wg.shape[0]
    G = min(groups, C)
    out = x
    for l in range(NL):
        conv = jax.lax.conv_general_dilated(
            out, wg[l], window_strides=(1,), padding=((1, 1),),
            dimension_numbers=("NCH", "OIH", "NCH"),
            feature_group_count=G) + cb[l][None, :, :]
        mean = conv.mean(axis=(0, 2), keepdims=True)
        var = ((conv - mean) ** 2).mean(axis=(0, 2), keepdims=True)
        bn = (conv - mean) * jax.lax.rsqrt(var + eps) * gamma[l][None] + beta[l][None]
        out = jnp.maximum(bn, 0.0)
    s = out.mean(axis=2)                                           # (B, C)
    h = jnp.maximum(s @ w1.T + b1[:, 0][None, :], 0.0)             # (B, Cr)
    se = jax.nn.sigmoid(h @ w2.T + b2[:, 0][None, :])              # (B, C)
    return x + jax.nn.sigmoid(alpha[0]) * (out * se[:, :, None])


if __name__ == "__main__":
    B, C, L = 2, 32, 16
    groups, num_layers = 4, 8

    key = jax.random.PRNGKey(0)
    kx, kp = jax.random.split(key)
    x = jax.random.normal(kx, (B, C, L), dtype=jnp.float32)
    params = init_params(kp, C, groups=groups, num_layers=num_layers)

    y = enhanced_channel_interaction(x, params, groups=groups,
                                     num_layers=num_layers)
    y = jax.block_until_ready(y)

    y_ref = reference_forward(x, params, groups=groups)
    assert y.shape == (B, C, L)
    assert bool(jnp.all(jnp.isfinite(y)))
    assert bool(jnp.allclose(y, y_ref, atol=3e-3, rtol=3e-3)), "mismatch vs reference"

    print("KERNEL_OK")
</pallas_src>

<mosaic_0001>
module attributes {stable_mosaic.version = 11 : i64} {
  func.func @_eci_kernel(%arg0: memref<32x256xf32, #tpu.memory_space<vmem>>, %arg1: memref<3x256xf32, #tpu.memory_space<vmem>>, %arg2: memref<8x32x96xf32, #tpu.memory_space<vmem>>, %arg3: memref<8x32x1xf32, #tpu.memory_space<vmem>>, %arg4: memref<8x32x1xf32, #tpu.memory_space<vmem>>, %arg5: memref<8x32x1xf32, #tpu.memory_space<vmem>>, %arg6: memref<2x32xf32, #tpu.memory_space<vmem>>, %arg7: memref<2x1xf32, #tpu.memory_space<vmem>>, %arg8: memref<32x2xf32, #tpu.memory_space<vmem>>, %arg9: memref<32x1xf32, #tpu.memory_space<vmem>>, %arg10: memref<1xf32, #tpu.memory_space<smem>>, %arg11: memref<32x256xf32, #tpu.memory_space<vmem>>) attributes {dimension_semantics = [], scalar_prefetch = 0 : i64, scratch_operands = 0 : i64, tpu.core_type = #tpu.core_type<tc>} {
    %c0 = arith.constant 0 : index
    %c0_0 = arith.constant 0 : index
    %0 = vector.load %arg1[%c0, %c0_0] : memref<3x256xf32, #tpu.memory_space<vmem>>, vector<1x256xf32>
    %c1 = arith.constant 1 : index
    %c0_1 = arith.constant 0 : index
    %1 = vector.load %arg1[%c1, %c0_1] : memref<3x256xf32, #tpu.memory_space<vmem>>, vector<1x256xf32>
    %c2 = arith.constant 2 : index
    %c0_2 = arith.constant 0 : index
    %2 = vector.load %arg1[%c2, %c0_2] : memref<3x256xf32, #tpu.memory_space<vmem>>, vector<1x256xf32>
    %c0_3 = arith.constant 0 : index
    %c0_4 = arith.constant 0 : index
    %3 = vector.load %arg0[%c0_3, %c0_4] : memref<32x256xf32, #tpu.memory_space<vmem>>, vector<32x256xf32>
    %c1_i32 = arith.constant 1 : i32
    %4 = tpu.dynamic_rotate %3 by %c1_i32 dim 1 : vector<32x256xf32>, i32 -> vector<32x256xf32>
    %5 = vector.broadcast %0 : vector<1x256xf32> to vector<32x256xf32>
    %6 = arith.mulf %4, %5 : vector<32x256xf32>
    %c255_i32 = arith.constant 255 : i32
    %7 = tpu.dynamic_rotate %3 by %c255_i32 dim 1 : vector<32x256xf32>, i32 -> vector<32x256xf32>
    %8 = vector.broadcast %1 : vector<1x256xf32> to vector<32x256xf32>
    %9 = arith.mulf %7, %8 : vector<32x256xf32>
    %10 = tpu.concatenate %6, %3, %9 in 0 : vector<32x256xf32>, vector<32x256xf32>, vector<32x256xf32> -> vector<96x256xf32>
    %c0_5 = arith.constant 0 : index
    %c0_6 = arith.constant 0 : index
    %c0_7 = arith.constant 0 : index
    %11 = vector.load %arg2[%c0_5, %c0_6, %c0_7] : memref<8x32x96xf32, #tpu.memory_space<vmem>>, vector<1x32x96xf32>
    %12 = vector.shape_cast %11 : vector<1x32x96xf32> to vector<32x96xf32>
    %cst = arith.constant dense<0.000000e+00> : vector<32x256xf32>
    %13 = tpu.matmul %12, %10, %cst {dimension_numbers = #tpu.dot_dimension_numbers<[1], [0], [0], [1], [0, 0, 1, 1], [], []>} : vector<32x96xf32>, vector<96x256xf32>, vector<32x256xf32> -> vector<32x256xf32>
    %c0_8 = arith.constant 0 : index
    %c0_9 = arith.constant 0 : index
    %c0_10 = arith.constant 0 : index
    %14 = vector.load %arg3[%c0_8, %c0_9, %c0_10] : memref<8x32x1xf32, #tpu.memory_space<vmem>>, vector<1x32x1xf32>
    %15 = vector.shape_cast %14 : vector<1x32x1xf32> to vector<32x1xf32>
    %16 = vector.broadcast %15 : vector<32x1xf32> to vector<32x256xf32>
    %17 = arith.addf %13, %16 : vector<32x256xf32>
    %18 = vector.broadcast %2 : vector<1x256xf32> to vector<32x256xf32>
    %19 = arith.mulf %17, %18 : vector<32x256xf32>
    %cst_11 = arith.constant dense<0.000000e+00> : vector<32xf32>
    %20 = vector.multi_reduction <add>, %19, %cst_11 [1] : vector<32x256xf32> to vector<32xf32>
    %21 = vector.shape_cast %20 : vector<32xf32> to vector<32x1xf32>
    %cst_12 = arith.constant 3.125000e-02 : f32
    %22 = vector.broadcast %cst_12 : f32 to vector<32x1xf32>
    %23 = arith.mulf %21, %22 : vector<32x1xf32>
    %24 = vector.broadcast %23 : vector<32x1xf32> to vector<32x256xf32>
    %25 = arith.subf %17, %24 : vector<32x256xf32>
    %26 = vector.broadcast %2 : vector<1x256xf32> to vector<32x256xf32>
    %27 = arith.mulf %25, %26 : vector<32x256xf32>
    %28 = arith.mulf %27, %27 : vector<32x256xf32>
    %cst_13 = arith.constant dense<0.000000e+00> : vector<32xf32>
    %29 = vector.multi_reduction <add>, %28, %cst_13 [1] : vector<32x256xf32> to vector<32xf32>
    %30 = vector.shape_cast %29 : vector<32xf32> to vector<32x1xf32>
    %cst_14 = arith.constant 3.125000e-02 : f32
    %31 = vector.broadcast %cst_14 : f32 to vector<32x1xf32>
    %32 = arith.mulf %30, %31 : vector<32x1xf32>
    %c0_15 = arith.constant 0 : index
    %c0_16 = arith.constant 0 : index
    %c0_17 = arith.constant 0 : index
    %33 = vector.load %arg4[%c0_15, %c0_16, %c0_17] : memref<8x32x1xf32, #tpu.memory_space<vmem>>, vector<1x32x1xf32>
    %34 = vector.shape_cast %33 : vector<1x32x1xf32> to vector<32x1xf32>
    %cst_18 = arith.constant 9.99999974E-6 : f32
    %35 = vector.broadcast %cst_18 : f32 to vector<32x1xf32>
    %36 = arith.addf %32, %35 : vector<32x1xf32>
    %37 = math.rsqrt %36 : vector<32x1xf32>
    %38 = arith.mulf %34, %37 : vector<32x1xf32>
    %c0_19 = arith.constant 0 : index
    %c0_20 = arith.constant 0 : index
    %c0_21 = arith.constant 0 : index
    %39 = vector.load %arg5[%c0_19, %c0_20, %c0_21] : memref<8x32x1xf32, #tpu.memory_space<vmem>>, vector<1x32x1xf32>
    %40 = vector.shape_cast %39 : vector<1x32x1xf32> to vector<32x1xf32>
    %41 = arith.mulf %23, %38 : vector<32x1xf32>
    %42 = arith.subf %40, %41 : vector<32x1xf32>
    %43 = vector.broadcast %38 : vector<32x1xf32> to vector<32x256xf32>
    %44 = arith.mulf %17, %43 : vector<32x256xf32>
    %45 = vector.broadcast %42 : vector<32x1xf32> to vector<32x256xf32>
    %46 = arith.addf %44, %45 : vector<32x256xf32>
    %cst_22 = arith.constant 0.000000e+00 : f32
    %47 = vector.broadcast %cst_22 : f32 to vector<32x256xf32>
    %48 = arith.maximumf %46, %47 : vector<32x256xf32>
    %49 = vector.broadcast %2 : vector<1x256xf32> to vector<32x256xf32>
    %50 = arith.mulf %48, %49 : vector<32x256xf32>
    %c1_i32_23 = arith.constant 1 : i32
    %51 = tpu.dynamic_rotate %50 by %c1_i32_23 dim 1 : vector<32x256xf32>, i32 -> vector<32x256xf32>
    %52 = vector.broadcast %0 : vector<1x256xf32> to vector<32x256xf32>
    %53 = arith.mulf %51, %52 : vector<32x256xf32>
    %c255_i32_24 = arith.constant 255 : i32
    %54 = tpu.dynamic_rotate %50 by %c255_i32_24 dim 1 : vector<32x256xf32>, i32 -> vector<32x256xf32>
    %55 = vector.broadcast %1 : vector<1x256xf32> to vector<32x256xf32>
    %56 = arith.mulf %54, %55 : vector<32x256xf32>
    %57 = tpu.concatenate %53, %50, %56 in 0 : vector<32x256xf32>, vector<32x256xf32>, vector<32x256xf32> -> vector<96x256xf32>
    %c1_25 = arith.constant 1 : index
    %c0_26 = arith.constant 0 : index
    %c0_27 = arith.constant 0 : index
    %58 = vector.load %arg2[%c1_25, %c0_26, %c0_27] : memref<8x32x96xf32, #tpu.memory_space<vmem>>, vector<1x32x96xf32>
    %59 = vector.shape_cast %58 : vector<1x32x96xf32> to vector<32x96xf32>
    %cst_28 = arith.constant dense<0.000000e+00> : vector<32x256xf32>
    %60 = tpu.matmul %59, %57, %cst_28 {dimension_numbers = #tpu.dot_dimension_numbers<[1], [0], [0], [1], [0, 0, 1, 1], [], []>} : vector<32x96xf32>, vector<96x256xf32>, vector<32x256xf32> -> vector<32x256xf32>
    %c1_29 = arith.constant 1 : index
    %c0_30 = arith.constant 0 : index
    %c0_31 = arith.constant 0 : index
    %61 = vector.load %arg3[%c1_29, %c0_30, %c0_31] : memref<8x32x1xf32, #tpu.memory_space<vmem>>, vector<1x32x1xf32>
    %62 = vector.shape_cast %61 : vector<1x32x1xf32> to vector<32x1xf32>
    %63 = vector.broadcast %62 : vector<32x1xf32> to vector<32x256xf32>
    %64 = arith.addf %60, %63 : vector<32x256xf32>
    %65 = vector.broadcast %2 : vector<1x256xf32> to vector<32x256xf32>
    %66 = arith.mulf %64, %65 : vector<32x256xf32>
    %cst_32 = arith.constant dense<0.000000e+00> : vector<32xf32>
    %67 = vector.multi_reduction <add>, %66, %cst_32 [1] : vector<32x256xf32> to vector<32xf32>
    %68 = vector.shape_cast %67 : vector<32xf32> to vector<32x1xf32>
    %cst_33 = arith.constant 3.125000e-02 : f32
    %69 = vector.broadcast %cst_33 : f32 to vector<32x1xf32>
    %70 = arith.mulf %68, %69 : vector<32x1xf32>
    %71 = vector.broadcast %70 : vector<32x1xf32> to vector<32x256xf32>
    %72 = arith.subf %64, %71 : vector<32x256xf32>
    %73 = vector.broadcast %2 : vector<1x256xf32> to vector<32x256xf32>
    %74 = arith.mulf %72, %73 : vector<32x256xf32>
    %75 = arith.mulf %74, %74 : vector<32x256xf32>
    %cst_34 = arith.constant dense<0.000000e+00> : vector<32xf32>
    %76 = vector.multi_reduction <add>, %75, %cst_34 [1] : vector<32x256xf32> to vector<32xf32>
    %77 = vector.shape_cast %76 : vector<32xf32> to vector<32x1xf32>
    %cst_35 = arith.constant 3.125000e-02 : f32
    %78 = vector.broadcast %cst_35 : f32 to vector<32x1xf32>
    %79 = arith.mulf %77, %78 : vector<32x1xf32>
    %c1_36 = arith.constant 1 : index
    %c0_37 = arith.constant 0 : index
    %c0_38 = arith.constant 0 : index
    %80 = vector.load %arg4[%c1_36, %c0_37, %c0_38] : memref<8x32x1xf32, #tpu.memory_space<vmem>>, vector<1x32x1xf32>
    %81 = vector.shape_cast %80 : vector<1x32x1xf32> to vector<32x1xf32>
    %cst_39 = arith.constant 9.99999974E-6 : f32
    %82 = vector.broadcast %cst_39 : f32 to vector<32x1xf32>
    %83 = arith.addf %79, %82 : vector<32x1xf32>
    %84 = math.rsqrt %83 : vector<32x1xf32>
    %85 = arith.mulf %81, %84 : vector<32x1xf32>
    %c1_40 = arith.constant 1 : index
    %c0_41 = arith.constant 0 : index
    %c0_42 = arith.constant 0 : index
    %86 = vector.load %arg5[%c1_40, %c0_41, %c0_42] : memref<8x32x1xf32, #tpu.memory_space<vmem>>, vector<1x32x1xf32>
    %87 = vector.shape_cast %86 : vector<1x32x1xf32> to vector<32x1xf32>
    %88 = arith.mulf %70, %85 : vector<32x1xf32>
    %89 = arith.subf %87, %88 : vector<32x1xf32>
    %90 = vector.broadcast %85 : vector<32x1xf32> to vector<32x256xf32>
    %91 = arith.mulf %64, %90 : vector<32x256xf32>
    %92 = vector.broadcast %89 : vector<32x1xf32> to vector<32x256xf32>
    %93 = arith.addf %91, %92 : vector<32x256xf32>
    %cst_43 = arith.constant 0.000000e+00 : f32
    %94 = vector.broadcast %cst_43 : f32 to vector<32x256xf32>
    %95 = arith.maximumf %93, %94 : vector<32x256xf32>
    %96 = vector.broadcast %2 : vector<1x256xf32> to vector<32x256xf32>
    %97 = arith.mulf %95, %96 : vector<32x256xf32>
    %c1_i32_44 = arith.constant 1 : i32
    %98 = tpu.dynamic_rotate %97 by %c1_i32_44 dim 1 : vector<32x256xf32>, i32 -> vector<32x256xf32>
    %99 = vector.broadcast %0 : vector<1x256xf32> to vector<32x256xf32>
    %100 = arith.mulf %98, %99 : vector<32x256xf32>
    %c255_i32_45 = arith.constant 255 : i32
    %101 = tpu.dynamic_rotate %97 by %c255_i32_45 dim 1 : vector<32x256xf32>, i32 -> vector<32x256xf32>
    %102 = vector.broadcast %1 : vector<1x256xf32> to vector<32x256xf32>
    %103 = arith.mulf %101, %102 : vector<32x256xf32>
    %104 = tpu.concatenate %100, %97, %103 in 0 : vector<32x256xf32>, vector<32x256xf32>, vector<32x256xf32> -> vector<96x256xf32>
    %c2_46 = arith.constant 2 : index
    %c0_47 = arith.constant 0 : index
    %c0_48 = arith.constant 0 : index
    %105 = vector.load %arg2[%c2_46, %c0_47, %c0_48] : memref<8x32x96xf32, #tpu.memory_space<vmem>>, vector<1x32x96xf32>
    %106 = vector.shape_cast %105 : vector<1x32x96xf32> to vector<32x96xf32>
    %cst_49 = arith.constant dense<0.000000e+00> : vector<32x256xf32>
    %107 = tpu.matmul %106, %104, %cst_49 {dimension_numbers = #tpu.dot_dimension_numbers<[1], [0], [0], [1], [0, 0, 1, 1], [], []>} : vector<32x96xf32>, vector<96x256xf32>, vector<32x256xf32> -> vector<32x256xf32>
    %c2_50 = arith.constant 2 : index
    %c0_51 = arith.constant 0 : index
    %c0_52 = arith.constant 0 : index
    %108 = vector.load %arg3[%c2_50, %c0_51, %c0_52] : memref<8x32x1xf32, #tpu.memory_space<vmem>>, vector<1x32x1xf32>
    %109 = vector.shape_cast %108 : vector<1x32x1xf32> to vector<32x1xf32>
    %110 = vector.broadcast %109 : vector<32x1xf32> to vector<32x256xf32>
    %111 = arith.addf %107, %110 : vector<32x256xf32>
    %112 = vector.broadcast %2 : vector<1x256xf32> to vector<32x256xf32>
    %113 = arith.mulf %111, %112 : vector<32x256xf32>
    %cst_53 = arith.constant dense<0.000000e+00> : vector<32xf32>
    %114 = vector.multi_reduction <add>, %113, %cst_53 [1] : vector<32x256xf32> to vector<32xf32>
    %115 = vector.shape_cast %114 : vector<32xf32> to vector<32x1xf32>
    %cst_54 = arith.constant 3.125000e-02 : f32
    %116 = vector.broadcast %cst_54 : f32 to vector<32x1xf32>
    %117 = arith.mulf %115, %116 : vector<32x1xf32>
    %118 = vector.broadcast %117 : vector<32x1xf32> to vector<32x256xf32>
    %119 = arith.subf %111, %118 : vector<32x256xf32>
    %120 = vector.broadcast %2 : vector<1x256xf32> to vector<32x256xf32>
    %121 = arith.mulf %119, %120 : vector<32x256xf32>
    %122 = arith.mulf %121, %121 : vector<32x256xf32>
    %cst_55 = arith.constant dense<0.000000e+00> : vector<32xf32>
    %123 = vector.multi_reduction <add>, %122, %cst_55 [1] : vector<32x256xf32> to vector<32xf32>
    %124 = vector.shape_cast %123 : vector<32xf32> to vector<32x1xf32>
    %cst_56 = arith.constant 3.125000e-02 : f32
    %125 = vector.broadcast %cst_56 : f32 to vector<32x1xf32>
    %126 = arith.mulf %124, %125 : vector<32x1xf32>
    %c2_57 = arith.constant 2 : index
    %c0_58 = arith.constant 0 : index
    %c0_59 = arith.constant 0 : index
    %127 = vector.load %arg4[%c2_57, %c0_58, %c0_59] : memref<8x32x1xf32, #tpu.memory_space<vmem>>, vector<1x32x1xf32>
    %128 = vector.shape_cast %127 : vector<1x32x1xf32> to vector<32x1xf32>
    %cst_60 = arith.constant 9.99999974E-6 : f32
    %129 = vector.broadcast %cst_60 : f32 to vector<32x1xf32>
    %130 = arith.addf %126, %129 : vector<32x1xf32>
    %131 = math.rsqrt %130 : vector<32x1xf32>
    %132 = arith.mulf %128, %131 : vector<32x1xf32>
    %c2_61 = arith.constant 2 : index
    %c0_62 = arith.constant 0 : index
    %c0_63 = arith.constant 0 : index
    %133 = vector.load %arg5[%c2_61, %c0_62, %c0_63] : memref<8x32x1xf32, #tpu.memory_space<vmem>>, vector<1x32x1xf32>
    %134 = vector.shape_cast %133 : vector<1x32x1xf32> to vector<32x1xf32>
    %135 = arith.mulf %117, %132 : vector<32x1xf32>
    %136 = arith.subf %134, %135 : vector<32x1xf32>
    %137 = vector.broadcast %132 : vector<32x1xf32> to vector<32x256xf32>
    %138 = arith.mulf %111, %137 : vector<32x256xf32>
    %139 = vector.broadcast %136 : vector<32x1xf32> to vector<32x256xf32>
    %140 = arith.addf %138, %139 : vector<32x256xf32>
    %cst_64 = arith.constant 0.000000e+00 : f32
    %141 = vector.broadcast %cst_64 : f32 to vector<32x256xf32>
    %142 = arith.maximumf %140, %141 : vector<32x256xf32>
    %143 = vector.broadcast %2 : vector<1x256xf32> to vector<32x256xf32>
    %144 = arith.mulf %142, %143 : vector<32x256xf32>
    %c1_i32_65 = arith.constant 1 : i32
    %145 = tpu.dynamic_rotate %144 by %c1_i32_65 dim 1 : vector<32x256xf32>, i32 -> vector<32x256xf32>
    %146 = vector.broadcast %0 : vector<1x256xf32> to vector<32x256xf32>
    %147 = arith.mulf %145, %146 : vector<32x256xf32>
    %c255_i32_66 = arith.constant 255 : i32
    %148 = tpu.dynamic_rotate %144 by %c255_i32_66 dim 1 : vector<32x256xf32>, i32 -> vector<32x256xf32>
    %149 = vector.broadcast %1 : vector<1x256xf32> to vector<32x256xf32>
    %150 = arith.mulf %148, %149 : vector<32x256xf32>
    %151 = tpu.concatenate %147, %144, %150 in 0 : vector<32x256xf32>, vector<32x256xf32>, vector<32x256xf32> -> vector<96x256xf32>
    %c3 = arith.constant 3 : index
    %c0_67 = arith.constant 0 : index
    %c0_68 = arith.constant 0 : index
    %152 = vector.load %arg2[%c3, %c0_67, %c0_68] : memref<8x32x96xf32, #tpu.memory_space<vmem>>, vector<1x32x96xf32>
    %153 = vector.shape_cast %152 : vector<1x32x96xf32> to vector<32x96xf32>
    %cst_69 = arith.constant dense<0.000000e+00> : vector<32x256xf32>
    %154 = tpu.matmul %153, %151, %cst_69 {dimension_numbers = #tpu.dot_dimension_numbers<[1], [0], [0], [1], [0, 0, 1, 1], [], []>} : vector<32x96xf32>, vector<96x256xf32>, vector<32x256xf32> -> vector<32x256xf32>
    %c3_70 = arith.constant 3 : index
    %c0_71 = arith.constant 0 : index
    %c0_72 = arith.constant 0 : index
    %155 = vector.load %arg3[%c3_70, %c0_71, %c0_72] : memref<8x32x1xf32, #tpu.memory_space<vmem>>, vector<1x32x1xf32>
    %156 = vector.shape_cast %155 : vector<1x32x1xf32> to vector<32x1xf32>
    %157 = vector.broadcast %156 : vector<32x1xf32> to vector<32x256xf32>
    %158 = arith.addf %154, %157 : vector<32x256xf32>
    %159 = vector.broadcast %2 : vector<1x256xf32> to vector<32x256xf32>
    %160 = arith.mulf %158, %159 : vector<32x256xf32>
    %cst_73 = arith.constant dense<0.000000e+00> : vector<32xf32>
    %161 = vector.multi_reduction <add>, %160, %cst_73 [1] : vector<32x256xf32> to vector<32xf32>
    %162 = vector.shape_cast %161 : vector<32xf32> to vector<32x1xf32>
    %cst_74 = arith.constant 3.125000e-02 : f32
    %163 = vector.broadcast %cst_74 : f32 to vector<32x1xf32>
    %164 = arith.mulf %162, %163 : vector<32x1xf32>
    %165 = vector.broadcast %164 : vector<32x1xf32> to vector<32x256xf32>
    %166 = arith.subf %158, %165 : vector<32x256xf32>
    %167 = vector.broadcast %2 : vector<1x256xf32> to vector<32x256xf32>
    %168 = arith.mulf %166, %167 : vector<32x256xf32>
    %169 = arith.mulf %168, %168 : vector<32x256xf32>
    %cst_75 = arith.constant dense<0.000000e+00> : vector<32xf32>
    %170 = vector.multi_reduction <add>, %169, %cst_75 [1] : vector<32x256xf32> to vector<32xf32>
    %171 = vector.shape_cast %170 : vector<32xf32> to vector<32x1xf32>
    %cst_76 = arith.constant 3.125000e-02 : f32
    %172 = vector.broadcast %cst_76 : f32 to vector<32x1xf32>
    %173 = arith.mulf %171, %172 : vector<32x1xf32>
    %c3_77 = arith.constant 3 : index
    %c0_78 = arith.constant 0 : index
    %c0_79 = arith.constant 0 : index
    %174 = vector.load %arg4[%c3_77, %c0_78, %c0_79] : memref<8x32x1xf32, #tpu.memory_space<vmem>>, vector<1x32x1xf32>
    %175 = vector.shape_cast %174 : vector<1x32x1xf32> to vector<32x1xf32>
    %cst_80 = arith.constant 9.99999974E-6 : f32
    %176 = vector.broadcast %cst_80 : f32 to vector<32x1xf32>
    %177 = arith.addf %173, %176 : vector<32x1xf32>
    %178 = math.rsqrt %177 : vector<32x1xf32>
    %179 = arith.mulf %175, %178 : vector<32x1xf32>
    %c3_81 = arith.constant 3 : index
    %c0_82 = arith.constant 0 : index
    %c0_83 = arith.constant 0 : index
    %180 = vector.load %arg5[%c3_81, %c0_82, %c0_83] : memref<8x32x1xf32, #tpu.memory_space<vmem>>, vector<1x32x1xf32>
    %181 = vector.shape_cast %180 : vector<1x32x1xf32> to vector<32x1xf32>
    %182 = arith.mulf %164, %179 : vector<32x1xf32>
    %183 = arith.subf %181, %182 : vector<32x1xf32>
    %184 = vector.broadcast %179 : vector<32x1xf32> to vector<32x256xf32>
    %185 = arith.mulf %158, %184 : vector<32x256xf32>
    %186 = vector.broadcast %183 : vector<32x1xf32> to vector<32x256xf32>
    %187 = arith.addf %185, %186 : vector<32x256xf32>
    %cst_84 = arith.constant 0.000000e+00 : f32
    %188 = vector.broadcast %cst_84 : f32 to vector<32x256xf32>
    %189 = arith.maximumf %187, %188 : vector<32x256xf32>
    %190 = vector.broadcast %2 : vector<1x256xf32> to vector<32x256xf32>
    %191 = arith.mulf %189, %190 : vector<32x256xf32>
    %c1_i32_85 = arith.constant 1 : i32
    %192 = tpu.dynamic_rotate %191 by %c1_i32_85 dim 1 : vector<32x256xf32>, i32 -> vector<32x256xf32>
    %193 = vector.broadcast %0 : vector<1x256xf32> to vector<32x256xf32>
    %194 = arith.mulf %192, %193 : vector<32x256xf32>
    %c255_i32_86 = arith.constant 255 : i32
    %195 = tpu.dynamic_rotate %191 by %c255_i32_86 dim 1 : vector<32x256xf32>, i32 -> vector<32x256xf32>
    %196 = vector.broadcast %1 : vector<1x256xf32> to vector<32x256xf32>
    %197 = arith.mulf %195, %196 : vector<32x256xf32>
    %198 = tpu.concatenate %194, %191, %197 in 0 : vector<32x256xf32>, vector<32x256xf32>, vector<32x256xf32> -> vector<96x256xf32>
    %c4 = arith.constant 4 : index
    %c0_87 = arith.constant 0 : index
    %c0_88 = arith.constant 0 : index
    %199 = vector.load %arg2[%c4, %c0_87, %c0_88] : memref<8x32x96xf32, #tpu.memory_space<vmem>>, vector<1x32x96xf32>
    %200 = vector.shape_cast %199 : vector<1x32x96xf32> to vector<32x96xf32>
    %cst_89 = arith.constant dense<0.000000e+00> : vector<32x256xf32>
    %201 = tpu.matmul %200, %198, %cst_89 {dimension_numbers = #tpu.dot_dimension_numbers<[1], [0], [0], [1], [0, 0, 1, 1], [], []>} : vector<32x96xf32>, vector<96x256xf32>, vector<32x256xf32> -> vector<32x256xf32>
    %c4_90 = arith.constant 4 : index
    %c0_91 = arith.constant 0 : index
    %c0_92 = arith.constant 0 : index
    %202 = vector.load %arg3[%c4_90, %c0_91, %c0_92] : memref<8x32x1xf32, #tpu.memory_space<vmem>>, vector<1x32x1xf32>
    %203 = vector.shape_cast %202 : vector<1x32x1xf32> to vector<32x1xf32>
    %204 = vector.broadcast %203 : vector<32x1xf32> to vector<32x256xf32>
    %205 = arith.addf %201, %204 : vector<32x256xf32>
    %206 = vector.broadcast %2 : vector<1x256xf32> to vector<32x256xf32>
    %207 = arith.mulf %205, %206 : vector<32x256xf32>
    %cst_93 = arith.constant dense<0.000000e+00> : vector<32xf32>
    %208 = vector.multi_reduction <add>, %207, %cst_93 [1] : vector<32x256xf32> to vector<32xf32>
    %209 = vector.shape_cast %208 : vector<32xf32> to vector<32x1xf32>
    %cst_94 = arith.constant 3.125000e-02 : f32
    %210 = vector.broadcast %cst_94 : f32 to vector<32x1xf32>
    %211 = arith.mulf %209, %210 : vector<32x1xf32>
    %212 = vector.broadcast %211 : vector<32x1xf32> to vector<32x256xf32>
    %213 = arith.subf %205, %212 : vector<32x256xf32>
    %214 = vector.broadcast %2 : vector<1x256xf32> to vector<32x256xf32>
    %215 = arith.mulf %213, %214 : vector<32x256xf32>
    %216 = arith.mulf %215, %215 : vector<32x256xf32>
    %cst_95 = arith.constant dense<0.000000e+00> : vector<32xf32>
    %217 = vector.multi_reduction <add>, %216, %cst_95 [1] : vector<32x256xf32> to vector<32xf32>
    %218 = vector.shape_cast %217 : vector<32xf32> to vector<32x1xf32>
    %cst_96 = arith.constant 3.125000e-02 : f32
    %219 = vector.broadcast %cst_96 : f32 to vector<32x1xf32>
    %220 = arith.mulf %218, %219 : vector<32x1xf32>
    %c4_97 = arith.constant 4 : index
    %c0_98 = arith.constant 0 : index
    %c0_99 = arith.constant 0 : index
    %221 = vector.load %arg4[%c4_97, %c0_98, %c0_99] : memref<8x32x1xf32, #tpu.memory_space<vmem>>, vector<1x32x1xf32>
    %222 = vector.shape_cast %221 : vector<1x32x1xf32> to vector<32x1xf32>
    %cst_100 = arith.constant 9.99999974E-6 : f32
    %223 = vector.broadcast %cst_100 : f32 to vector<32x1xf32>
    %224 = arith.addf %220, %223 : vector<32x1xf32>
    %225 = math.rsqrt %224 : vector<32x1xf32>
    %226 = arith.mulf %222, %225 : vector<32x1xf32>
    %c4_101 = arith.constant 4 : index
    %c0_102 = arith.constant 0 : index
    %c0_103 = arith.constant 0 : index
    %227 = vector.load %arg5[%c4_101, %c0_102, %c0_103] : memref<8x32x1xf32, #tpu.memory_space<vmem>>, vector<1x32x1xf32>
    %228 = vector.shape_cast %227 : vector<1x32x1xf32> to vector<32x1xf32>
    %229 = arith.mulf %211, %226 : vector<32x1xf32>
    %230 = arith.subf %228, %229 : vector<32x1xf32>
    %231 = vector.broadcast %226 : vector<32x1xf32> to vector<32x256xf32>
    %232 = arith.mulf %205, %231 : vector<32x256xf32>
    %233 = vector.broadcast %230 : vector<32x1xf32> to vector<32x256xf32>
    %234 = arith.addf %232, %233 : vector<32x256xf32>
    %cst_104 = arith.constant 0.000000e+00 : f32
    %235 = vector.broadcast %cst_104 : f32 to vector<32x256xf32>
    %236 = arith.maximumf %234, %235 : vector<32x256xf32>
    %237 = vector.broadcast %2 : vector<1x256xf32> to vector<32x256xf32>
    %238 = arith.mulf %236, %237 : vector<32x256xf32>
    %c1_i32_105 = arith.constant 1 : i32
    %239 = tpu.dynamic_rotate %238 by %c1_i32_105 dim 1 : vector<32x256xf32>, i32 -> vector<32x256xf32>
    %240 = vector.broadcast %0 : vector<1x256xf32> to vector<32x256xf32>
    %241 = arith.mulf %239, %240 : vector<32x256xf32>
    %c255_i32_106 = arith.constant 255 : i32
    %242 = tpu.dynamic_rotate %238 by %c255_i32_106 dim 1 : vector<32x256xf32>, i32 -> vector<32x256xf32>
    %243 = vector.broadcast %1 : vector<1x256xf32> to vector<32x256xf32>
    %244 = arith.mulf %242, %243 : vector<32x256xf32>
    %245 = tpu.concatenate %241, %238, %244 in 0 : vector<32x256xf32>, vector<32x256xf32>, vector<32x256xf32> -> vector<96x256xf32>
    %c5 = arith.constant 5 : index
    %c0_107 = arith.constant 0 : index
    %c0_108 = arith.constant 0 : index
    %246 = vector.load %arg2[%c5, %c0_107, %c0_108] : memref<8x32x96xf32, #tpu.memory_space<vmem>>, vector<1x32x96xf32>
    %247 = vector.shape_cast %246 : vector<1x32x96xf32> to vector<32x96xf32>
    %cst_109 = arith.constant dense<0.000000e+00> : vector<32x256xf32>
    %248 = tpu.matmul %247, %245, %cst_109 {dimension_numbers = #tpu.dot_dimension_numbers<[1], [0], [0], [1], [0, 0, 1, 1], [], []>} : vector<32x96xf32>, vector<96x256xf32>, vector<32x256xf32> -> vector<32x256xf32>
    %c5_110 = arith.constant 5 : index
    %c0_111 = arith.constant 0 : index
    %c0_112 = arith.constant 0 : index
    %249 = vector.load %arg3[%c5_110, %c0_111, %c0_112] : memref<8x32x1xf32, #tpu.memory_space<vmem>>, vector<1x32x1xf32>
    %250 = vector.shape_cast %249 : vector<1x32x1xf32> to vector<32x1xf32>
    %251 = vector.broadcast %250 : vector<32x1xf32> to vector<32x256xf32>
    %252 = arith.addf %248, %251 : vector<32x256xf32>
    %253 = vector.broadcast %2 : vector<1x256xf32> to vector<32x256xf32>
    %254 = arith.mulf %252, %253 : vector<32x256xf32>
    %cst_113 = arith.constant dense<0.000000e+00> : vector<32xf32>
    %255 = vector.multi_reduction <add>, %254, %cst_113 [1] : vector<32x256xf32> to vector<32xf32>
    %256 = vector.shape_cast %255 : vector<32xf32> to vector<32x1xf32>
    %cst_114 = arith.constant 3.125000e-02 : f32
    %257 = vector.broadcast %cst_114 : f32 to vector<32x1xf32>
    %258 = arith.mulf %256, %257 : vector<32x1xf32>
    %259 = vector.broadcast %258 : vector<32x1xf32> to vector<32x256xf32>
    %260 = arith.subf %252, %259 : vector<32x256xf32>
    %261 = vector.broadcast %2 : vector<1x256xf32> to vector<32x256xf32>
    %262 = arith.mulf %260, %261 : vector<32x256xf32>
    %263 = arith.mulf %262, %262 : vector<32x256xf32>
    %cst_115 = arith.constant dense<0.000000e+00> : vector<32xf32>
    %264 = vector.multi_reduction <add>, %263, %cst_115 [1] : vector<32x256xf32> to vector<32xf32>
    %265 = vector.shape_cast %264 : vector<32xf32> to vector<32x1xf32>
    %cst_116 = arith.constant 3.125000e-02 : f32
    %266 = vector.broadcast %cst_116 : f32 to vector<32x1xf32>
    %267 = arith.mulf %265, %266 : vector<32x1xf32>
    %c5_117 = arith.constant 5 : index
    %c0_118 = arith.constant 0 : index
    %c0_119 = arith.constant 0 : index
    %268 = vector.load %arg4[%c5_117, %c0_118, %c0_119] : memref<8x32x1xf32, #tpu.memory_space<vmem>>, vector<1x32x1xf32>
    %269 = vector.shape_cast %268 : vector<1x32x1xf32> to vector<32x1xf32>
    %cst_120 = arith.constant 9.99999974E-6 : f32
    %270 = vector.broadcast %cst_120 : f32 to vector<32x1xf32>
    %271 = arith.addf %267, %270 : vector<32x1xf32>
    %272 = math.rsqrt %271 : vector<32x1xf32>
    %273 = arith.mulf %269, %272 : vector<32x1xf32>
    %c5_121 = arith.constant 5 : index
    %c0_122 = arith.constant 0 : index
    %c0_123 = arith.constant 0 : index
    %274 = vector.load %arg5[%c5_121, %c0_122, %c0_123] : memref<8x32x1xf32, #tpu.memory_space<vmem>>, vector<1x32x1xf32>
    %275 = vector.shape_cast %274 : vector<1x32x1xf32> to vector<32x1xf32>
    %276 = arith.mulf %258, %273 : vector<32x1xf32>
    %277 = arith.subf %275, %276 : vector<32x1xf32>
    %278 = vector.broadcast %273 : vector<32x1xf32> to vector<32x256xf32>
    %279 = arith.mulf %252, %278 : vector<32x256xf32>
    %280 = vector.broadcast %277 : vector<32x1xf32> to vector<32x256xf32>
    %281 = arith.addf %279, %280 : vector<32x256xf32>
    %cst_124 = arith.constant 0.000000e+00 : f32
    %282 = vector.broadcast %cst_124 : f32 to vector<32x256xf32>
    %283 = arith.maximumf %281, %282 : vector<32x256xf32>
    %284 = vector.broadcast %2 : vector<1x256xf32> to vector<32x256xf32>
    %285 = arith.mulf %283, %284 : vector<32x256xf32>
    %c1_i32_125 = arith.constant 1 : i32
    %286 = tpu.dynamic_rotate %285 by %c1_i32_125 dim 1 : vector<32x256xf32>, i32 -> vector<32x256xf32>
    %287 = vector.broadcast %0 : vector<1x256xf32> to vector<32x256xf32>
    %288 = arith.mulf %286, %287 : vector<32x256xf32>
    %c255_i32_126 = arith.constant 255 : i32
    %289 = tpu.dynamic_rotate %285 by %c255_i32_126 dim 1 : vector<32x256xf32>, i32 -> vector<32x256xf32>
    %290 = vector.broadcast %1 : vector<1x256xf32> to vector<32x256xf32>
    %291 = arith.mulf %289, %290 : vector<32x256xf32>
    %292 = tpu.concatenate %288, %285, %291 in 0 : vector<32x256xf32>, vector<32x256xf32>, vector<32x256xf32> -> vector<96x256xf32>
    %c6 = arith.constant 6 : index
    %c0_127 = arith.constant 0 : index
    %c0_128 = arith.constant 0 : index
    %293 = vector.load %arg2[%c6, %c0_127, %c0_128] : memref<8x32x96xf32, #tpu.memory_space<vmem>>, vector<1x32x96xf32>
    %294 = vector.shape_cast %293 : vector<1x32x96xf32> to vector<32x96xf32>
    %cst_129 = arith.constant dense<0.000000e+00> : vector<32x256xf32>
    %295 = tpu.matmul %294, %292, %cst_129 {dimension_numbers = #tpu.dot_dimension_numbers<[1], [0], [0], [1], [0, 0, 1, 1], [], []>} : vector<32x96xf32>, vector<96x256xf32>, vector<32x256xf32> -> vector<32x256xf32>
    %c6_130 = arith.constant 6 : index
    %c0_131 = arith.constant 0 : index
    %c0_132 = arith.constant 0 : index
    %296 = vector.load %arg3[%c6_130, %c0_131, %c0_132] : memref<8x32x1xf32, #tpu.memory_space<vmem>>, vector<1x32x1xf32>
    %297 = vector.shape_cast %296 : vector<1x32x1xf32> to vector<32x1xf32>
    %298 = vector.broadcast %297 : vector<32x1xf32> to vector<32x256xf32>
    %299 = arith.addf %295, %298 : vector<32x256xf32>
    %300 = vector.broadcast %2 : vector<1x256xf32> to vector<32x256xf32>
    %301 = arith.mulf %299, %300 : vector<32x256xf32>
    %cst_133 = arith.constant dense<0.000000e+00> : vector<32xf32>
    %302 = vector.multi_reduction <add>, %301, %cst_133 [1] : vector<32x256xf32> to vector<32xf32>
    %303 = vector.shape_cast %302 : vector<32xf32> to vector<32x1xf32>
    %cst_134 = arith.constant 3.125000e-02 : f32
    %304 = vector.broadcast %cst_134 : f32 to vector<32x1xf32>
    %305 = arith.mulf %303, %304 : vector<32x1xf32>
    %306 = vector.broadcast %305 : vector<32x1xf32> to vector<32x256xf32>
    %307 = arith.subf %299, %306 : vector<32x256xf32>
    %308 = vector.broadcast %2 : vector<1x256xf32> to vector<32x256xf32>
    %309 = arith.mulf %307, %308 : vector<32x256xf32>
    %310 = arith.mulf %309, %309 : vector<32x256xf32>
    %cst_135 = arith.constant dense<0.000000e+00> : vector<32xf32>
    %311 = vector.multi_reduction <add>, %310, %cst_135 [1] : vector<32x256xf32> to vector<32xf32>
    %312 = vector.shape_cast %311 : vector<32xf32> to vector<32x1xf32>
    %cst_136 = arith.constant 3.125000e-02 : f32
    %313 = vector.broadcast %cst_136 : f32 to vector<32x1xf32>
    %314 = arith.mulf %312, %313 : vector<32x1xf32>
    %c6_137 = arith.constant 6 : index
    %c0_138 = arith.constant 0 : index
    %c0_139 = arith.constant 0 : index
    %315 = vector.load %arg4[%c6_137, %c0_138, %c0_139] : memref<8x32x1xf32, #tpu.memory_space<vmem>>, vector<1x32x1xf32>
    %316 = vector.shape_cast %315 : vector<1x32x1xf32> to vector<32x1xf32>
    %cst_140 = arith.constant 9.99999974E-6 : f32
    %317 = vector.broadcast %cst_140 : f32 to vector<32x1xf32>
    %318 = arith.addf %314, %317 : vector<32x1xf32>
    %319 = math.rsqrt %318 : vector<32x1xf32>
    %320 = arith.mulf %316, %319 : vector<32x1xf32>
    %c6_141 = arith.constant 6 : index
    %c0_142 = arith.constant 0 : index
    %c0_143 = arith.constant 0 : index
    %321 = vector.load %arg5[%c6_141, %c0_142, %c0_143] : memref<8x32x1xf32, #tpu.memory_space<vmem>>, vector<1x32x1xf32>
    %322 = vector.shape_cast %321 : vector<1x32x1xf32> to vector<32x1xf32>
    %323 = arith.mulf %305, %320 : vector<32x1xf32>
    %324 = arith.subf %322, %323 : vector<32x1xf32>
    %325 = vector.broadcast %320 : vector<32x1xf32> to vector<32x256xf32>
    %326 = arith.mulf %299, %325 : vector<32x256xf32>
    %327 = vector.broadcast %324 : vector<32x1xf32> to vector<32x256xf32>
    %328 = arith.addf %326, %327 : vector<32x256xf32>
    %cst_144 = arith.constant 0.000000e+00 : f32
    %329 = vector.broadcast %cst_144 : f32 to vector<32x256xf32>
    %330 = arith.maximumf %328, %329 : vector<32x256xf32>
    %331 = vector.broadcast %2 : vector<1x256xf32> to vector<32x256xf32>
    %332 = arith.mulf %330, %331 : vector<32x256xf32>
    %c1_i32_145 = arith.constant 1 : i32
    %333 = tpu.dynamic_rotate %332 by %c1_i32_145 dim 1 : vector<32x256xf32>, i32 -> vector<32x256xf32>
    %334 = vector.broadcast %0 : vector<1x256xf32> to vector<32x256xf32>
    %335 = arith.mulf %333, %334 : vector<32x256xf32>
    %c255_i32_146 = arith.constant 255 : i32
    %336 = tpu.dynamic_rotate %332 by %c255_i32_146 dim 1 : vector<32x256xf32>, i32 -> vector<32x256xf32>
    %337 = vector.broadcast %1 : vector<1x256xf32> to vector<32x256xf32>
    %338 = arith.mulf %336, %337 : vector<32x256xf32>
    %339 = tpu.concatenate %335, %332, %338 in 0 : vector<32x256xf32>, vector<32x256xf32>, vector<32x256xf32> -> vector<96x256xf32>
    %c7 = arith.constant 7 : index
    %c0_147 = arith.constant 0 : index
    %c0_148 = arith.constant 0 : index
    %340 = vector.load %arg2[%c7, %c0_147, %c0_148] : memref<8x32x96xf32, #tpu.memory_space<vmem>>, vector<1x32x96xf32>
    %341 = vector.shape_cast %340 : vector<1x32x96xf32> to vector<32x96xf32>
    %cst_149 = arith.constant dense<0.000000e+00> : vector<32x256xf32>
    %342 = tpu.matmul %341, %339, %cst_149 {dimension_numbers = #tpu.dot_dimension_numbers<[1], [0], [0], [1], [0, 0, 1, 1], [], []>} : vector<32x96xf32>, vector<96x256xf32>, vector<32x256xf32> -> vector<32x256xf32>
    %c7_150 = arith.constant 7 : index
    %c0_151 = arith.constant 0 : index
    %c0_152 = arith.constant 0 : index
    %343 = vector.load %arg3[%c7_150, %c0_151, %c0_152] : memref<8x32x1xf32, #tpu.memory_space<vmem>>, vector<1x32x1xf32>
    %344 = vector.shape_cast %343 : vector<1x32x1xf32> to vector<32x1xf32>
    %345 = vector.broadcast %344 : vector<32x1xf32> to vector<32x256xf32>
    %346 = arith.addf %342, %345 : vector<32x256xf32>
    %347 = vector.broadcast %2 : vector<1x256xf32> to vector<32x256xf32>
    %348 = arith.mulf %346, %347 : vector<32x256xf32>
    %cst_153 = arith.constant dense<0.000000e+00> : vector<32xf32>
    %349 = vector.multi_reduction <add>, %348, %cst_153 [1] : vector<32x256xf32> to vector<32xf32>
    %350 = vector.shape_cast %349 : vector<32xf32> to vector<32x1xf32>
    %cst_154 = arith.constant 3.125000e-02 : f32
    %351 = vector.broadcast %cst_154 : f32 to vector<32x1xf32>
    %352 = arith.mulf %350, %351 : vector<32x1xf32>
    %353 = vector.broadcast %352 : vector<32x1xf32> to vector<32x256xf32>
    %354 = arith.subf %346, %353 : vector<32x256xf32>
    %355 = vector.broadcast %2 : vector<1x256xf32> to vector<32x256xf32>
    %356 = arith.mulf %354, %355 : vector<32x256xf32>
    %357 = arith.mulf %356, %356 : vector<32x256xf32>
    %cst_155 = arith.constant dense<0.000000e+00> : vector<32xf32>
    %358 = vector.multi_reduction <add>, %357, %cst_155 [1] : vector<32x256xf32> to vector<32xf32>
    %359 = vector.shape_cast %358 : vector<32xf32> to vector<32x1xf32>
    %cst_156 = arith.constant 3.125000e-02 : f32
    %360 = vector.broadcast %cst_156 : f32 to vector<32x1xf32>
    %361 = arith.mulf %359, %360 : vector<32x1xf32>
    %c7_157 = arith.constant 7 : index
    %c0_158 = arith.constant 0 : index
    %c0_159 = arith.constant 0 : index
    %362 = vector.load %arg4[%c7_157, %c0_158, %c0_159] : memref<8x32x1xf32, #tpu.memory_space<vmem>>, vector<1x32x1xf32>
    %363 = vector.shape_cast %362 : vector<1x32x1xf32> to vector<32x1xf32>
    %cst_160 = arith.constant 9.99999974E-6 : f32
    %364 = vector.broadcast %cst_160 : f32 to vector<32x1xf32>
    %365 = arith.addf %361, %364 : vector<32x1xf32>
    %366 = math.rsqrt %365 : vector<32x1xf32>
    %367 = arith.mulf %363, %366 : vector<32x1xf32>
    %c7_161 = arith.constant 7 : index
    %c0_162 = arith.constant 0 : index
    %c0_163 = arith.constant 0 : index
    %368 = vector.load %arg5[%c7_161, %c0_162, %c0_163] : memref<8x32x1xf32, #tpu.memory_space<vmem>>, vector<1x32x1xf32>
    %369 = vector.shape_cast %368 : vector<1x32x1xf32> to vector<32x1xf32>
    %370 = arith.mulf %352, %367 : vector<32x1xf32>
    %371 = arith.subf %369, %370 : vector<32x1xf32>
    %372 = vector.broadcast %367 : vector<32x1xf32> to vector<32x256xf32>
    %373 = arith.mulf %346, %372 : vector<32x256xf32>
    %374 = vector.broadcast %371 : vector<32x1xf32> to vector<32x256xf32>
    %375 = arith.addf %373, %374 : vector<32x256xf32>
    %cst_164 = arith.constant 0.000000e+00 : f32
    %376 = vector.broadcast %cst_164 : f32 to vector<32x256xf32>
    %377 = arith.maximumf %375, %376 : vector<32x256xf32>
    %378 = vector.broadcast %2 : vector<1x256xf32> to vector<32x256xf32>
    %379 = arith.mulf %377, %378 : vector<32x256xf32>
    %380 = vector.extract_strided_slice %379 {offsets = [0, 0], sizes = [32, 128], strides = [1, 1]} : vector<32x256xf32> to vector<32x128xf32>
    %cst_165 = arith.constant dense<0.000000e+00> : vector<32xf32>
    %381 = vector.multi_reduction <add>, %380, %cst_165 [1] : vector<32x128xf32> to vector<32xf32>
    %382 = vector.shape_cast %381 : vector<32xf32> to vector<32x1xf32>
    %383 = vector.extract_strided_slice %379 {offsets = [0, 128], sizes = [32, 128], strides = [1, 1]} : vector<32x256xf32> to vector<32x128xf32>
    %cst_166 = arith.constant dense<0.000000e+00> : vector<32xf32>
    %384 = vector.multi_reduction <add>, %383, %cst_166 [1] : vector<32x128xf32> to vector<32xf32>
    %385 = vector.shape_cast %384 : vector<32xf32> to vector<32x1xf32>
    %386 = tpu.concatenate %382, %385 in 1 : vector<32x1xf32>, vector<32x1xf32> -> vector<32x2xf32>
    %cst_167 = arith.constant 6.250000e-02 : f32
    %387 = vector.broadcast %cst_167 : f32 to vector<32x2xf32>
    %388 = arith.mulf %386, %387 : vector<32x2xf32>
    %c0_168 = arith.constant 0 : index
    %c0_169 = arith.constant 0 : index
    %389 = vector.load %arg6[%c0_168, %c0_169] : memref<2x32xf32, #tpu.memory_space<vmem>>, vector<2x32xf32>
    %cst_170 = arith.constant dense<0.000000e+00> : vector<2x2xf32>
    %390 = tpu.matmul %389, %388, %cst_170 {dimension_numbers = #tpu.dot_dimension_numbers<[1], [0], [0], [1], [0, 0, 1, 1], [], []>} : vector<2x32xf32>, vector<32x2xf32>, vector<2x2xf32> -> vector<2x2xf32>
    %c0_171 = arith.constant 0 : index
    %c0_172 = arith.constant 0 : index
    %391 = vector.load %arg7[%c0_171, %c0_172] : memref<2x1xf32, #tpu.memory_space<vmem>>, vector<2x1xf32>
    %392 = vector.broadcast %391 : vector<2x1xf32> to vector<2x2xf32>
    %393 = arith.addf %390, %392 : vector<2x2xf32>
    %cst_173 = arith.constant 0.000000e+00 : f32
    %394 = vector.broadcast %cst_173 : f32 to vector<2x2xf32>
    %395 = arith.maximumf %393, %394 : vector<2x2xf32>
    %c0_174 = arith.constant 0 : index
    %c0_175 = arith.constant 0 : index
    %396 = vector.load %arg8[%c0_174, %c0_175] : memref<32x2xf32, #tpu.memory_space<vmem>>, vector<32x2xf32>
    %cst_176 = arith.constant dense<0.000000e+00> : vector<32x2xf32>
    %397 = tpu.matmul %396, %395, %cst_176 {dimension_numbers = #tpu.dot_dimension_numbers<[1], [0], [0], [1], [0, 0, 1, 1], [], []>} : vector<32x2xf32>, vector<2x2xf32>, vector<32x2xf32> -> vector<32x2xf32>
    %c0_177 = arith.constant 0 : index
    %c0_178 = arith.constant 0 : index
    %398 = vector.load %arg9[%c0_177, %c0_178] : memref<32x1xf32, #tpu.memory_space<vmem>>, vector<32x1xf32>
    %399 = vector.broadcast %398 : vector<32x1xf32> to vector<32x2xf32>
    %400 = arith.addf %397, %399 : vector<32x2xf32>
    %401 = arith.negf %400 : vector<32x2xf32>
    %402 = math.exp %401 : vector<32x2xf32>
    %cst_179 = arith.constant 1.000000e+00 : f32
    %403 = vector.broadcast %cst_179 : f32 to vector<32x2xf32>
    %404 = arith.addf %403, %402 : vector<32x2xf32>
    %405 = arith.divf %403, %404 : vector<32x2xf32>
    %c0_180 = arith.constant 0 : index
    %406 = memref.load %arg10[%c0_180] : memref<1xf32, #tpu.memory_space<smem>>
    %407 = arith.negf %406 : f32
    %408 = math.exp %407 : f32
    %cst_181 = arith.constant 1.000000e+00 : f32
    %409 = arith.addf %cst_181, %408 : f32
    %410 = arith.divf %cst_181, %409 : f32
    %411 = vector.extract_strided_slice %405 {offsets = [0, 0], sizes = [32, 1], strides = [1, 1]} : vector<32x2xf32> to vector<32x1xf32>
    %412 = vector.shape_cast %411 : vector<32x1xf32> to vector<32x1xf32>
    %413 = vector.broadcast %412 : vector<32x1xf32> to vector<32x128xf32>
    %414 = vector.extract_strided_slice %405 {offsets = [0, 1], sizes = [32, 1], strides = [1, 1]} : vector<32x2xf32> to vector<32x1xf32>
    %415 = vector.shape_cast %414 : vector<32x1xf32> to vector<32x1xf32>
    %416 = vector.broadcast %415 : vector<32x1xf32> to vector<32x128xf32>
    %417 = tpu.concatenate %413, %416 in 1 : vector<32x128xf32>, vector<32x128xf32> -> vector<32x256xf32>
    %418 = arith.mulf %379, %417 : vector<32x256xf32>
    %419 = vector.broadcast %410 : f32 to vector<32x256xf32>
    %420 = arith.mulf %419, %418 : vector<32x256xf32>
    %421 = arith.addf %3, %420 : vector<32x256xf32>
    %c0_182 = arith.constant 0 : index
    %c0_183 = arith.constant 0 : index
    %422 = vector.load %arg11[%c0_182, %c0_183] : memref<32x256xf32, #tpu.memory_space<vmem>>, vector<32x256xf32>
    tpu.vector_store %arg11[%c0_182, %c0_183], %421 {strides = array<i32>} : memref<32x256xf32, #tpu.memory_space<vmem>>, vector<32x256xf32>,
    return
  }
}

</mosaic_0001>

<bundles_post_ra>
// kernel: tpu_custom_call.1
= control target key start
LH: loop header
LB: loop body
LE: loop exit
PB: predicated region body
PF: predicated region fallthrough
CT: control target
= control target key end

     0   :  { %s3852_s21 = smov 1   ;;  %s6047_s0 = inlined_call_operand.vmem [shape: f32[32,256], index: 0, kind: input, shape index: {}]   ;;  %s6048_s1 = inlined_call_operand.vmem [shape: f32[3,256], index: 1, kind: input, shape index: {}]   ;;  %s6049_s2 = inlined_call_operand.vmem [shape: f32[8,32,96], index: 2, kind: input, shape index: {}]   ;;  %s6050_s3 = inlined_call_operand.vmem [shape: f32[8,32,1], index: 3, kind: input, shape index: {}]   ;;  %s6051_s4 = inlined_call_operand.vmem [shape: f32[8,32,1], index: 4, kind: input, shape index: {}]   ;;  %s6052_s5 = inlined_call_operand.vmem [shape: f32[8,32,1], index: 5, kind: input, shape index: {}]   ;;  %s6053_s6 = inlined_call_operand.vmem [shape: f32[2,32], index: 6, kind: input, shape index: {}]   ;;  %s6054_s7 = inlined_call_operand.vmem [shape: f32[2,1], index: 7, kind: input, shape index: {}]   ;;  %s6055_s8 = inlined_call_operand.vmem [shape: f32[32,2], index: 8, kind: input, shape index: {}]   ;;  %s6056_s9 = inlined_call_operand.vmem [shape: f32[32,1], index: 9, kind: input, shape index: {}]   ;;  %s6057_s10 = inlined_call_operand.<no memory space> [shape: f32[1], index: 10, kind: input, shape index: {}]   ;;  %s6058_s11 = inlined_call_operand.hbm [shape: f32[32,256], index: 11, kind: output, shape index: {}]  }
   0x1   :  { %v3925_v0 = vld [vmem:[%s6047_s0 + $0x8] sm:$0xff]  ;;  %v3930_v1 = vld [vmem:[%s6047_s0] sm:$0xff]  ;;  %v3939_v2 = vld [vmem:[%s6047_s0 + $0x18] sm:$0xff] }
   0x2   :  { %61 = vrot.lane.b32.xlu1 %v3925_v0, %s3852_s21  ;;  %53 = vrot.lane.b32.xlu0 %v3930_v1, %s3852_s21  ;;  %v3944_v3 = vld [vmem:[%s6047_s0 + $0x10] sm:$0xff] }
   0x3   :  { %17 = vsyncpa [#allocation4], 0  ;;  %v3953_v4 = vld [vmem:[%s6047_s0 + $0x30] sm:$0xff]  ;;  %v3958_v5 = vld [vmem:[%s6047_s0 + $0x20] sm:$0xff]  ;;  %s3853_s15 = smov 127   ;;  %v3854_v8 = vmov 0.0   ;;  %v69_v14 = vlaneseq  ;;  %v3524_v53 = vpack.c.bf16 %v3939_v2, %v3925_v0  ;;  %v3526_v55 = vpack.c.bf16 %v3944_v3, %v3930_v1 }
   0x4   :  { %v3967_v6 = vld [vmem:[%s6047_s0 + $0x38] sm:$0xff]  ;;  %v3972_v7 = vld [vmem:[%s6047_s0 + $0x28] sm:$0xff]  ;;  %248 = vmatprep.mubr.f32.mxu0 %v3854_v8  ;;  %618 = vmatprep.mubr.f32.mxu1 %v3854_v8  ;;  %v147_v9 = vld [vmem:[%s6050_s3] sm:$0xff]  ;;  %v3855_v11 = vmov 0   ;;  %vm171_vm2 = vcmask 785408   ;;  %vm3857_vm3 = vmmov 0  }
   0x5   :  { %v148_v10 = vld [vmem:[%s6050_s3 + $0x8] sm:$0xff]  ;;  %3728 = vset.pattern.permute.xlu0 %v3855_v11  ;;  %3729 = vset.pattern.permute.xlu1 %v3855_v11  ;;  %v149_v12 = vld [vmem:[%s6050_s3 + $0x10] sm:$0xff]  ;;  %v150_v13 = vld [vmem:[%s6050_s3 + $0x18] sm:$0xff]  ;;  %v82_v15 = vshrl.u32 %v69_v14, 7  ;;  %v4010_v16 = vand.u32 127, %v69_v14  ;;  %v3528_v59 = vpack.c.bf16 %v3967_v6, %v3972_v7  ;;  %vm2991_vm4 = vcmask 7168  }
   0x6   :  { %63 = vrot.lane.b32.xlu1 %v3939_v2, %s3852_s21  ;;  %55 = vrot.lane.b32.xlu0 %v3944_v3, %s3852_s21  ;;  %v40_v19 = vld [vmem:[%s6048_s1] ss:$4 sm:$0x3]  ;;  %v3331_v48 = vld [vmem:[%s6048_s1 + $0x1] ss:$4 sm:$0x3] }
   0x7   :  { %v4012_v17 = vsub.s32 1, %v82_v15  ;;  %v4014_v18 = vsub.s32 0, %v82_v15  ;;  %vm71_vm0 = vcmp.lt.s32.totalorder %v4010_v16, 1  ;;  %vm115_vm1 = vcmp.lt.s32.totalorder %v4010_v16, 127  ;;  %v3458_v16 = vld [vmem:[%s6049_s2 + $0xe8] sm:$0xff]  ;;  %s3237_s17 = sxor.u32 2147483648, %s6057_s10 }
   0x8   :  { %vm3007_vm5 = vcmask 261120   ;;  %vm3110_vm6 = vcmask 15360   ;;  %vm3123_vm7 = vcmask 1041408   ;;  %s3859_s26 = smov [#allocation3]  }
   0x9   :  { %v4021_v22 = vrot.slane %v40_v19, %v4012_v17  ;;  %v4024_v23 = vrot.slane %v40_v19, %v4014_v18  ;;  %v4057_v54 = vrot.slane %v3331_v48, %v4012_v17  ;;  %v4062_v57 = vrot.slane %v3331_v48, %v4014_v18 }
   0xa   :  { %59 = vrot.lane.b32.xlu1 %v3953_v4, %s3852_s21  ;;  %57 = vrot.lane.b32.xlu0 %v3958_v5, %s3852_s21 }
   0xe   :  { %67 = vrot.lane.b32.xlu1 %v3967_v6, %s3852_s21  ;;  %65 = vrot.lane.b32.xlu0 %v3972_v7, %s3852_s21 }
  0x12   :  { %101 = vrot.lane.b32.xlu1 %v3944_v3, %s3853_s15  ;;  %99 = vrot.lane.b32.xlu0 %v3930_v1, %s3853_s15 }
  0x16   :  { %109 = vrot.lane.b32.xlu1 %v3939_v2, %s3853_s15  ;;  %107 = vrot.lane.b32.xlu0 %v3925_v0, %s3853_s15  ;;  %v3530_v2 = vpack.c.bf16 %v3953_v4, %v3958_v5 }
  0x1a   :  { %105 = vrot.lane.b32.xlu1 %v3953_v4, %s3853_s15  ;;  %103 = vrot.lane.b32.xlu0 %v3958_v5, %s3853_s15 }
  0x1e   :  { %113 = vrot.lane.b32.xlu1 %v3967_v6, %s3853_s15  ;;  %111 = vrot.lane.b32.xlu0 %v3972_v7, %s3853_s15 }
  0x22   :  { %153 = vperm.xlu0 %3728, %v147_v9   ;;  %158 = vperm.xlu1 %3729, %v148_v10  }
  0x26   :  { %163 = vperm.xlu1 %3729, %v149_v12   ;;  %168 = vperm.xlu0 %3728, %v150_v13  }
  0x74   :  { %v62_v20 = vpop.permute.xlu1 %61  ;;  %v54_v21 = vpop.permute.xlu0 %53 }
  0x75   :  { %v76_v24 = vsel %vm71_vm0, %v62_v20, %v54_v21  ;;  %v72_v25 = vsel %vm71_vm0, %v54_v21, %v62_v20 }
  0x76   :  { %v92_v30 = vmul.f32 %v4021_v22, %v72_v25  ;;  %v91_v32 = vmul.f32 %v4024_v23, %v76_v24 }
  0x78   :  { %v64_v26 = vpop.permute.xlu1 %63  ;;  %v56_v27 = vpop.permute.xlu0 %55 }
  0x79   :  { %v77_v28 = vsel %vm71_vm0, %v64_v26, %v56_v27  ;;  %v73_v29 = vsel %vm71_vm0, %v56_v27, %v64_v26 }
  0x7a   :  { %v94_v31 = vmul.f32 %v4021_v22, %v73_v29  ;;  %v93_v33 = vmul.f32 %v4024_v23, %v77_v28  ;;  %v143_v28 = vld [vmem:[%s6049_s2] sm:$0xff]  ;;  %v144_v29 = vld [vmem:[%s6049_s2 + $0x8] sm:$0xff] }
  0x7c   :  { %v60_v34 = vpop.permute.xlu1 %59  ;;  %v58_v35 = vpop.permute.xlu0 %57  ;;  %v3516_v36 = vpack.c.bf16 %v94_v31, %v92_v30  ;;  %v3518_v37 = vpack.c.bf16 %v93_v33, %v91_v32  ;;  %v145_v30 = vld [vmem:[%s6049_s2 + $0x10] sm:$0xff]  ;;  %v146_v31 = vld [vmem:[%s6049_s2 + $0x18] sm:$0xff]  ;;  %v3332_v32 = vld [vmem:[%s6048_s1 + $0x2] ss:$4 sm:$0x3] }
  0x7e   :  { %3517 = vmatprep.subr.bf16.mxu0 %v3516_v36 }
  0x7f   :  { %3519 = vmatpush1.bf16.msra.mxu0 %v3518_v37 }
  0x80   :  { %v68_v38 = vpop.permute.xlu1 %67  ;;  %v66_v39 = vpop.permute.xlu0 %65 }
  0x81   :  { %v75_v40 = vsel %vm71_vm0, %v60_v34, %v68_v38  ;;  %v79_v41 = vsel %vm71_vm0, %v68_v38, %v60_v34  ;;  %v74_v42 = vsel %vm71_vm0, %v58_v35, %v66_v39  ;;  %v78_v43 = vsel %vm71_vm0, %v66_v39, %v58_v35 }
  0x82   :  { %v97_v44 = vmul.f32 %v4024_v23, %v79_v41  ;;  %v98_v45 = vmul.f32 %v4021_v22, %v75_v40  ;;  %v95_v46 = vmul.f32 %v4024_v23, %v78_v43  ;;  %v96_v47 = vmul.f32 %v4021_v22, %v74_v42 }
  0x83   :  { %v4116_v34 = vrot.slane %v3332_v32, %v4014_v18  ;;  %v4119_v35 = vrot.slane %v3332_v32, %v4012_v17 }
  0x84   :  { %v102_v49 = vpop.permute.xlu1 %101  ;;  %v100_v50 = vpop.permute.xlu0 %99  ;;  %v3520_v51 = vpack.c.bf16 %v98_v45, %v96_v47  ;;  %v3522_v52 = vpack.c.bf16 %v97_v44, %v95_v46 }
  0x86   :  { %3521 = vmatprep.subr.bf16.mxu0 %v3520_v51 }
  0x87   :  { %3523 = vmatpush1.bf16.msra.mxu0 %v3522_v52 }
  0x88   :  { %v110_v56 = vpop.permute.xlu1 %109  ;;  %v108_v58 = vpop.permute.xlu0 %107  ;;  %3525 = vmatprep.subr.bf16.mxu0 %v3524_v53 }
  0x89   :  { %v117_v60 = vsel %vm115_vm1, %v102_v49, %v110_v56  ;;  %v121_v61 = vsel %vm115_vm1, %v110_v56, %v102_v49  ;;  %v116_v62 = vsel %vm115_vm1, %v100_v50, %v108_v58  ;;  %v120_v63 = vsel %vm115_vm1, %v108_v58, %v100_v50 }
  0x8a   :  { %v138_v0 = vmul.f32 %v4057_v54, %v121_v61  ;;  %v136_v1 = vmul.f32 %v4057_v54, %v120_v63  ;;  %v137_v3 = vmul.f32 %v4062_v57, %v117_v60  ;;  %v135_v6 = vmul.f32 %v4062_v57, %v116_v62 }
  0x8b   :  { %3527 = vmatpush1.bf16.msra.mxu0 %v3526_v55 }
  0x8c   :  { %v106_v7 = vpop.permute.xlu1 %105  ;;  %v104_v9 = vpop.permute.xlu0 %103  ;;  %3529 = vmatprep.subr.bf16.mxu0 %v3528_v59  ;;  %v3532_v10 = vpack.c.bf16 %v138_v0, %v136_v1  ;;  %v3534_v14 = vpack.c.bf16 %v137_v3, %v135_v6 }
  0x8f   :  { %3531 = vmatpush1.bf16.msra.mxu0 %v3530_v2 }
  0x90   :  { %v114_v12 = vpop.permute.xlu1 %113  ;;  %v112_v13 = vpop.permute.xlu0 %111  ;;  %3533 = vmatprep.subr.bf16.mxu0 %v3532_v10 }
  0x91   :  { %v119_v15 = vsel %vm115_vm1, %v106_v7, %v114_v12  ;;  %v123_v19 = vsel %vm115_vm1, %v114_v12, %v106_v7  ;;  %v118_v4 = vsel %vm115_vm1, %v104_v9, %v112_v13  ;;  %v122_v5 = vsel %vm115_vm1, %v112_v13, %v104_v9 }
  0x92   :  { %v141_v20 = vmul.f32 %v4062_v57, %v119_v15  ;;  %v142_v21 = vmul.f32 %v4057_v54, %v123_v19  ;;  %v139_v24 = vmul.f32 %v4062_v57, %v118_v4  ;;  %v140_v25 = vmul.f32 %v4057_v54, %v122_v5 }
  0x93   :  { %3535 = vmatpush1.bf16.msra.mxu0 %v3534_v14 }
  0x94   :  { %v3536_v26 = vpack.c.bf16 %v142_v21, %v140_v25  ;;  %v3538_v27 = vpack.c.bf16 %v141_v20, %v139_v24 }
  0x96   :  { %3537 = vmatprep.subr.bf16.mxu0 %v3536_v26 }
  0x97   :  { %3539 = vmatpush1.bf16.msra.mxu0 %v3538_v27 }
  0x9a   :  { %3333 = vmatmul.mubr.msk.f32.vlgmr.msra.gmra.mrb[0].mxu0 %vm171_vm2, %v143_v28 }
  0x9b   :  { %254 = vmatprep.mubr.f32.mxu0 %v3854_v8 }
  0x9e   :  { %3334 = vmatmul.mubr.msk.f32.gmra.mrb[2].mxu0 %vm171_vm2, %v144_v29 }
  0x9f   :  { %260 = vmatprep.mubr.f32.mxu0 %v3854_v8 }
  0xa1   :  { %v154_v33 = vpop.permute.xlu0 %153  ;;  %v159_v39 = vpop.permute.xlu1 %158 }
  0xa2   :  { %3335 = vmatmul.mubr.msk.f32.gmra.mrb[4].mxu0 %vm171_vm2, %v145_v30 }
  0xa3   :  { %266 = vmatprep.mubr.f32.mxu0 %v3854_v8 }
  0xa5   :  { %v164_v47 = vpop.permute.xlu1 %163  ;;  %v169_v56 = vpop.permute.xlu0 %168 }
  0xa6   :  { %3336 = vmatmul.mubr.msk.f32.gmra.mrb[6].mxu0 %vm171_vm2, %v146_v31 }
  0xa7   :  { %979 = vmatprep.mubr.f32.mxu0 %v3854_v8 }
 0x16d   :  { %v250_v36 = vpop.f32.mrb[0].mxu0 }
 0x16e   :  { %v4121_v37 = vadd.f32 %v250_v36, %v154_v33  ;;  %v252_v38 = vpop.f32.mrb[1].mxu0 }
 0x16f   :  { %v4123_v40 = vadd.f32 %v252_v38, %v154_v33 }
 0x170   :  { %v284_v41 = vmul.f32 %v4116_v34, %v4121_v37 }
 0x171   :  { %v256_v42 = vpop.f32.mrb[2].mxu0  ;;  %v285_v43 = vmul.f32 %v4119_v35, %v4123_v40 }
 0x172   :  { %v4129_v44 = vadd.f32 %v256_v42, %v159_v39  ;;  %v258_v18 = vpop.f32.mrb[3].mxu0 }
 0x173   :  { %v4131_v45 = vadd.f32 %v258_v18, %v159_v39  ;;  %v292_v17 = vadd.f32 %v285_v43, %v284_v41 }
 0x174   :  { %v286_v46 = vmul.f32 %v4116_v34, %v4129_v44 }
 0x175   :  { %v262_v48 = vpop.f32.mrb[4].mxu0  ;;  %293 = vadd.xlane.f32.xlu1 %v292_v17  ;;  %v287_v49 = vmul.f32 %v4119_v35, %v4131_v45 }
 0x176   :  { %v4137_v50 = vadd.f32 %v262_v48, %v164_v47  ;;  %v264_v51 = vpop.f32.mrb[5].mxu0 }
 0x177   :  { %v4139_v52 = vadd.f32 %v264_v51, %v164_v47  ;;  %v295_v53 = vadd.f32 %v287_v49, %v286_v46 }
 0x178   :  { %v288_v55 = vmul.f32 %v4116_v34, %v4137_v50 }
 0x179   :  { %v268_v58 = vpop.f32.mrb[6].mxu0  ;;  %296 = vadd.xlane.f32.xlu0 %v295_v53  ;;  %v289_v59 = vmul.f32 %v4119_v35, %v4139_v52 }
 0x17a   :  { %v4145_v60 = vadd.f32 %v268_v58, %v169_v56  ;;  %v270_v61 = vpop.f32.mrb[7].mxu0 }
 0x17b   :  { %v4147_v62 = vadd.f32 %v270_v61, %v169_v56  ;;  %v298_v63 = vadd.f32 %v289_v59, %v288_v55 }
 0x17c   :  { %v290_v0 = vmul.f32 %v4116_v34, %v4145_v60 }
 0x17d   :  { %299 = vadd.xlane.f32.xlu0 %v298_v63  ;;  %v291_v1 = vmul.f32 %v4119_v35, %v4147_v62 }
 0x17f   :  { %v301_v2 = vadd.f32 %v291_v1, %v290_v0 }
 0x181   :  { %302 = vadd.xlane.f32.xlu1 %v301_v2 }
 0x202   :  { %v294_v3 = vpop.xlane.xlu1 %293 }
 0x203   :  { %v304_v6 = vmul.f32 0.03125, %v294_v3  ;;  %v348_v3 = vld [vmem:[%s6051_s4] sm:$0xff] }
 0x205   :  { %v308_v7 = vsub.f32 %v4121_v37, %v304_v6  ;;  %v309_v9 = vsub.f32 %v4123_v40, %v304_v6 }
 0x206   :  { %v297_v10 = vpop.xlane.xlu0 %296 }
 0x207   :  { %v4155_v12 = vmul.f32 0.03125, %v297_v10  ;;  %v316_v13 = vmul.f32 %v308_v7, %v4116_v34  ;;  %v317_v14 = vmul.f32 %v309_v9, %v4119_v35 }
 0x209   :  { %v324_v15 = vmul.f32 %v316_v13, %v316_v13  ;;  %v325_v19 = vmul.f32 %v317_v14, %v317_v14  ;;  %v310_v4 = vsub.f32 %v4129_v44, %v4155_v12  ;;  %v311_v5 = vsub.f32 %v4131_v45, %v4155_v12  ;;  %v349_v13 = vld [vmem:[%s6051_s4 + $0x8] sm:$0xff] }
 0x20a   :  { %v300_v20 = vpop.xlane.xlu0 %299 }
 0x20b   :  { %v4163_v21 = vmul.f32 0.03125, %v300_v20  ;;  %v332_v24 = vadd.f32 %v325_v19, %v324_v15  ;;  %v318_v25 = vmul.f32 %v310_v4, %v4116_v34  ;;  %v319_v26 = vmul.f32 %v311_v5, %v4119_v35  ;;  %v364_v4 = vld [vmem:[%s6052_s5] sm:$0xff]  ;;  %v365_v5 = vld [vmem:[%s6052_s5 + $0x8] sm:$0xff]  ;;  %v350_v20 = vld [vmem:[%s6051_s4 + $0x10] sm:$0xff] }
 0x20d   :  { %333 = vadd.xlane.f32.xlu0 %v332_v24  ;;  %v326_v27 = vmul.f32 %v318_v25, %v318_v25  ;;  %v327_v28 = vmul.f32 %v319_v26, %v319_v26  ;;  %v312_v29 = vsub.f32 %v4137_v50, %v4163_v21  ;;  %v313_v30 = vsub.f32 %v4139_v52, %v4163_v21 }
 0x20e   :  { %v303_v31 = vpop.xlane.xlu1 %302 }
 0x20f   :  { %v307_v32 = vmul.f32 0.03125, %v303_v31  ;;  %v335_v33 = vadd.f32 %v327_v28, %v326_v27  ;;  %v320_v36 = vmul.f32 %v312_v29, %v4116_v34  ;;  %v321_v38 = vmul.f32 %v313_v30, %v4119_v35 }
 0x211   :  { %336 = vadd.xlane.f32.xlu1 %v335_v33  ;;  %v328_v39 = vmul.f32 %v320_v36, %v320_v36  ;;  %v329_v41 = vmul.f32 %v321_v38, %v321_v38  ;;  %v314_v42 = vsub.f32 %v4145_v60, %v307_v32  ;;  %v315_v43 = vsub.f32 %v4147_v62, %v307_v32  ;;  %v366_v33 = vld [vmem:[%s6052_s5 + $0x10] sm:$0xff] }
 0x213   :  { %v338_v18 = vadd.f32 %v329_v41, %v328_v39  ;;  %v322_v17 = vmul.f32 %v314_v42, %v4116_v34  ;;  %v323_v46 = vmul.f32 %v315_v43, %v4119_v35 }
 0x215   :  { %339 = vadd.xlane.f32.xlu0 %v338_v18  ;;  %v330_v47 = vmul.f32 %v322_v17, %v322_v17  ;;  %v331_v48 = vmul.f32 %v323_v46, %v323_v46 }
 0x217   :  { %v341_v49 = vadd.f32 %v331_v48, %v330_v47 }
 0x219   :  { %342 = vadd.xlane.f32.xlu1 %v341_v49 }
 0x29a   :  { %v334_v51 = vpop.xlane.xlu0 %333 }
 0x29b   :  { %v344_v53 = vmul.f32 0.03125, %v334_v51 }
 0x29d   :  { %v352_v55 = vadd.f32 1e-05, %v344_v53 }
 0x29e   :  { %v337_v56 = vpop.xlane.xlu1 %336 }
 0x29f   :  { %3736 = vrsqrt.f32 %v352_v55  ;;  %v345_v58 = vmul.f32 0.03125, %v337_v56 }
 0x2a1   :  { %v353_v59 = vadd.f32 1e-05, %v345_v58 }
 0x2a2   :  { %v340_v61 = vpop.xlane.xlu0 %339 }
 0x2a3   :  { %3738 = vrsqrt.f32 %v353_v59  ;;  %v346_v63 = vmul.f32 0.03125, %v340_v61 }
 0x2a5   :  { %v354_v0 = vadd.f32 1e-05, %v346_v63 }
 0x2a6   :  { %v343_v1 = vpop.xlane.xlu1 %342 }
 0x2a7   :  { %3740 = vrsqrt.f32 %v354_v0  ;;  %v347_v2 = vmul.f32 0.03125, %v343_v1 }
 0x2a9   :  { %v3737_v7 = vpop.eup %3736  ;;  %v355_v9 = vadd.f32 1e-05, %v347_v2 }
 0x2aa   :  { %v360_v10 = vmul.f32 %v3737_v7, %v348_v3 }
 0x2ab   :  { %3742 = vrsqrt.f32 %v355_v9 }
 0x2ac   :  { %378 = vperm.xlu0 %3728, %v360_v10   ;;  %v368_v19 = vmul.f32 %v360_v10, %v304_v6  ;;  %v351_v6 = vld [vmem:[%s6051_s4 + $0x18] sm:$0xff] }
 0x2ad   :  { %v3739_v14 = vpop.eup %3738 }
 0x2ae   :  { %v361_v15 = vmul.f32 %v3739_v14, %v349_v13  ;;  %v372_v26 = vsub.f32 %v364_v4, %v368_v19 }
 0x2b0   :  { %383 = vperm.xlu1 %3729, %v361_v15   ;;  %v369_v24 = vmul.f32 %v361_v15, %v4155_v12  ;;  %v367_v12 = vld [vmem:[%s6052_s5 + $0x18] sm:$0xff] }
 0x2b1   :  { %v3741_v25 = vpop.eup %3740 }
 0x2b2   :  { %v373_v27 = vsub.f32 %v365_v5, %v369_v24  ;;  %v362_v28 = vmul.f32 %v3741_v25, %v350_v20 }
 0x2b4   :  { %406 = vperm.xlu1 %3729, %v372_v26   ;;  %411 = vperm.xlu0 %3728, %v373_v27   ;;  %v370_v31 = vmul.f32 %v362_v28, %v4163_v21  ;;  %v3342_v27 = vld [vmem:[%s6050_s3 + $0x28] sm:$0xff] }
 0x2b5   :  { %v3743_v29 = vpop.eup %3742 }
 0x2b6   :  { %v363_v30 = vmul.f32 %v3743_v29, %v351_v6  ;;  %v374_v38 = vsub.f32 %v366_v33, %v370_v31  ;;  %v3344_v6 = vld [vmem:[%s6050_s3 + $0x38] sm:$0xff]  ;;  %v3343_v29 = vld [vmem:[%s6050_s3 + $0x30] sm:$0xff] }
 0x2b8   :  { %388 = vperm.xlu1 %3729, %v362_v28   ;;  %393 = vperm.xlu0 %3728, %v363_v30   ;;  %v371_v36 = vmul.f32 %v363_v30, %v307_v32  ;;  %v3341_v28 = vld [vmem:[%s6050_s3 + $0x20] sm:$0xff] }
 0x2ba   :  { %v375_v39 = vsub.f32 %v367_v12, %v371_v36 }
 0x2bc   :  { %416 = vperm.xlu1 %3729, %v374_v38   ;;  %421 = vperm.xlu0 %3728, %v375_v39  }
 0x32b   :  { %v379_v41 = vpop.permute.xlu0 %378 }
 0x32c   :  { %v396_v43 = vmul.f32 %v379_v41, %v4121_v37  ;;  %v397_v21 = vmul.f32 %v379_v41, %v4123_v40 }
 0x32f   :  { %v384_v42 = vpop.permute.xlu1 %383 }
 0x330   :  { %v398_v18 = vmul.f32 %v384_v42, %v4129_v44  ;;  %v399_v17 = vmul.f32 %v384_v42, %v4131_v45 }
 0x333   :  { %v412_v46 = vpop.permute.xlu0 %411  ;;  %v407_v47 = vpop.permute.xlu1 %406 }
 0x334   :  { %v426_v48 = vadd.f32 %v412_v46, %v398_v18  ;;  %v427_v49 = vadd.f32 %v412_v46, %v399_v17  ;;  %v424_v51 = vadd.f32 %v407_v47, %v396_v43  ;;  %v425_v32 = vadd.f32 %v407_v47, %v397_v21 }
 0x336   :  { %v434_v53 = vmax.f32 %v426_v48, 0.0  ;;  %v435_v55 = vmax.f32 %v427_v49, 0.0  ;;  %v432_v56 = vmax.f32 %v424_v51, 0.0  ;;  %v433_v58 = vmax.f32 %v425_v32, 0.0 }
 0x337   :  { %v394_v59 = vpop.permute.xlu0 %393  ;;  %v389_v61 = vpop.permute.xlu1 %388 }
 0x338   :  { %v4208_v37 = vmul.f32 %v434_v53, %v4116_v34  ;;  %v4211_v40 = vmul.f32 %v432_v56, %v4116_v34  ;;  %v4214_v44 = vmul.f32 %v435_v55, %v4119_v35  ;;  %v4217_v45 = vmul.f32 %v433_v58, %v4119_v35 }
 0x339   :  { %v402_v63 = vmul.f32 %v394_v59, %v4145_v60  ;;  %v403_v0 = vmul.f32 %v394_v59, %v4147_v62  ;;  %v400_v1 = vmul.f32 %v389_v61, %v4137_v50  ;;  %v401_v2 = vmul.f32 %v389_v61, %v4139_v52 }
 0x33a   :  { %450 = vrot.lane.b32.xlu0 %v4208_v37, %s3852_s21  ;;  %448 = vrot.lane.b32.xlu1 %v4211_v40, %s3852_s21  ;;  %v3548_v9 = vpack.c.bf16 %v4214_v44, %v4217_v45  ;;  %v3550_v60 = vpack.c.bf16 %v4208_v37, %v4211_v40 }
 0x33b   :  { %v422_v3 = vpop.permute.xlu0 %421  ;;  %v417_v7 = vpop.permute.xlu1 %416 }
 0x33c   :  { %v430_v10 = vadd.f32 %v422_v3, %v402_v63  ;;  %v431_v62 = vadd.f32 %v422_v3, %v403_v0  ;;  %v428_v13 = vadd.f32 %v417_v7, %v400_v1  ;;  %v429_v50 = vadd.f32 %v417_v7, %v401_v2 }
 0x33e   :  { %v438_v14 = vmax.f32 %v430_v10, 0.0  ;;  %v439_v52 = vmax.f32 %v431_v62, 0.0  ;;  %v436_v15 = vmax.f32 %v428_v13, 0.0  ;;  %v437_v19 = vmax.f32 %v429_v50, 0.0  ;;  %458 = vrot.lane.b32.xlu0 %v4214_v44, %s3852_s21  ;;  %456 = vrot.lane.b32.xlu1 %v4217_v45, %s3852_s21 }
 0x340   :  { %v4236_v4 = vmul.f32 %v438_v14, %v4116_v34  ;;  %v4239_v5 = vmul.f32 %v436_v15, %v4116_v34  ;;  %v4242_v20 = vmul.f32 %v439_v52, %v4119_v35  ;;  %v4245_v24 = vmul.f32 %v437_v19, %v4119_v35 }
 0x342   :  { %v3552_v25 = vpack.c.bf16 %v4242_v20, %v4245_v24  ;;  %v3554_v26 = vpack.c.bf16 %v4236_v4, %v4239_v5  ;;  %454 = vrot.lane.b32.xlu0 %v4236_v4, %s3852_s21  ;;  %452 = vrot.lane.b32.xlu1 %v4239_v5, %s3852_s21 }
 0x346   :  { %462 = vrot.lane.b32.xlu0 %v4242_v20, %s3852_s21  ;;  %460 = vrot.lane.b32.xlu1 %v4245_v24, %s3852_s21 }
 0x34a   :  { %482 = vrot.lane.b32.xlu0 %v4208_v37, %s3853_s15  ;;  %480 = vrot.lane.b32.xlu1 %v4211_v40, %s3853_s15 }
 0x34e   :  { %490 = vrot.lane.b32.xlu0 %v4214_v44, %s3853_s15  ;;  %488 = vrot.lane.b32.xlu1 %v4217_v45, %s3853_s15 }
 0x352   :  { %486 = vrot.lane.b32.xlu0 %v4236_v4, %s3853_s15  ;;  %484 = vrot.lane.b32.xlu1 %v4239_v5, %s3853_s15 }
 0x356   :  { %494 = vrot.lane.b32.xlu0 %v4242_v20, %s3853_s15  ;;  %492 = vrot.lane.b32.xlu1 %v4245_v24, %s3853_s15 }
 0x35a   :  { %529 = vperm.xlu0 %3728, %v3342_v27   ;;  %524 = vperm.xlu1 %3729, %v3341_v28  }
 0x35e   :  { %539 = vperm.xlu0 %3728, %v3344_v6   ;;  %534 = vperm.xlu1 %3729, %v3343_v29  }
 0x3ac   :  { %v451_v30 = vpop.permute.xlu0 %450  ;;  %v449_v31 = vpop.permute.xlu1 %448 }
 0x3b0   :  { %v459_v33 = vpop.permute.xlu0 %458  ;;  %v457_v12 = vpop.permute.xlu1 %456 }
 0x3b1   :  { %v469_v36 = vsel %vm71_vm0, %v459_v33, %v451_v30  ;;  %v468_v38 = vsel %vm71_vm0, %v457_v12, %v449_v31  ;;  %v464_v39 = vsel %vm71_vm0, %v449_v31, %v457_v12  ;;  %v465_v41 = vsel %vm71_vm0, %v451_v30, %v459_v33  ;;  %v3337_v31 = vld [vmem:[%s6049_s2 + $0x20] sm:$0xff]  ;;  %v3338_v33 = vld [vmem:[%s6049_s2 + $0x28] sm:$0xff]  ;;  %v3339_v12 = vld [vmem:[%s6049_s2 + $0x30] sm:$0xff] }
 0x3b2   :  { %v473_v42 = vmul.f32 %v464_v39, %v4021_v22  ;;  %v475_v43 = vmul.f32 %v465_v41, %v4021_v22  ;;  %v472_v21 = vmul.f32 %v468_v38, %v4024_v23  ;;  %v474_v18 = vmul.f32 %v469_v36, %v4024_v23  ;;  %v3340_v36 = vld [vmem:[%s6049_s2 + $0x38] sm:$0xff] }
 0x3b4   :  { %v455_v17 = vpop.permute.xlu0 %454  ;;  %v453_v46 = vpop.permute.xlu1 %452  ;;  %v3540_v47 = vpack.c.bf16 %v475_v43, %v473_v42  ;;  %v3542_v48 = vpack.c.bf16 %v474_v18, %v472_v21 }
 0x3b6   :  { %3541 = vmatprep.subr.bf16.mxu1 %v3540_v47 }
 0x3b7   :  { %3543 = vmatpush1.bf16.msra.mxu1 %v3542_v48 }
 0x3b8   :  { %v463_v49 = vpop.permute.xlu0 %462  ;;  %v461_v51 = vpop.permute.xlu1 %460 }
 0x3b9   :  { %v467_v32 = vsel %vm71_vm0, %v455_v17, %v463_v49  ;;  %v471_v53 = vsel %vm71_vm0, %v463_v49, %v455_v17  ;;  %v466_v55 = vsel %vm71_vm0, %v453_v46, %v461_v51  ;;  %v470_v56 = vsel %vm71_vm0, %v461_v51, %v453_v46 }
 0x3ba   :  { %v478_v58 = vmul.f32 %v471_v53, %v4024_v23  ;;  %v479_v59 = vmul.f32 %v467_v32, %v4021_v22  ;;  %v476_v61 = vmul.f32 %v470_v56, %v4024_v23  ;;  %v477_v63 = vmul.f32 %v466_v55, %v4021_v22 }
 0x3bc   :  { %v483_v0 = vpop.permute.xlu0 %482  ;;  %v481_v1 = vpop.permute.xlu1 %480  ;;  %v3544_v2 = vpack.c.bf16 %v479_v59, %v477_v63  ;;  %v3546_v3 = vpack.c.bf16 %v478_v58, %v476_v61 }
 0x3be   :  { %3545 = vmatprep.subr.bf16.mxu1 %v3544_v2 }
 0x3bf   :  { %3547 = vmatpush1.bf16.msra.mxu1 %v3546_v3 }
 0x3c0   :  { %v491_v7 = vpop.permute.xlu0 %490  ;;  %3549 = vmatprep.subr.bf16.mxu1 %v3548_v9  ;;  %v489_v10 = vpop.permute.xlu1 %488 }
 0x3c1   :  { %v497_v62 = vsel %vm115_vm1, %v483_v0, %v491_v7  ;;  %v501_v13 = vsel %vm115_vm1, %v491_v7, %v483_v0  ;;  %v496_v50 = vsel %vm115_vm1, %v481_v1, %v489_v10  ;;  %v500_v14 = vsel %vm115_vm1, %v489_v10, %v481_v1 }
 0x3c2   :  { %v507_v52 = vmul.f32 %v501_v13, %v4057_v54  ;;  %v505_v15 = vmul.f32 %v500_v14, %v4057_v54  ;;  %v506_v44 = vmul.f32 %v497_v62, %v4062_v57  ;;  %v504_v45 = vmul.f32 %v496_v50, %v4062_v57 }
 0x3c3   :  { %3551 = vmatpush1.bf16.msra.mxu1 %v3550_v60 }
 0x3c4   :  { %v487_v9 = vpop.permute.xlu0 %486  ;;  %3553 = vmatprep.subr.bf16.mxu1 %v3552_v25  ;;  %v485_v19 = vpop.permute.xlu1 %484  ;;  %v3556_v27 = vpack.c.bf16 %v507_v52, %v505_v15  ;;  %v3558_v37 = vpack.c.bf16 %v506_v44, %v504_v45 }
 0x3c7   :  { %3555 = vmatpush1.bf16.msra.mxu1 %v3554_v26 }
 0x3c8   :  { %v495_v28 = vpop.permute.xlu0 %494  ;;  %3557 = vmatprep.subr.bf16.mxu1 %v3556_v27  ;;  %v493_v6 = vpop.permute.xlu1 %492 }
 0x3c9   :  { %v499_v40 = vsel %vm115_vm1, %v487_v9, %v495_v28  ;;  %v503_v60 = vsel %vm115_vm1, %v495_v28, %v487_v9  ;;  %v498_v20 = vsel %vm115_vm1, %v485_v19, %v493_v6  ;;  %v502_v24 = vsel %vm115_vm1, %v493_v6, %v485_v19 }
 0x3ca   :  { %v510_v25 = vmul.f32 %v499_v40, %v4062_v57  ;;  %v511_v4 = vmul.f32 %v503_v60, %v4057_v54  ;;  %v508_v5 = vmul.f32 %v498_v20, %v4062_v57  ;;  %v509_v26 = vmul.f32 %v502_v24, %v4057_v54 }
 0x3cb   :  { %3559 = vmatpush1.bf16.msra.mxu1 %v3558_v37 }
 0x3cc   :  { %v3560_v29 = vpack.c.bf16 %v511_v4, %v509_v26  ;;  %v3562_v30 = vpack.c.bf16 %v510_v25, %v508_v5 }
 0x3ce   :  { %3561 = vmatprep.subr.bf16.mxu1 %v3560_v29 }
 0x3cf   :  { %3563 = vmatpush1.bf16.msra.mxu1 %v3562_v30 }
 0x3d2   :  { %3345 = vmatmul.mubr.msk.f32.vlgmr.msra.gmra.mrb[0].mxu1 %vm171_vm2, %v3337_v31 }
 0x3d3   :  { %624 = vmatprep.mubr.f32.mxu1 %v3854_v8 }
 0x3d6   :  { %3346 = vmatmul.mubr.msk.f32.gmra.mrb[2].mxu1 %vm171_vm2, %v3338_v33 }
 0x3d7   :  { %630 = vmatprep.mubr.f32.mxu1 %v3854_v8 }
 0x3d9   :  { %v525_v38 = vpop.permute.xlu1 %524  ;;  %v530_v18 = vpop.permute.xlu0 %529 }
 0x3da   :  { %3347 = vmatmul.mubr.msk.f32.gmra.mrb[4].mxu1 %vm171_vm2, %v3339_v12 }
 0x3db   :  { %636 = vmatprep.mubr.f32.mxu1 %v3854_v8 }
 0x3dd   :  { %v535_v53 = vpop.permute.xlu1 %534  ;;  %v540_v1 = vpop.permute.xlu0 %539 }
 0x3de   :  { %3348 = vmatmul.mubr.msk.f32.gmra.mrb[6].mxu1 %vm171_vm2, %v3340_v36 }
 0x3df   :  { %1340 = vmatprep.mubr.f32.mxu1 %v3854_v8 }
 0x4a5   :  { %v620_v39 = vpop.f32.mrb[0].mxu1 }
 0x4a6   :  { %v4367_v41 = vadd.f32 %v620_v39, %v525_v38  ;;  %v622_v42 = vpop.f32.mrb[1].mxu1 }
 0x4a7   :  { %v4369_v43 = vadd.f32 %v622_v42, %v525_v38 }
 0x4a8   :  { %v643_v21 = vmul.f32 %v4367_v41, %v4116_v34 }
 0x4a9   :  { %v626_v17 = vpop.f32.mrb[2].mxu1  ;;  %v644_v46 = vmul.f32 %v4369_v43, %v4119_v35 }
 0x4aa   :  { %v4375_v47 = vadd.f32 %v626_v17, %v530_v18  ;;  %v628_v48 = vpop.f32.mrb[3].mxu1 }
 0x4ab   :  { %v4377_v49 = vadd.f32 %v628_v48, %v530_v18  ;;  %v651_v51 = vadd.f32 %v644_v46, %v643_v21 }
 0x4ac   :  { %v645_v32 = vmul.f32 %v4375_v47, %v4116_v34 }
 0x4ad   :  { %v632_v55 = vpop.f32.mrb[4].mxu1  ;;  %652 = vadd.xlane.f32.xlu1 %v651_v51  ;;  %v646_v56 = vmul.f32 %v4377_v49, %v4119_v35 }
 0x4ae   :  { %v4383_v58 = vadd.f32 %v632_v55, %v535_v53  ;;  %v634_v59 = vpop.f32.mrb[5].mxu1 }
 0x4af   :  { %v4385_v61 = vadd.f32 %v634_v59, %v535_v53  ;;  %v654_v63 = vadd.f32 %v646_v56, %v645_v32 }
 0x4b0   :  { %v647_v0 = vmul.f32 %v4383_v58, %v4116_v34 }
 0x4b1   :  { %v638_v2 = vpop.f32.mrb[6].mxu1  ;;  %655 = vadd.xlane.f32.xlu0 %v654_v63  ;;  %v648_v3 = vmul.f32 %v4385_v61, %v4119_v35 }
 0x4b2   :  { %v4391_v7 = vadd.f32 %v638_v2, %v540_v1  ;;  %v640_v10 = vpop.f32.mrb[7].mxu1 }
 0x4b3   :  { %v4393_v62 = vadd.f32 %v640_v10, %v540_v1  ;;  %v657_v13 = vadd.f32 %v648_v3, %v647_v0 }
 0x4b4   :  { %v649_v50 = vmul.f32 %v4391_v7, %v4116_v34 }
 0x4b5   :  { %658 = vadd.xlane.f32.xlu0 %v657_v13  ;;  %v650_v14 = vmul.f32 %v4393_v62, %v4119_v35 }
 0x4b7   :  { %v660_v52 = vadd.f32 %v650_v14, %v649_v50 }
 0x4b9   :  { %661 = vadd.xlane.f32.xlu1 %v660_v52 }
 0x53a   :  { %v653_v15 = vpop.xlane.xlu1 %652 }
 0x53b   :  { %v663_v44 = vmul.f32 0.03125, %v653_v15  ;;  %v3349_v15 = vld [vmem:[%s6051_s4 + $0x20] sm:$0xff] }
 0x53d   :  { %v667_v45 = vsub.f32 %v4367_v41, %v663_v44  ;;  %v668_v9 = vsub.f32 %v4369_v43, %v663_v44 }
 0x53e   :  { %v656_v19 = vpop.xlane.xlu0 %655 }
 0x53f   :  { %v4401_v27 = vmul.f32 0.03125, %v656_v19  ;;  %v675_v28 = vmul.f32 %v667_v45, %v4116_v34  ;;  %v676_v6 = vmul.f32 %v668_v9, %v4119_v35 }
 0x541   :  { %v683_v37 = vmul.f32 %v675_v28, %v675_v28  ;;  %v684_v40 = vmul.f32 %v676_v6, %v676_v6  ;;  %v669_v60 = vsub.f32 %v4375_v47, %v4401_v27  ;;  %v670_v20 = vsub.f32 %v4377_v49, %v4401_v27  ;;  %v3350_v28 = vld [vmem:[%s6051_s4 + $0x28] sm:$0xff] }
 0x542   :  { %v659_v24 = vpop.xlane.xlu0 %658 }
 0x543   :  { %v4409_v25 = vmul.f32 0.03125, %v659_v24  ;;  %v691_v4 = vadd.f32 %v684_v40, %v683_v37  ;;  %v677_v5 = vmul.f32 %v669_v60, %v4116_v34  ;;  %v678_v26 = vmul.f32 %v670_v20, %v4119_v35  ;;  %v3353_v60 = vld [vmem:[%s6052_s5 + $0x20] sm:$0xff]  ;;  %v3354_v20 = vld [vmem:[%s6052_s5 + $0x28] sm:$0xff]  ;;  %v3351_v24 = vld [vmem:[%s6051_s4 + $0x30] sm:$0xff] }
 0x545   :  { %692 = vadd.xlane.f32.xlu0 %v691_v4  ;;  %v685_v29 = vmul.f32 %v677_v5, %v677_v5  ;;  %v686_v30 = vmul.f32 %v678_v26, %v678_v26  ;;  %v671_v31 = vsub.f32 %v4383_v58, %v4409_v25  ;;  %v672_v33 = vsub.f32 %v4385_v61, %v4409_v25 }
 0x546   :  { %v662_v12 = vpop.xlane.xlu1 %661 }
 0x547   :  { %v666_v36 = vmul.f32 0.03125, %v662_v12  ;;  %v694_v38 = vadd.f32 %v686_v30, %v685_v29  ;;  %v679_v39 = vmul.f32 %v671_v31, %v4116_v34  ;;  %v680_v42 = vmul.f32 %v672_v33, %v4119_v35 }
 0x549   :  { %695 = vadd.xlane.f32.xlu1 %v694_v38  ;;  %v687_v21 = vmul.f32 %v679_v39, %v679_v39  ;;  %v688_v18 = vmul.f32 %v680_v42, %v680_v42  ;;  %v673_v17 = vsub.f32 %v4391_v7, %v666_v36  ;;  %v674_v46 = vsub.f32 %v4393_v62, %v666_v36  ;;  %v3355_v38 = vld [vmem:[%s6052_s5 + $0x30] sm:$0xff] }
 0x54b   :  { %v697_v48 = vadd.f32 %v688_v18, %v687_v21  ;;  %v681_v51 = vmul.f32 %v673_v17, %v4116_v34  ;;  %v682_v32 = vmul.f32 %v674_v46, %v4119_v35 }
 0x54d   :  { %698 = vadd.xlane.f32.xlu0 %v697_v48  ;;  %v689_v53 = vmul.f32 %v681_v51, %v681_v51  ;;  %v690_v55 = vmul.f32 %v682_v32, %v682_v32 }
 0x54f   :  { %v700_v56 = vadd.f32 %v690_v55, %v689_v53 }
 0x551   :  { %701 = vadd.xlane.f32.xlu1 %v700_v56 }
 0x5d2   :  { %v693_v59 = vpop.xlane.xlu0 %692 }
 0x5d3   :  { %v703_v63 = vmul.f32 0.03125, %v693_v59 }
 0x5d5   :  { %v712_v0 = vadd.f32 1e-05, %v703_v63 }
 0x5d6   :  { %v696_v1 = vpop.xlane.xlu1 %695 }
 0x5d7   :  { %3744 = vrsqrt.f32 %v712_v0  ;;  %v704_v2 = vmul.f32 0.03125, %v696_v1 }
 0x5d9   :  { %v713_v3 = vadd.f32 1e-05, %v704_v2 }
 0x5da   :  { %v699_v10 = vpop.xlane.xlu0 %698 }
 0x5db   :  { %3746 = vrsqrt.f32 %v713_v3  ;;  %v705_v13 = vmul.f32 0.03125, %v699_v10 }
 0x5dd   :  { %v714_v50 = vadd.f32 1e-05, %v705_v13 }
 0x5de   :  { %v702_v14 = vpop.xlane.xlu1 %701 }
 0x5df   :  { %3748 = vrsqrt.f32 %v714_v50  ;;  %v706_v52 = vmul.f32 0.03125, %v702_v14 }
 0x5e1   :  { %v3745_v45 = vpop.eup %3744  ;;  %v715_v9 = vadd.f32 1e-05, %v706_v52 }
 0x5e2   :  { %v720_v19 = vmul.f32 %v3745_v45, %v3349_v15 }
 0x5e3   :  { %3750 = vrsqrt.f32 %v715_v9 }
 0x5e4   :  { %739 = vperm.xlu0 %3728, %v720_v19   ;;  %v729_v40 = vmul.f32 %v720_v19, %v663_v44  ;;  %v3352_v44 = vld [vmem:[%s6051_s4 + $0x38] sm:$0xff] }
 0x5e5   :  { %v3747_v6 = vpop.eup %3746 }
 0x5e6   :  { %v721_v37 = vmul.f32 %v3747_v6, %v3350_v28  ;;  %v733_v26 = vsub.f32 %v3353_v60, %v729_v40 }
 0x5e8   :  { %744 = vperm.xlu1 %3729, %v721_v37   ;;  %v730_v4 = vmul.f32 %v721_v37, %v4401_v27  ;;  %v3356_v27 = vld [vmem:[%s6052_s5 + $0x38] sm:$0xff] }
 0x5e9   :  { %v3749_v5 = vpop.eup %3748 }
 0x5ea   :  { %v734_v29 = vsub.f32 %v3354_v20, %v730_v4  ;;  %v722_v30 = vmul.f32 %v3749_v5, %v3351_v24 }
 0x5ec   :  { %767 = vperm.xlu1 %3729, %v733_v26   ;;  %772 = vperm.xlu0 %3728, %v734_v29   ;;  %v731_v12 = vmul.f32 %v722_v30, %v4409_v25  ;;  %v3362_v29 = vld [vmem:[%s6050_s3 + $0x48] sm:$0xff] }
 0x5ed   :  { %v3751_v31 = vpop.eup %3750 }
 0x5ee   :  { %v723_v33 = vmul.f32 %v3751_v31, %v3352_v44  ;;  %v735_v42 = vsub.f32 %v3355_v38, %v731_v12  ;;  %v3364_v44 = vld [vmem:[%s6050_s3 + $0x58] sm:$0xff]  ;;  %v3363_v31 = vld [vmem:[%s6050_s3 + $0x50] sm:$0xff] }
 0x5f0   :  { %749 = vperm.xlu1 %3729, %v722_v30   ;;  %754 = vperm.xlu0 %3728, %v723_v33   ;;  %v732_v39 = vmul.f32 %v723_v33, %v666_v36  ;;  %v3361_v30 = vld [vmem:[%s6050_s3 + $0x40] sm:$0xff] }
 0x5f2   :  { %v736_v21 = vsub.f32 %v3356_v27, %v732_v39 }
 0x5f4   :  { %777 = vperm.xlu1 %3729, %v735_v42   ;;  %782 = vperm.xlu0 %3728, %v736_v21  }
 0x663   :  { %v740_v18 = vpop.permute.xlu0 %739 }
 0x664   :  { %v757_v46 = vmul.f32 %v740_v18, %v4367_v41  ;;  %v758_v25 = vmul.f32 %v740_v18, %v4369_v43 }
 0x667   :  { %v745_v17 = vpop.permute.xlu1 %744 }
 0x668   :  { %v759_v48 = vmul.f32 %v745_v17, %v4375_v47  ;;  %v760_v51 = vmul.f32 %v745_v17, %v4377_v49 }
 0x66b   :  { %v773_v32 = vpop.permute.xlu0 %772  ;;  %v768_v53 = vpop.permute.xlu1 %767 }
 0x66c   :  { %v787_v55 = vadd.f32 %v773_v32, %v759_v48  ;;  %v788_v56 = vadd.f32 %v773_v32, %v760_v51  ;;  %v785_v59 = vadd.f32 %v768_v53, %v757_v46  ;;  %v786_v36 = vadd.f32 %v768_v53, %v758_v25 }
 0x66e   :  { %v795_v63 = vmax.f32 %v787_v55, 0.0  ;;  %v796_v0 = vmax.f32 %v788_v56, 0.0  ;;  %v793_v1 = vmax.f32 %v785_v59, 0.0  ;;  %v794_v2 = vmax.f32 %v786_v36, 0.0 }
 0x66f   :  { %v755_v3 = vpop.permute.xlu0 %754  ;;  %v750_v10 = vpop.permute.xlu1 %749 }
 0x670   :  { %v4454_v41 = vmul.f32 %v795_v63, %v4116_v34  ;;  %v4457_v43 = vmul.f32 %v793_v1, %v4116_v34  ;;  %v4460_v47 = vmul.f32 %v796_v0, %v4119_v35  ;;  %v4463_v49 = vmul.f32 %v794_v2, %v4119_v35 }
 0x671   :  { %v763_v13 = vmul.f32 %v755_v3, %v4391_v7  ;;  %v764_v50 = vmul.f32 %v755_v3, %v4393_v62  ;;  %v761_v14 = vmul.f32 %v750_v10, %v4383_v58  ;;  %v762_v52 = vmul.f32 %v750_v10, %v4385_v61 }
 0x672   :  { %811 = vrot.lane.b32.xlu0 %v4454_v41, %s3852_s21  ;;  %809 = vrot.lane.b32.xlu1 %v4457_v43, %s3852_s21  ;;  %v3572_v9 = vpack.c.bf16 %v4460_v47, %v4463_v49  ;;  %v3574_v7 = vpack.c.bf16 %v4454_v41, %v4457_v43 }
 0x673   :  { %v783_v15 = vpop.permute.xlu0 %782  ;;  %v778_v45 = vpop.permute.xlu1 %777 }
 0x674   :  { %v791_v19 = vadd.f32 %v783_v15, %v763_v13  ;;  %v792_v62 = vadd.f32 %v783_v15, %v764_v50  ;;  %v789_v28 = vadd.f32 %v778_v45, %v761_v14  ;;  %v790_v58 = vadd.f32 %v778_v45, %v762_v52 }
 0x676   :  { %v799_v6 = vmax.f32 %v791_v19, 0.0  ;;  %v800_v61 = vmax.f32 %v792_v62, 0.0  ;;  %v797_v37 = vmax.f32 %v789_v28, 0.0  ;;  %v798_v40 = vmax.f32 %v790_v58, 0.0  ;;  %819 = vrot.lane.b32.xlu0 %v4460_v47, %s3852_s21  ;;  %817 = vrot.lane.b32.xlu1 %v4463_v49, %s3852_s21 }
 0x678   :  { %v4482_v60 = vmul.f32 %v799_v6, %v4116_v34  ;;  %v4485_v20 = vmul.f32 %v797_v37, %v4116_v34  ;;  %v4488_v24 = vmul.f32 %v800_v61, %v4119_v35  ;;  %v4491_v4 = vmul.f32 %v798_v40, %v4119_v35 }
 0x67a   :  { %v3576_v5 = vpack.c.bf16 %v4488_v24, %v4491_v4  ;;  %v3578_v26 = vpack.c.bf16 %v4482_v60, %v4485_v20  ;;  %815 = vrot.lane.b32.xlu0 %v4482_v60, %s3852_s21  ;;  %813 = vrot.lane.b32.xlu1 %v4485_v20, %s3852_s21 }
 0x67e   :  { %823 = vrot.lane.b32.xlu0 %v4488_v24, %s3852_s21  ;;  %821 = vrot.lane.b32.xlu1 %v4491_v4, %s3852_s21 }
 0x682   :  { %843 = vrot.lane.b32.xlu0 %v4454_v41, %s3853_s15  ;;  %841 = vrot.lane.b32.xlu1 %v4457_v43, %s3853_s15 }
 0x686   :  { %851 = vrot.lane.b32.xlu0 %v4460_v47, %s3853_s15  ;;  %849 = vrot.lane.b32.xlu1 %v4463_v49, %s3853_s15 }
 0x68a   :  { %847 = vrot.lane.b32.xlu0 %v4482_v60, %s3853_s15  ;;  %845 = vrot.lane.b32.xlu1 %v4485_v20, %s3853_s15 }
 0x68e   :  { %855 = vrot.lane.b32.xlu0 %v4488_v24, %s3853_s15  ;;  %853 = vrot.lane.b32.xlu1 %v4491_v4, %s3853_s15 }
 0x692   :  { %890 = vperm.xlu0 %3728, %v3362_v29   ;;  %885 = vperm.xlu1 %3729, %v3361_v30  }
 0x696   :  { %900 = vperm.xlu0 %3728, %v3364_v44   ;;  %895 = vperm.xlu1 %3729, %v3363_v31  }
 0x6e4   :  { %v812_v33 = vpop.permute.xlu0 %811  ;;  %v810_v12 = vpop.permute.xlu1 %809 }
 0x6e8   :  { %v820_v38 = vpop.permute.xlu0 %819  ;;  %v818_v27 = vpop.permute.xlu1 %817 }
 0x6e9   :  { %v826_v39 = vsel %vm71_vm0, %v812_v33, %v820_v38  ;;  %v830_v42 = vsel %vm71_vm0, %v820_v38, %v812_v33  ;;  %v825_v21 = vsel %vm71_vm0, %v810_v12, %v818_v27  ;;  %v829_v18 = vsel %vm71_vm0, %v818_v27, %v810_v12  ;;  %v3357_v12 = vld [vmem:[%s6049_s2 + $0x40] sm:$0xff]  ;;  %v3358_v38 = vld [vmem:[%s6049_s2 + $0x48] sm:$0xff]  ;;  %v3359_v27 = vld [vmem:[%s6049_s2 + $0x50] sm:$0xff] }
 0x6ea   :  { %v835_v17 = vmul.f32 %v830_v42, %v4024_v23  ;;  %v836_v46 = vmul.f32 %v826_v39, %v4021_v22  ;;  %v833_v25 = vmul.f32 %v829_v18, %v4024_v23  ;;  %v834_v48 = vmul.f32 %v825_v21, %v4021_v22  ;;  %v3360_v39 = vld [vmem:[%s6049_s2 + $0x58] sm:$0xff] }
 0x6ec   :  { %v3566_v51 = vpack.c.bf16 %v835_v17, %v833_v25  ;;  %v816_v32 = vpop.permute.xlu0 %815  ;;  %v814_v53 = vpop.permute.xlu1 %813  ;;  %v3564_v55 = vpack.c.bf16 %v836_v46, %v834_v48 }
 0x6ee   :  { %3565 = vmatprep.subr.bf16.mxu0 %v3564_v55 }
 0x6ef   :  { %3567 = vmatpush1.bf16.msra.mxu0 %v3566_v51 }
 0x6f0   :  { %v824_v56 = vpop.permute.xlu0 %823  ;;  %v822_v59 = vpop.permute.xlu1 %821 }
 0x6f1   :  { %v828_v36 = vsel %vm71_vm0, %v816_v32, %v824_v56  ;;  %v832_v63 = vsel %vm71_vm0, %v824_v56, %v816_v32  ;;  %v827_v0 = vsel %vm71_vm0, %v814_v53, %v822_v59  ;;  %v831_v1 = vsel %vm71_vm0, %v822_v59, %v814_v53 }
 0x6f2   :  { %v839_v2 = vmul.f32 %v832_v63, %v4024_v23  ;;  %v840_v3 = vmul.f32 %v828_v36, %v4021_v22  ;;  %v837_v10 = vmul.f32 %v831_v1, %v4024_v23  ;;  %v838_v13 = vmul.f32 %v827_v0, %v4021_v22 }
 0x6f4   :  { %v3570_v50 = vpack.c.bf16 %v839_v2, %v837_v10  ;;  %v844_v14 = vpop.permute.xlu0 %843  ;;  %v842_v52 = vpop.permute.xlu1 %841  ;;  %v3568_v15 = vpack.c.bf16 %v840_v3, %v838_v13 }
 0x6f6   :  { %3569 = vmatprep.subr.bf16.mxu0 %v3568_v15 }
 0x6f7   :  { %3571 = vmatpush1.bf16.msra.mxu0 %v3570_v50 }
 0x6f8   :  { %v852_v45 = vpop.permute.xlu0 %851  ;;  %3573 = vmatprep.subr.bf16.mxu0 %v3572_v9  ;;  %v850_v19 = vpop.permute.xlu1 %849 }
 0x6f9   :  { %v858_v62 = vsel %vm115_vm1, %v844_v14, %v852_v45  ;;  %v862_v28 = vsel %vm115_vm1, %v852_v45, %v844_v14  ;;  %v857_v58 = vsel %vm115_vm1, %v842_v52, %v850_v19  ;;  %v861_v6 = vsel %vm115_vm1, %v850_v19, %v842_v52 }
 0x6fa   :  { %v868_v61 = vmul.f32 %v862_v28, %v4057_v54  ;;  %v866_v37 = vmul.f32 %v861_v6, %v4057_v54  ;;  %v867_v47 = vmul.f32 %v858_v62, %v4062_v57  ;;  %v865_v49 = vmul.f32 %v857_v58, %v4062_v57 }
 0x6fb   :  { %3575 = vmatpush1.bf16.msra.mxu0 %v3574_v7 }
 0x6fc   :  { %v848_v9 = vpop.permute.xlu0 %847  ;;  %3577 = vmatprep.subr.bf16.mxu0 %v3576_v5  ;;  %v846_v40 = vpop.permute.xlu1 %845  ;;  %v3580_v29 = vpack.c.bf16 %v868_v61, %v866_v37  ;;  %v3582_v30 = vpack.c.bf16 %v867_v47, %v865_v49 }
 0x6ff   :  { %3579 = vmatpush1.bf16.msra.mxu0 %v3578_v26 }
 0x700   :  { %v856_v44 = vpop.permute.xlu0 %855  ;;  %3581 = vmatprep.subr.bf16.mxu0 %v3580_v29  ;;  %v854_v41 = vpop.permute.xlu1 %853 }
 0x701   :  { %v860_v43 = vsel %vm115_vm1, %v848_v9, %v856_v44  ;;  %v864_v7 = vsel %vm115_vm1, %v856_v44, %v848_v9  ;;  %v859_v24 = vsel %vm115_vm1, %v846_v40, %v854_v41  ;;  %v863_v4 = vsel %vm115_vm1, %v854_v41, %v846_v40 }
 0x702   :  { %v871_v5 = vmul.f32 %v860_v43, %v4062_v57  ;;  %v872_v60 = vmul.f32 %v864_v7, %v4057_v54  ;;  %v869_v20 = vmul.f32 %v859_v24, %v4062_v57  ;;  %v870_v26 = vmul.f32 %v863_v4, %v4057_v54 }
 0x703   :  { %3583 = vmatpush1.bf16.msra.mxu0 %v3582_v30 }
 0x704   :  { %v3586_v31 = vpack.c.bf16 %v871_v5, %v869_v20  ;;  %v3584_v33 = vpack.c.bf16 %v872_v60, %v870_v26 }
 0x706   :  { %3585 = vmatprep.subr.bf16.mxu0 %v3584_v33 }
 0x707   :  { %3587 = vmatpush1.bf16.msra.mxu0 %v3586_v31 }
 0x70a   :  { %3365 = vmatmul.mubr.msk.f32.vlgmr.msra.gmra.mrb[8].mxu0 %vm171_vm2, %v3357_v12 }
 0x70b   :  { %985 = vmatprep.mubr.f32.mxu0 %v3854_v8 }
 0x70e   :  { %3366 = vmatmul.mubr.msk.f32.gmra.mrb[10].mxu0 %vm171_vm2, %v3358_v38 }
 0x70f   :  { %991 = vmatprep.mubr.f32.mxu0 %v3854_v8 }
 0x711   :  { %v886_v42 = vpop.permute.xlu1 %885  ;;  %v891_v48 = vpop.permute.xlu0 %890 }
 0x712   :  { %3367 = vmatmul.mubr.msk.f32.gmra.mrb[12].mxu0 %vm171_vm2, %v3359_v27 }
 0x713   :  { %997 = vmatprep.mubr.f32.mxu0 %v3854_v8 }
 0x715   :  { %v896_v63 = vpop.permute.xlu1 %895  ;;  %v901_v14 = vpop.permute.xlu0 %900 }
 0x716   :  { %3368 = vmatmul.mubr.msk.f32.gmra.mrb[14].mxu0 %vm171_vm2, %v3360_v39 }
 0x717   :  { %1701 = vmatprep.mubr.f32.mxu0 %v3854_v8 }
 0x7dd   :  { %v981_v21 = vpop.f32.mrb[8].mxu0 }
 0x7de   :  { %v4613_v18 = vadd.f32 %v981_v21, %v886_v42  ;;  %v983_v17 = vpop.f32.mrb[9].mxu0 }
 0x7df   :  { %v4615_v46 = vadd.f32 %v983_v17, %v886_v42 }
 0x7e0   :  { %v1004_v25 = vmul.f32 %v4613_v18, %v4116_v34 }
 0x7e1   :  { %v987_v51 = vpop.f32.mrb[10].mxu0  ;;  %v1005_v32 = vmul.f32 %v4615_v46, %v4119_v35 }
 0x7e2   :  { %v4621_v53 = vadd.f32 %v987_v51, %v891_v48  ;;  %v989_v55 = vpop.f32.mrb[11].mxu0 }
 0x7e3   :  { %v4623_v56 = vadd.f32 %v989_v55, %v891_v48  ;;  %v1012_v59 = vadd.f32 %v1005_v32, %v1004_v25 }
 0x7e4   :  { %v1006_v36 = vmul.f32 %v4621_v53, %v4116_v34 }
 0x7e5   :  { %v993_v0 = vpop.f32.mrb[12].mxu0  ;;  %1013 = vadd.xlane.f32.xlu1 %v1012_v59  ;;  %v1007_v1 = vmul.f32 %v4623_v56, %v4119_v35 }
 0x7e6   :  { %v4629_v2 = vadd.f32 %v993_v0, %v896_v63  ;;  %v995_v3 = vpop.f32.mrb[13].mxu0 }
 0x7e7   :  { %v4631_v10 = vadd.f32 %v995_v3, %v896_v63  ;;  %v1015_v13 = vadd.f32 %v1007_v1, %v1006_v36 }
 0x7e8   :  { %v1008_v50 = vmul.f32 %v4629_v2, %v4116_v34 }
 0x7e9   :  { %v999_v52 = vpop.f32.mrb[14].mxu0  ;;  %1016 = vadd.xlane.f32.xlu0 %v1015_v13  ;;  %v1009_v15 = vmul.f32 %v4631_v10, %v4119_v35 }
 0x7ea   :  { %v4637_v45 = vadd.f32 %v999_v52, %v901_v14  ;;  %v1001_v19 = vpop.f32.mrb[15].mxu0 }
 0x7eb   :  { %v4639_v62 = vadd.f32 %v1001_v19, %v901_v14  ;;  %v1018_v28 = vadd.f32 %v1009_v15, %v1008_v50 }
 0x7ec   :  { %v1010_v58 = vmul.f32 %v4637_v45, %v4116_v34 }
 0x7ed   :  { %1019 = vadd.xlane.f32.xlu0 %v1018_v28  ;;  %v1011_v6 = vmul.f32 %v4639_v62, %v4119_v35 }
 0x7ef   :  { %v1021_v61 = vadd.f32 %v1011_v6, %v1010_v58 }
 0x7f1   :  { %1022 = vadd.xlane.f32.xlu1 %v1021_v61 }
 0x872   :  { %v1014_v37 = vpop.xlane.xlu1 %1013 }
 0x873   :  { %v1024_v47 = vmul.f32 0.03125, %v1014_v37  ;;  %v3369_v37 = vld [vmem:[%s6051_s4 + $0x40] sm:$0xff] }
 0x875   :  { %v1028_v49 = vsub.f32 %v4613_v18, %v1024_v47  ;;  %v1029_v9 = vsub.f32 %v4615_v46, %v1024_v47 }
 0x876   :  { %v1017_v40 = vpop.xlane.xlu0 %1016 }
 0x877   :  { %v4647_v29 = vmul.f32 0.03125, %v1017_v40  ;;  %v1036_v30 = vmul.f32 %v1028_v49, %v4116_v34  ;;  %v1037_v44 = vmul.f32 %v1029_v9, %v4119_v35 }
 0x879   :  { %v1044_v41 = vmul.f32 %v1036_v30, %v1036_v30  ;;  %v1045_v43 = vmul.f32 %v1037_v44, %v1037_v44  ;;  %v1030_v7 = vsub.f32 %v4621_v53, %v4647_v29  ;;  %v1031_v24 = vsub.f32 %v4623_v56, %v4647_v29  ;;  %v3370_v30 = vld [vmem:[%s6051_s4 + $0x48] sm:$0xff] }
 0x87a   :  { %v1020_v4 = vpop.xlane.xlu0 %1019 }
 0x87b   :  { %v4655_v5 = vmul.f32 0.03125, %v1020_v4  ;;  %v1052_v60 = vadd.f32 %v1045_v43, %v1044_v41  ;;  %v1038_v20 = vmul.f32 %v1030_v7, %v4116_v34  ;;  %v1039_v26 = vmul.f32 %v1031_v24, %v4119_v35  ;;  %v3373_v7 = vld [vmem:[%s6052_s5 + $0x40] sm:$0xff]  ;;  %v3374_v24 = vld [vmem:[%s6052_s5 + $0x48] sm:$0xff]  ;;  %v3371_v4 = vld [vmem:[%s6051_s4 + $0x50] sm:$0xff] }
 0x87d   :  { %v1032_v31 = vsub.f32 %v4629_v2, %v4655_v5  ;;  %v1033_v33 = vsub.f32 %v4631_v10, %v4655_v5  ;;  %1053 = vadd.xlane.f32.xlu0 %v1052_v60  ;;  %v1046_v12 = vmul.f32 %v1038_v20, %v1038_v20  ;;  %v1047_v38 = vmul.f32 %v1039_v26, %v1039_v26 }
 0x87e   :  { %v1023_v27 = vpop.xlane.xlu1 %1022 }
 0x87f   :  { %v1027_v39 = vmul.f32 0.03125, %v1023_v27  ;;  %v1055_v42 = vadd.f32 %v1047_v38, %v1046_v12  ;;  %v1040_v21 = vmul.f32 %v1032_v31, %v4116_v34  ;;  %v1041_v17 = vmul.f32 %v1033_v33, %v4119_v35 }
 0x881   :  { %v1034_v25 = vsub.f32 %v4637_v45, %v1027_v39  ;;  %v1035_v48 = vsub.f32 %v4639_v62, %v1027_v39  ;;  %1056 = vadd.xlane.f32.xlu1 %v1055_v42  ;;  %v1048_v51 = vmul.f32 %v1040_v21, %v1040_v21  ;;  %v1049_v32 = vmul.f32 %v1041_v17, %v1041_v17  ;;  %v3375_v42 = vld [vmem:[%s6052_s5 + $0x50] sm:$0xff] }
 0x883   :  { %v1058_v55 = vadd.f32 %v1049_v32, %v1048_v51  ;;  %v1042_v59 = vmul.f32 %v1034_v25, %v4116_v34  ;;  %v1043_v36 = vmul.f32 %v1035_v48, %v4119_v35 }
 0x885   :  { %1059 = vadd.xlane.f32.xlu0 %v1058_v55  ;;  %v1050_v63 = vmul.f32 %v1042_v59, %v1042_v59  ;;  %v1051_v0 = vmul.f32 %v1043_v36, %v1043_v36 }
 0x887   :  { %v1061_v1 = vadd.f32 %v1051_v0, %v1050_v63 }
 0x889   :  { %1062 = vadd.xlane.f32.xlu1 %v1061_v1 }
 0x90a   :  { %v1054_v3 = vpop.xlane.xlu0 %1053 }
 0x90b   :  { %v1064_v13 = vmul.f32 0.03125, %v1054_v3 }
 0x90d   :  { %v1073_v50 = vadd.f32 1e-05, %v1064_v13 }
 0x90e   :  { %v1057_v14 = vpop.xlane.xlu1 %1056 }
 0x90f   :  { %3752 = vrsqrt.f32 %v1073_v50  ;;  %v1065_v52 = vmul.f32 0.03125, %v1057_v14 }
 0x911   :  { %v1074_v15 = vadd.f32 1e-05, %v1065_v52 }
 0x912   :  { %v1060_v19 = vpop.xlane.xlu0 %1059 }
 0x913   :  { %3754 = vrsqrt.f32 %v1074_v15  ;;  %v1066_v28 = vmul.f32 0.03125, %v1060_v19 }
 0x915   :  { %v1075_v58 = vadd.f32 1e-05, %v1066_v28 }
 0x916   :  { %v1063_v6 = vpop.xlane.xlu1 %1062 }
 0x917   :  { %3756 = vrsqrt.f32 %v1075_v58  ;;  %v1067_v61 = vmul.f32 0.03125, %v1063_v6 }
 0x919   :  { %v3753_v49 = vpop.eup %3752  ;;  %v1076_v9 = vadd.f32 1e-05, %v1067_v61 }
 0x91a   :  { %v1081_v40 = vmul.f32 %v3753_v49, %v3369_v37 }
 0x91b   :  { %3758 = vrsqrt.f32 %v1076_v9 }
 0x91c   :  { %1100 = vperm.xlu0 %3728, %v1081_v40   ;;  %v1090_v43 = vmul.f32 %v1081_v40, %v1024_v47  ;;  %v3372_v47 = vld [vmem:[%s6051_s4 + $0x58] sm:$0xff] }
 0x91d   :  { %v3755_v44 = vpop.eup %3754 }
 0x91e   :  { %v1082_v41 = vmul.f32 %v3755_v44, %v3370_v30  ;;  %v1094_v26 = vsub.f32 %v3373_v7, %v1090_v43 }
 0x920   :  { %1105 = vperm.xlu1 %3729, %v1082_v41   ;;  %v1091_v60 = vmul.f32 %v1082_v41, %v4647_v29  ;;  %v3376_v29 = vld [vmem:[%s6052_s5 + $0x58] sm:$0xff] }
 0x921   :  { %v3757_v20 = vpop.eup %3756 }
 0x922   :  { %v1095_v31 = vsub.f32 %v3374_v24, %v1091_v60  ;;  %v1083_v33 = vmul.f32 %v3757_v20, %v3371_v4 }
 0x924   :  { %1128 = vperm.xlu1 %3729, %v1094_v26   ;;  %1133 = vperm.xlu0 %3728, %v1095_v31   ;;  %v1092_v27 = vmul.f32 %v1083_v33, %v4655_v5  ;;  %v3382_v31 = vld [vmem:[%s6050_s3 + $0x68] sm:$0xff] }
 0x925   :  { %v3759_v12 = vpop.eup %3758 }
 0x926   :  { %v1084_v38 = vmul.f32 %v3759_v12, %v3372_v47  ;;  %v1096_v17 = vsub.f32 %v3375_v42, %v1092_v27  ;;  %v3384_v47 = vld [vmem:[%s6050_s3 + $0x78] sm:$0xff]  ;;  %v3383_v12 = vld [vmem:[%s6050_s3 + $0x70] sm:$0xff] }
 0x928   :  { %1110 = vperm.xlu1 %3729, %v1083_v33   ;;  %1115 = vperm.xlu0 %3728, %v1084_v38   ;;  %v1093_v21 = vmul.f32 %v1084_v38, %v1027_v39  ;;  %v3381_v33 = vld [vmem:[%s6050_s3 + $0x60] sm:$0xff] }
 0x92a   :  { %v1097_v25 = vsub.f32 %v3376_v29, %v1093_v21 }
 0x92c   :  { %1138 = vperm.xlu1 %3729, %v1096_v17   ;;  %1143 = vperm.xlu0 %3728, %v1097_v25  }
 0x99b   :  { %v1101_v48 = vpop.permute.xlu0 %1100 }
 0x99c   :  { %v1118_v32 = vmul.f32 %v1101_v48, %v4613_v18  ;;  %v1119_v5 = vmul.f32 %v1101_v48, %v4615_v46 }
 0x99f   :  { %v1106_v51 = vpop.permute.xlu1 %1105 }
 0x9a0   :  { %v1120_v55 = vmul.f32 %v1106_v51, %v4621_v53  ;;  %v1121_v59 = vmul.f32 %v1106_v51, %v4623_v56 }
 0x9a3   :  { %v1134_v36 = vpop.permute.xlu0 %1133  ;;  %v1129_v63 = vpop.permute.xlu1 %1128 }
 0x9a4   :  { %v1148_v0 = vadd.f32 %v1134_v36, %v1120_v55  ;;  %v1149_v1 = vadd.f32 %v1134_v36, %v1121_v59  ;;  %v1146_v3 = vadd.f32 %v1129_v63, %v1118_v32  ;;  %v1147_v39 = vadd.f32 %v1129_v63, %v1119_v5 }
 0x9a6   :  { %v1156_v13 = vmax.f32 %v1148_v0, 0.0  ;;  %v1157_v50 = vmax.f32 %v1149_v1, 0.0  ;;  %v1154_v14 = vmax.f32 %v1146_v3, 0.0  ;;  %v1155_v52 = vmax.f32 %v1147_v39, 0.0 }
 0x9a7   :  { %v1116_v15 = vpop.permute.xlu0 %1115  ;;  %v1111_v19 = vpop.permute.xlu1 %1110 }
 0x9a8   :  { %v4700_v18 = vmul.f32 %v1156_v13, %v4116_v34  ;;  %v4703_v46 = vmul.f32 %v1157_v50, %v4119_v35  ;;  %v4706_v53 = vmul.f32 %v1154_v14, %v4116_v34  ;;  %v4709_v56 = vmul.f32 %v1155_v52, %v4119_v35 }
 0x9a9   :  { %v1124_v28 = vmul.f32 %v1116_v15, %v4637_v45  ;;  %v1125_v58 = vmul.f32 %v1116_v15, %v4639_v62  ;;  %v1122_v6 = vmul.f32 %v1111_v19, %v4629_v2  ;;  %v1123_v61 = vmul.f32 %v1111_v19, %v4631_v10 }
 0x9aa   :  { %1172 = vrot.lane.b32.xlu0 %v4700_v18, %s3852_s21  ;;  %1170 = vrot.lane.b32.xlu1 %v4706_v53, %s3852_s21  ;;  %v3596_v37 = vpack.c.bf16 %v4703_v46, %v4709_v56  ;;  %v3598_v49 = vpack.c.bf16 %v4700_v18, %v4706_v53 }
 0x9ab   :  { %v1144_v9 = vpop.permute.xlu0 %1143  ;;  %v1139_v45 = vpop.permute.xlu1 %1138 }
 0x9ac   :  { %v1152_v40 = vadd.f32 %v1144_v9, %v1124_v28  ;;  %v1153_v62 = vadd.f32 %v1144_v9, %v1125_v58  ;;  %v1150_v30 = vadd.f32 %v1139_v45, %v1122_v6  ;;  %v1151_v2 = vadd.f32 %v1139_v45, %v1123_v61 }
 0x9ae   :  { %v1160_v44 = vmax.f32 %v1152_v40, 0.0  ;;  %v1161_v10 = vmax.f32 %v1153_v62, 0.0  ;;  %v1158_v41 = vmax.f32 %v1150_v30, 0.0  ;;  %v1159_v43 = vmax.f32 %v1151_v2, 0.0  ;;  %1180 = vrot.lane.b32.xlu0 %v4703_v46, %s3852_s21  ;;  %1178 = vrot.lane.b32.xlu1 %v4709_v56, %s3852_s21 }
 0x9b0   :  { %v4728_v7 = vmul.f32 %v1160_v44, %v4116_v34  ;;  %v4731_v24 = vmul.f32 %v1161_v10, %v4119_v35  ;;  %v4734_v4 = vmul.f32 %v1158_v41, %v4116_v34  ;;  %v4737_v60 = vmul.f32 %v1159_v43, %v4119_v35 }
 0x9b2   :  { %1176 = vrot.lane.b32.xlu0 %v4728_v7, %s3852_s21  ;;  %1174 = vrot.lane.b32.xlu1 %v4734_v4, %s3852_s21  ;;  %v3600_v20 = vpack.c.bf16 %v4731_v24, %v4737_v60  ;;  %v3602_v26 = vpack.c.bf16 %v4728_v7, %v4734_v4 }
 0x9b6   :  { %1184 = vrot.lane.b32.xlu0 %v4731_v24, %s3852_s21  ;;  %1182 = vrot.lane.b32.xlu1 %v4737_v60, %s3852_s21 }
 0x9ba   :  { %1204 = vrot.lane.b32.xlu0 %v4700_v18, %s3853_s15  ;;  %1202 = vrot.lane.b32.xlu1 %v4706_v53, %s3853_s15 }
 0x9be   :  { %1212 = vrot.lane.b32.xlu0 %v4703_v46, %s3853_s15  ;;  %1210 = vrot.lane.b32.xlu1 %v4709_v56, %s3853_s15 }
 0x9c2   :  { %1208 = vrot.lane.b32.xlu0 %v4728_v7, %s3853_s15  ;;  %1206 = vrot.lane.b32.xlu1 %v4734_v4, %s3853_s15 }
 0x9c6   :  { %1216 = vrot.lane.b32.xlu0 %v4731_v24, %s3853_s15  ;;  %1214 = vrot.lane.b32.xlu1 %v4737_v60, %s3853_s15 }
 0x9ca   :  { %1251 = vperm.xlu0 %3728, %v3382_v31   ;;  %1246 = vperm.xlu1 %3729, %v3381_v33  }
 0x9ce   :  { %1261 = vperm.xlu0 %3728, %v3384_v47   ;;  %1256 = vperm.xlu1 %3729, %v3383_v12  }
 0xa1c   :  { %v1173_v38 = vpop.permute.xlu0 %1172  ;;  %v1171_v27 = vpop.permute.xlu1 %1170 }
 0xa20   :  { %v1181_v42 = vpop.permute.xlu0 %1180  ;;  %v1179_v29 = vpop.permute.xlu1 %1178 }
 0xa21   :  { %v1187_v21 = vsel %vm71_vm0, %v1173_v38, %v1181_v42  ;;  %v1191_v17 = vsel %vm71_vm0, %v1181_v42, %v1173_v38  ;;  %v1186_v25 = vsel %vm71_vm0, %v1171_v27, %v1179_v29  ;;  %v1190_v48 = vsel %vm71_vm0, %v1179_v29, %v1171_v27  ;;  %v3377_v27 = vld [vmem:[%s6049_s2 + $0x60] sm:$0xff]  ;;  %v3378_v42 = vld [vmem:[%s6049_s2 + $0x68] sm:$0xff]  ;;  %v3379_v29 = vld [vmem:[%s6049_s2 + $0x70] sm:$0xff] }
 0xa22   :  { %v1196_v51 = vmul.f32 %v1191_v17, %v4024_v23  ;;  %v1197_v32 = vmul.f32 %v1187_v21, %v4021_v22  ;;  %v1194_v5 = vmul.f32 %v1190_v48, %v4024_v23  ;;  %v1195_v55 = vmul.f32 %v1186_v25, %v4021_v22  ;;  %v3380_v21 = vld [vmem:[%s6049_s2 + $0x78] sm:$0xff] }
 0xa24   :  { %v3590_v59 = vpack.c.bf16 %v1196_v51, %v1194_v5  ;;  %v1177_v36 = vpop.permute.xlu0 %1176  ;;  %v1175_v63 = vpop.permute.xlu1 %1174  ;;  %v3588_v0 = vpack.c.bf16 %v1197_v32, %v1195_v55 }
 0xa26   :  { %3589 = vmatprep.subr.bf16.mxu1 %v3588_v0 }
 0xa27   :  { %3591 = vmatpush1.bf16.msra.mxu1 %v3590_v59 }
 0xa28   :  { %v1185_v1 = vpop.permute.xlu0 %1184  ;;  %v1183_v3 = vpop.permute.xlu1 %1182 }
 0xa29   :  { %v1189_v39 = vsel %vm71_vm0, %v1177_v36, %v1185_v1  ;;  %v1193_v13 = vsel %vm71_vm0, %v1185_v1, %v1177_v36  ;;  %v1188_v50 = vsel %vm71_vm0, %v1175_v63, %v1183_v3  ;;  %v1192_v14 = vsel %vm71_vm0, %v1183_v3, %v1175_v63 }
 0xa2a   :  { %v1200_v52 = vmul.f32 %v1193_v13, %v4024_v23  ;;  %v1201_v15 = vmul.f32 %v1189_v39, %v4021_v22  ;;  %v1198_v19 = vmul.f32 %v1192_v14, %v4024_v23  ;;  %v1199_v28 = vmul.f32 %v1188_v50, %v4021_v22 }
 0xa2c   :  { %v3594_v58 = vpack.c.bf16 %v1200_v52, %v1198_v19  ;;  %v1205_v6 = vpop.permute.xlu0 %1204  ;;  %v1203_v61 = vpop.permute.xlu1 %1202  ;;  %v3592_v9 = vpack.c.bf16 %v1201_v15, %v1199_v28 }
 0xa2e   :  { %3593 = vmatprep.subr.bf16.mxu1 %v3592_v9 }
 0xa2f   :  { %3595 = vmatpush1.bf16.msra.mxu1 %v3594_v58 }
 0xa30   :  { %v1213_v45 = vpop.permute.xlu0 %1212  ;;  %3597 = vmatprep.subr.bf16.mxu1 %v3596_v37  ;;  %v1211_v40 = vpop.permute.xlu1 %1210 }
 0xa31   :  { %v1219_v62 = vsel %vm115_vm1, %v1205_v6, %v1213_v45  ;;  %v1223_v30 = vsel %vm115_vm1, %v1213_v45, %v1205_v6  ;;  %v1218_v2 = vsel %vm115_vm1, %v1203_v61, %v1211_v40  ;;  %v1222_v44 = vsel %vm115_vm1, %v1211_v40, %v1203_v61 }
 0xa32   :  { %v1229_v10 = vmul.f32 %v1223_v30, %v4057_v54  ;;  %v1227_v41 = vmul.f32 %v1222_v44, %v4057_v54  ;;  %v1228_v46 = vmul.f32 %v1219_v62, %v4062_v57  ;;  %v1226_v56 = vmul.f32 %v1218_v2, %v4062_v57 }
 0xa33   :  { %3599 = vmatpush1.bf16.msra.mxu1 %v3598_v49 }
 0xa34   :  { %v1209_v37 = vpop.permute.xlu0 %1208  ;;  %3601 = vmatprep.subr.bf16.mxu1 %v3600_v20  ;;  %v1207_v43 = vpop.permute.xlu1 %1206  ;;  %v3604_v31 = vpack.c.bf16 %v1229_v10, %v1227_v41  ;;  %v3606_v33 = vpack.c.bf16 %v1228_v46, %v1226_v56 }
 0xa37   :  { %3603 = vmatpush1.bf16.msra.mxu1 %v3602_v26 }
 0xa38   :  { %v1217_v47 = vpop.permute.xlu0 %1216  ;;  %3605 = vmatprep.subr.bf16.mxu1 %v3604_v31  ;;  %v1215_v18 = vpop.permute.xlu1 %1214 }
 0xa39   :  { %v1221_v53 = vsel %vm115_vm1, %v1209_v37, %v1217_v47  ;;  %v1225_v49 = vsel %vm115_vm1, %v1217_v47, %v1209_v37  ;;  %v1220_v24 = vsel %vm115_vm1, %v1207_v43, %v1215_v18  ;;  %v1224_v60 = vsel %vm115_vm1, %v1215_v18, %v1207_v43 }
 0xa3a   :  { %v1232_v20 = vmul.f32 %v1221_v53, %v4062_v57  ;;  %v1233_v7 = vmul.f32 %v1225_v49, %v4057_v54  ;;  %v1230_v4 = vmul.f32 %v1220_v24, %v4062_v57  ;;  %v1231_v26 = vmul.f32 %v1224_v60, %v4057_v54 }
 0xa3b   :  { %3607 = vmatpush1.bf16.msra.mxu1 %v3606_v33 }
 0xa3c   :  { %v3610_v12 = vpack.c.bf16 %v1232_v20, %v1230_v4  ;;  %v3608_v38 = vpack.c.bf16 %v1233_v7, %v1231_v26 }
 0xa3e   :  { %3609 = vmatprep.subr.bf16.mxu1 %v3608_v38 }
 0xa3f   :  { %3611 = vmatpush1.bf16.msra.mxu1 %v3610_v12 }
 0xa42   :  { %3385 = vmatmul.mubr.msk.f32.vlgmr.msra.gmra.mrb[8].mxu1 %vm171_vm2, %v3377_v27 }
 0xa43   :  { %1346 = vmatprep.mubr.f32.mxu1 %v3854_v8 }
 0xa46   :  { %3386 = vmatmul.mubr.msk.f32.gmra.mrb[10].mxu1 %vm171_vm2, %v3378_v42 }
 0xa47   :  { %1352 = vmatprep.mubr.f32.mxu1 %v3854_v8 }
 0xa49   :  { %v1247_v17 = vpop.permute.xlu1 %1246  ;;  %v1252_v55 = vpop.permute.xlu0 %1251 }
 0xa4a   :  { %3387 = vmatmul.mubr.msk.f32.gmra.mrb[12].mxu1 %vm171_vm2, %v3379_v29 }
 0xa4b   :  { %1358 = vmatprep.mubr.f32.mxu1 %v3854_v8 }
 0xa4d   :  { %v1257_v13 = vpop.permute.xlu1 %1256  ;;  %v1262_v6 = vpop.permute.xlu0 %1261 }
 0xa4e   :  { %3388 = vmatmul.mubr.msk.f32.gmra.mrb[14].mxu1 %vm171_vm2, %v3380_v21 }
 0xa4f   :  { %2062 = vmatprep.mubr.f32.mxu1 %v3854_v8 }
 0xb15   :  { %v1342_v25 = vpop.f32.mrb[8].mxu1 }
 0xb16   :  { %v4859_v48 = vadd.f32 %v1342_v25, %v1247_v17  ;;  %v1344_v51 = vpop.f32.mrb[9].mxu1 }
 0xb17   :  { %v4861_v32 = vadd.f32 %v1344_v51, %v1247_v17 }
 0xb18   :  { %v1365_v5 = vmul.f32 %v4859_v48, %v4116_v34 }
 0xb19   :  { %v1366_v59 = vmul.f32 %v4861_v32, %v4119_v35  ;;  %v1348_v36 = vpop.f32.mrb[10].mxu1 }
 0xb1a   :  { %v4867_v63 = vadd.f32 %v1348_v36, %v1252_v55  ;;  %v1350_v0 = vpop.f32.mrb[11].mxu1 }
 0xb1b   :  { %v4869_v1 = vadd.f32 %v1350_v0, %v1252_v55  ;;  %v1373_v3 = vadd.f32 %v1366_v59, %v1365_v5 }
 0xb1c   :  { %v1367_v39 = vmul.f32 %v4867_v63, %v4116_v34 }
 0xb1d   :  { %v1368_v50 = vmul.f32 %v4869_v1, %v4119_v35  ;;  %v1354_v14 = vpop.f32.mrb[12].mxu1  ;;  %1374 = vadd.xlane.f32.xlu1 %v1373_v3 }
 0xb1e   :  { %v4875_v52 = vadd.f32 %v1354_v14, %v1257_v13  ;;  %v1356_v15 = vpop.f32.mrb[13].mxu1 }
 0xb1f   :  { %v4877_v19 = vadd.f32 %v1356_v15, %v1257_v13  ;;  %v1376_v28 = vadd.f32 %v1368_v50, %v1367_v39 }
 0xb20   :  { %v1369_v58 = vmul.f32 %v4875_v52, %v4116_v34 }
 0xb21   :  { %v1370_v61 = vmul.f32 %v4877_v19, %v4119_v35  ;;  %v1360_v9 = vpop.f32.mrb[14].mxu1  ;;  %1377 = vadd.xlane.f32.xlu0 %v1376_v28 }
 0xb22   :  { %v4883_v45 = vadd.f32 %v1360_v9, %v1262_v6  ;;  %v1362_v40 = vpop.f32.mrb[15].mxu1 }
 0xb23   :  { %v4885_v62 = vadd.f32 %v1362_v40, %v1262_v6  ;;  %v1379_v30 = vadd.f32 %v1370_v61, %v1369_v58 }
 0xb24   :  { %v1371_v2 = vmul.f32 %v4883_v45, %v4116_v34 }
 0xb25   :  { %v1372_v44 = vmul.f32 %v4885_v62, %v4119_v35  ;;  %1380 = vadd.xlane.f32.xlu0 %v1379_v30 }
 0xb27   :  { %v1382_v10 = vadd.f32 %v1372_v44, %v1371_v2 }
 0xb29   :  { %1383 = vadd.xlane.f32.xlu1 %v1382_v10 }
 0xbaa   :  { %v1375_v41 = vpop.xlane.xlu1 %1374 }
 0xbab   :  { %v1385_v46 = vmul.f32 0.03125, %v1375_v41  ;;  %v3389_v41 = vld [vmem:[%s6051_s4 + $0x60] sm:$0xff] }
 0xbad   :  { %v1389_v56 = vsub.f32 %v4859_v48, %v1385_v46  ;;  %v1390_v37 = vsub.f32 %v4861_v32, %v1385_v46 }
 0xbae   :  { %v1378_v43 = vpop.xlane.xlu0 %1377 }
 0xbaf   :  { %v4893_v31 = vmul.f32 0.03125, %v1378_v43  ;;  %v1397_v33 = vmul.f32 %v1389_v56, %v4116_v34  ;;  %v1398_v47 = vmul.f32 %v1390_v37, %v4119_v35 }
 0xbb1   :  { %v1391_v18 = vsub.f32 %v4867_v63, %v4893_v31  ;;  %v1392_v53 = vsub.f32 %v4869_v1, %v4893_v31  ;;  %v1405_v49 = vmul.f32 %v1397_v33, %v1397_v33  ;;  %v1406_v24 = vmul.f32 %v1398_v47, %v1398_v47  ;;  %v3390_v33 = vld [vmem:[%s6051_s4 + $0x68] sm:$0xff] }
 0xbb2   :  { %v1381_v60 = vpop.xlane.xlu0 %1380 }
 0xbb3   :  { %v4901_v20 = vmul.f32 0.03125, %v1381_v60  ;;  %v1413_v7 = vadd.f32 %v1406_v24, %v1405_v49  ;;  %v1399_v4 = vmul.f32 %v1391_v18, %v4116_v34  ;;  %v1400_v26 = vmul.f32 %v1392_v53, %v4119_v35  ;;  %v3393_v49 = vld [vmem:[%s6052_s5 + $0x60] sm:$0xff]  ;;  %v3394_v24 = vld [vmem:[%s6052_s5 + $0x68] sm:$0xff]  ;;  %v3391_v60 = vld [vmem:[%s6051_s4 + $0x70] sm:$0xff] }
 0xbb5   :  { %v1393_v12 = vsub.f32 %v4875_v52, %v4901_v20  ;;  %v1394_v38 = vsub.f32 %v4877_v19, %v4901_v20  ;;  %1414 = vadd.xlane.f32.xlu0 %v1413_v7  ;;  %v1407_v27 = vmul.f32 %v1399_v4, %v1399_v4  ;;  %v1408_v42 = vmul.f32 %v1400_v26, %v1400_v26 }
 0xbb6   :  { %v1384_v29 = vpop.xlane.xlu1 %1383 }
 0xbb7   :  { %v1388_v21 = vmul.f32 0.03125, %v1384_v29  ;;  %v1416_v17 = vadd.f32 %v1408_v42, %v1407_v27  ;;  %v1401_v25 = vmul.f32 %v1393_v12, %v4116_v34  ;;  %v1402_v51 = vmul.f32 %v1394_v38, %v4119_v35 }
 0xbb9   :  { %v1395_v5 = vsub.f32 %v4883_v45, %v1388_v21  ;;  %v1396_v55 = vsub.f32 %v4885_v62, %v1388_v21  ;;  %1417 = vadd.xlane.f32.xlu1 %v1416_v17  ;;  %v1409_v59 = vmul.f32 %v1401_v25, %v1401_v25  ;;  %v1410_v36 = vmul.f32 %v1402_v51, %v1402_v51  ;;  %v3395_v17 = vld [vmem:[%s6052_s5 + $0x70] sm:$0xff] }
 0xbbb   :  { %v1419_v0 = vadd.f32 %v1410_v36, %v1409_v59  ;;  %v1403_v3 = vmul.f32 %v1395_v5, %v4116_v34  ;;  %v1404_v39 = vmul.f32 %v1396_v55, %v4119_v35 }
 0xbbd   :  { %1420 = vadd.xlane.f32.xlu0 %v1419_v0  ;;  %v1411_v13 = vmul.f32 %v1403_v3, %v1403_v3  ;;  %v1412_v50 = vmul.f32 %v1404_v39, %v1404_v39 }
 0xbbf   :  { %v1422_v14 = vadd.f32 %v1412_v50, %v1411_v13 }
 0xbc1   :  { %1423 = vadd.xlane.f32.xlu1 %v1422_v14 }
 0xc42   :  { %v1415_v15 = vpop.xlane.xlu0 %1414 }
 0xc43   :  { %v1425_v28 = vmul.f32 0.03125, %v1415_v15 }
 0xc45   :  { %v1434_v58 = vadd.f32 1e-05, %v1425_v28 }
 0xc46   :  { %v1418_v6 = vpop.xlane.xlu1 %1417 }
 0xc47   :  { %3760 = vrsqrt.f32 %v1434_v58  ;;  %v1426_v61 = vmul.f32 0.03125, %v1418_v6 }
 0xc49   :  { %v1435_v9 = vadd.f32 1e-05, %v1426_v61 }
 0xc4a   :  { %v1421_v40 = vpop.xlane.xlu0 %1420 }
 0xc4b   :  { %3762 = vrsqrt.f32 %v1435_v9  ;;  %v1427_v30 = vmul.f32 0.03125, %v1421_v40 }
 0xc4d   :  { %v1436_v2 = vadd.f32 1e-05, %v1427_v30 }
 0xc4e   :  { %v1424_v44 = vpop.xlane.xlu1 %1423 }
 0xc4f   :  { %3764 = vrsqrt.f32 %v1436_v2  ;;  %v1428_v10 = vmul.f32 0.03125, %v1424_v44 }
 0xc51   :  { %v3761_v56 = vpop.eup %3760  ;;  %v1437_v37 = vadd.f32 1e-05, %v1428_v10 }
 0xc52   :  { %v1442_v43 = vmul.f32 %v3761_v56, %v3389_v41 }
 0xc53   :  { %3766 = vrsqrt.f32 %v1437_v37 }
 0xc54   :  { %1461 = vperm.xlu0 %3728, %v1442_v43   ;;  %v1451_v53 = vmul.f32 %v1442_v43, %v1385_v46  ;;  %v3392_v46 = vld [vmem:[%s6051_s4 + $0x78] sm:$0xff] }
 0xc55   :  { %v3763_v47 = vpop.eup %3762 }
 0xc56   :  { %v1443_v18 = vmul.f32 %v3763_v47, %v3390_v33  ;;  %v1455_v26 = vsub.f32 %v3393_v49, %v1451_v53 }
 0xc58   :  { %1466 = vperm.xlu1 %3729, %v1443_v18   ;;  %v1452_v7 = vmul.f32 %v1443_v18, %v4893_v31  ;;  %v3396_v31 = vld [vmem:[%s6052_s5 + $0x78] sm:$0xff] }
 0xc59   :  { %v3765_v4 = vpop.eup %3764 }
 0xc5a   :  { %v1456_v12 = vsub.f32 %v3394_v24, %v1452_v7  ;;  %v1444_v38 = vmul.f32 %v3765_v4, %v3391_v60 }
 0xc5c   :  { %1489 = vperm.xlu1 %3729, %v1455_v26   ;;  %1494 = vperm.xlu0 %3728, %v1456_v12   ;;  %v1453_v29 = vmul.f32 %v1444_v38, %v4901_v20  ;;  %v3402_v12 = vld [vmem:[%s6050_s3 + $0x88] sm:$0xff] }
 0xc5d   :  { %v3767_v27 = vpop.eup %3766 }
 0xc5e   :  { %v1445_v42 = vmul.f32 %v3767_v27, %v3392_v46  ;;  %v1457_v51 = vsub.f32 %v3395_v17, %v1453_v29  ;;  %v3404_v46 = vld [vmem:[%s6050_s3 + $0x98] sm:$0xff]  ;;  %v3403_v27 = vld [vmem:[%s6050_s3 + $0x90] sm:$0xff] }
 0xc60   :  { %1471 = vperm.xlu1 %3729, %v1444_v38   ;;  %1476 = vperm.xlu0 %3728, %v1445_v42   ;;  %v1454_v25 = vmul.f32 %v1445_v42, %v1388_v21  ;;  %v3401_v38 = vld [vmem:[%s6050_s3 + $0x80] sm:$0xff] }
 0xc62   :  { %v1458_v5 = vsub.f32 %v3396_v31, %v1454_v25 }
 0xc64   :  { %1499 = vperm.xlu1 %3729, %v1457_v51   ;;  %1504 = vperm.xlu0 %3728, %v1458_v5  }
 0xcd3   :  { %v1462_v55 = vpop.permute.xlu0 %1461 }
 0xcd4   :  { %v1479_v36 = vmul.f32 %v1462_v55, %v4859_v48  ;;  %v1480_v20 = vmul.f32 %v1462_v55, %v4861_v32 }
 0xcd7   :  { %v1467_v59 = vpop.permute.xlu1 %1466 }
 0xcd8   :  { %v1481_v0 = vmul.f32 %v1467_v59, %v4867_v63  ;;  %v1482_v3 = vmul.f32 %v1467_v59, %v4869_v1 }
 0xcdb   :  { %v1495_v39 = vpop.permute.xlu0 %1494  ;;  %v1490_v13 = vpop.permute.xlu1 %1489 }
 0xcdc   :  { %v1509_v50 = vadd.f32 %v1495_v39, %v1481_v0  ;;  %v1510_v14 = vadd.f32 %v1495_v39, %v1482_v3  ;;  %v1507_v15 = vadd.f32 %v1490_v13, %v1479_v36  ;;  %v1508_v21 = vadd.f32 %v1490_v13, %v1480_v20 }
 0xcde   :  { %v1517_v28 = vmax.f32 %v1509_v50, 0.0  ;;  %v1518_v58 = vmax.f32 %v1510_v14, 0.0  ;;  %v1515_v6 = vmax.f32 %v1507_v15, 0.0  ;;  %v1516_v61 = vmax.f32 %v1508_v21, 0.0 }
 0xcdf   :  { %v1477_v9 = vpop.permute.xlu0 %1476  ;;  %v1472_v40 = vpop.permute.xlu1 %1471 }
 0xce0   :  { %v4946_v48 = vmul.f32 %v1517_v28, %v4116_v34  ;;  %v4949_v32 = vmul.f32 %v1518_v58, %v4119_v35  ;;  %v4952_v63 = vmul.f32 %v1515_v6, %v4116_v34  ;;  %v4955_v1 = vmul.f32 %v1516_v61, %v4119_v35 }
 0xce1   :  { %v1485_v30 = vmul.f32 %v1477_v9, %v4883_v45  ;;  %v1486_v2 = vmul.f32 %v1477_v9, %v4885_v62  ;;  %v1483_v44 = vmul.f32 %v1472_v40, %v4875_v52  ;;  %v1484_v10 = vmul.f32 %v1472_v40, %v4877_v19 }
 0xce2   :  { %1533 = vrot.lane.b32.xlu0 %v4946_v48, %s3852_s21  ;;  %1531 = vrot.lane.b32.xlu1 %v4952_v63, %s3852_s21  ;;  %v3620_v41 = vpack.c.bf16 %v4949_v32, %v4955_v1  ;;  %v3622_v56 = vpack.c.bf16 %v4946_v48, %v4952_v63 }
 0xce3   :  { %v1505_v37 = vpop.permute.xlu0 %1504  ;;  %v1500_v45 = vpop.permute.xlu1 %1499 }
 0xce4   :  { %v1513_v43 = vadd.f32 %v1505_v37, %v1485_v30  ;;  %v1514_v62 = vadd.f32 %v1505_v37, %v1486_v2  ;;  %v1511_v33 = vadd.f32 %v1500_v45, %v1483_v44  ;;  %v1512_v52 = vadd.f32 %v1500_v45, %v1484_v10 }
 0xce6   :  { %v1521_v47 = vmax.f32 %v1513_v43, 0.0  ;;  %v1522_v19 = vmax.f32 %v1514_v62, 0.0  ;;  %v1519_v18 = vmax.f32 %v1511_v33, 0.0  ;;  %v1520_v53 = vmax.f32 %v1512_v52, 0.0  ;;  %1541 = vrot.lane.b32.xlu0 %v4949_v32, %s3852_s21  ;;  %1539 = vrot.lane.b32.xlu1 %v4955_v1, %s3852_s21 }
 0xce8   :  { %v4974_v49 = vmul.f32 %v1521_v47, %v4116_v34  ;;  %v4977_v24 = vmul.f32 %v1522_v19, %v4119_v35  ;;  %v4980_v60 = vmul.f32 %v1519_v18, %v4116_v34  ;;  %v4983_v7 = vmul.f32 %v1520_v53, %v4119_v35 }
 0xcea   :  { %1537 = vrot.lane.b32.xlu0 %v4974_v49, %s3852_s21  ;;  %1535 = vrot.lane.b32.xlu1 %v4980_v60, %s3852_s21  ;;  %v3624_v4 = vpack.c.bf16 %v4977_v24, %v4983_v7  ;;  %v3626_v26 = vpack.c.bf16 %v4974_v49, %v4980_v60 }
 0xcee   :  { %1545 = vrot.lane.b32.xlu0 %v4977_v24, %s3852_s21  ;;  %1543 = vrot.lane.b32.xlu1 %v4983_v7, %s3852_s21 }
 0xcf2   :  { %1565 = vrot.lane.b32.xlu0 %v4946_v48, %s3853_s15  ;;  %1563 = vrot.lane.b32.xlu1 %v4952_v63, %s3853_s15 }
 0xcf6   :  { %1573 = vrot.lane.b32.xlu0 %v4949_v32, %s3853_s15  ;;  %1571 = vrot.lane.b32.xlu1 %v4955_v1, %s3853_s15 }
 0xcfa   :  { %1569 = vrot.lane.b32.xlu0 %v4974_v49, %s3853_s15  ;;  %1567 = vrot.lane.b32.xlu1 %v4980_v60, %s3853_s15 }
 0xcfe   :  { %1577 = vrot.lane.b32.xlu0 %v4977_v24, %s3853_s15  ;;  %1575 = vrot.lane.b32.xlu1 %v4983_v7, %s3853_s15 }
 0xd02   :  { %1612 = vperm.xlu0 %3728, %v3402_v12   ;;  %1607 = vperm.xlu1 %3729, %v3401_v38  }
 0xd06   :  { %1622 = vperm.xlu0 %3728, %v3404_v46   ;;  %1617 = vperm.xlu1 %3729, %v3403_v27  }
 0xd54   :  { %v1534_v42 = vpop.permute.xlu0 %1533  ;;  %v1532_v29 = vpop.permute.xlu1 %1531 }
 0xd58   :  { %v1542_v17 = vpop.permute.xlu0 %1541  ;;  %v1540_v31 = vpop.permute.xlu1 %1539 }
 0xd59   :  { %v1548_v25 = vsel %vm71_vm0, %v1534_v42, %v1542_v17  ;;  %v1552_v51 = vsel %vm71_vm0, %v1542_v17, %v1534_v42  ;;  %v1547_v5 = vsel %vm71_vm0, %v1532_v29, %v1540_v31  ;;  %v1551_v55 = vsel %vm71_vm0, %v1540_v31, %v1532_v29  ;;  %v3397_v29 = vld [vmem:[%s6049_s2 + $0x80] sm:$0xff]  ;;  %v3398_v17 = vld [vmem:[%s6049_s2 + $0x88] sm:$0xff]  ;;  %v3399_v31 = vld [vmem:[%s6049_s2 + $0x90] sm:$0xff] }
 0xd5a   :  { %v1557_v59 = vmul.f32 %v1552_v51, %v4024_v23  ;;  %v1558_v36 = vmul.f32 %v1548_v25, %v4021_v22  ;;  %v1555_v20 = vmul.f32 %v1551_v55, %v4024_v23  ;;  %v1556_v0 = vmul.f32 %v1547_v5, %v4021_v22  ;;  %v3400_v25 = vld [vmem:[%s6049_s2 + $0x98] sm:$0xff] }
 0xd5c   :  { %v3614_v3 = vpack.c.bf16 %v1557_v59, %v1555_v20  ;;  %v1538_v39 = vpop.permute.xlu0 %1537  ;;  %v1536_v13 = vpop.permute.xlu1 %1535  ;;  %v3612_v50 = vpack.c.bf16 %v1558_v36, %v1556_v0 }
 0xd5e   :  { %3613 = vmatprep.subr.bf16.mxu0 %v3612_v50 }
 0xd5f   :  { %3615 = vmatpush1.bf16.msra.mxu0 %v3614_v3 }
 0xd60   :  { %v1546_v14 = vpop.permute.xlu0 %1545  ;;  %v1544_v15 = vpop.permute.xlu1 %1543 }
 0xd61   :  { %v1550_v21 = vsel %vm71_vm0, %v1538_v39, %v1546_v14  ;;  %v1554_v28 = vsel %vm71_vm0, %v1546_v14, %v1538_v39  ;;  %v1549_v58 = vsel %vm71_vm0, %v1536_v13, %v1544_v15  ;;  %v1553_v6 = vsel %vm71_vm0, %v1544_v15, %v1536_v13 }
 0xd62   :  { %v1561_v61 = vmul.f32 %v1554_v28, %v4024_v23  ;;  %v1562_v9 = vmul.f32 %v1550_v21, %v4021_v22  ;;  %v1559_v40 = vmul.f32 %v1553_v6, %v4024_v23  ;;  %v1560_v30 = vmul.f32 %v1549_v58, %v4021_v22 }
 0xd64   :  { %v3618_v2 = vpack.c.bf16 %v1561_v61, %v1559_v40  ;;  %v1566_v44 = vpop.permute.xlu0 %1565  ;;  %v1564_v10 = vpop.permute.xlu1 %1563  ;;  %v3616_v37 = vpack.c.bf16 %v1562_v9, %v1560_v30 }
 0xd66   :  { %3617 = vmatprep.subr.bf16.mxu0 %v3616_v37 }
 0xd67   :  { %3619 = vmatpush1.bf16.msra.mxu0 %v3618_v2 }
 0xd68   :  { %v1574_v45 = vpop.permute.xlu0 %1573  ;;  %3621 = vmatprep.subr.bf16.mxu0 %v3620_v41  ;;  %v1572_v43 = vpop.permute.xlu1 %1571 }
 0xd69   :  { %v1580_v62 = vsel %vm115_vm1, %v1566_v44, %v1574_v45  ;;  %v1584_v33 = vsel %vm115_vm1, %v1574_v45, %v1566_v44  ;;  %v1579_v52 = vsel %vm115_vm1, %v1564_v10, %v1572_v43  ;;  %v1583_v47 = vsel %vm115_vm1, %v1572_v43, %v1564_v10 }
 0xd6a   :  { %v1590_v19 = vmul.f32 %v1584_v33, %v4057_v54  ;;  %v1588_v18 = vmul.f32 %v1583_v47, %v4057_v54  ;;  %v1589_v32 = vmul.f32 %v1580_v62, %v4062_v57  ;;  %v1587_v1 = vmul.f32 %v1579_v52, %v4062_v57 }
 0xd6b   :  { %3623 = vmatpush1.bf16.msra.mxu0 %v3622_v56 }
 0xd6c   :  { %v1570_v41 = vpop.permute.xlu0 %1569  ;;  %3625 = vmatprep.subr.bf16.mxu0 %v3624_v4  ;;  %v1568_v53 = vpop.permute.xlu1 %1567  ;;  %v3628_v12 = vpack.c.bf16 %v1590_v19, %v1588_v18  ;;  %v3630_v38 = vpack.c.bf16 %v1589_v32, %v1587_v1 }
 0xd6f   :  { %3627 = vmatpush1.bf16.msra.mxu0 %v3626_v26 }
 0xd70   :  { %v1578_v46 = vpop.permute.xlu0 %1577  ;;  %3629 = vmatprep.subr.bf16.mxu0 %v3628_v12  ;;  %v1576_v48 = vpop.permute.xlu1 %1575 }
 0xd71   :  { %v1582_v63 = vsel %vm115_vm1, %v1570_v41, %v1578_v46  ;;  %v1586_v56 = vsel %vm115_vm1, %v1578_v46, %v1570_v41  ;;  %v1581_v24 = vsel %vm115_vm1, %v1568_v53, %v1576_v48  ;;  %v1585_v7 = vsel %vm115_vm1, %v1576_v48, %v1568_v53 }
 0xd72   :  { %v1593_v4 = vmul.f32 %v1582_v63, %v4062_v57  ;;  %v1594_v49 = vmul.f32 %v1586_v56, %v4057_v54  ;;  %v1591_v60 = vmul.f32 %v1581_v24, %v4062_v57  ;;  %v1592_v26 = vmul.f32 %v1585_v7, %v4057_v54 }
 0xd73   :  { %3631 = vmatpush1.bf16.msra.mxu0 %v3630_v38 }
 0xd74   :  { %v3634_v27 = vpack.c.bf16 %v1593_v4, %v1591_v60  ;;  %v3632_v42 = vpack.c.bf16 %v1594_v49, %v1592_v26 }
 0xd76   :  { %3633 = vmatprep.subr.bf16.mxu0 %v3632_v42 }
 0xd77   :  { %3635 = vmatpush1.bf16.msra.mxu0 %v3634_v27 }
 0xd7a   :  { %3405 = vmatmul.mubr.msk.f32.vlgmr.msra.gmra.mrb[16].mxu0 %vm171_vm2, %v3397_v29 }
 0xd7b   :  { %1707 = vmatprep.mubr.f32.mxu0 %v3854_v8 }
 0xd7e   :  { %3406 = vmatmul.mubr.msk.f32.gmra.mrb[18].mxu0 %vm171_vm2, %v3398_v17 }
 0xd7f   :  { %1713 = vmatprep.mubr.f32.mxu0 %v3854_v8 }
 0xd81   :  { %v1608_v51 = vpop.permute.xlu1 %1607  ;;  %v1613_v0 = vpop.permute.xlu0 %1612 }
 0xd82   :  { %3407 = vmatmul.mubr.msk.f32.gmra.mrb[20].mxu0 %vm171_vm2, %v3399_v31 }
 0xd83   :  { %1719 = vmatprep.mubr.f32.mxu0 %v3854_v8 }
 0xd85   :  { %v1618_v28 = vpop.permute.xlu1 %1617  ;;  %v1623_v44 = vpop.permute.xlu0 %1622 }
 0xd86   :  { %3408 = vmatmul.mubr.msk.f32.gmra.mrb[22].mxu0 %vm171_vm2, %v3400_v25 }
 0xd87   :  { %2423 = vmatprep.mubr.f32.mxu0 %v3854_v8 }
 0xe4d   :  { %v1703_v5 = vpop.f32.mrb[16].mxu0 }
 0xe4e   :  { %v5105_v55 = vadd.f32 %v1703_v5, %v1608_v51  ;;  %v1705_v59 = vpop.f32.mrb[17].mxu0 }
 0xe4f   :  { %v5107_v36 = vadd.f32 %v1705_v59, %v1608_v51 }
 0xe50   :  { %v1726_v20 = vmul.f32 %v5105_v55, %v4116_v34 }
 0xe51   :  { %v1727_v3 = vmul.f32 %v5107_v36, %v4119_v35  ;;  %v1709_v39 = vpop.f32.mrb[18].mxu0 }
 0xe52   :  { %v5113_v13 = vadd.f32 %v1709_v39, %v1613_v0  ;;  %v1711_v50 = vpop.f32.mrb[19].mxu0 }
 0xe53   :  { %v5115_v14 = vadd.f32 %v1711_v50, %v1613_v0  ;;  %v1734_v15 = vadd.f32 %v1727_v3, %v1726_v20 }
 0xe54   :  { %v1728_v21 = vmul.f32 %v5113_v13, %v4116_v34 }
 0xe55   :  { %v1729_v58 = vmul.f32 %v5115_v14, %v4119_v35  ;;  %v1715_v6 = vpop.f32.mrb[20].mxu0  ;;  %1735 = vadd.xlane.f32.xlu1 %v1734_v15 }
 0xe56   :  { %v5121_v61 = vadd.f32 %v1715_v6, %v1618_v28  ;;  %v1717_v9 = vpop.f32.mrb[21].mxu0 }
 0xe57   :  { %v5123_v40 = vadd.f32 %v1717_v9, %v1618_v28  ;;  %v1737_v30 = vadd.f32 %v1729_v58, %v1728_v21 }
 0xe58   :  { %v1730_v2 = vmul.f32 %v5121_v61, %v4116_v34 }
 0xe59   :  { %v1731_v10 = vmul.f32 %v5123_v40, %v4119_v35  ;;  %v1721_v37 = vpop.f32.mrb[22].mxu0  ;;  %1738 = vadd.xlane.f32.xlu0 %v1737_v30 }
 0xe5a   :  { %v5129_v45 = vadd.f32 %v1721_v37, %v1623_v44  ;;  %v1723_v43 = vpop.f32.mrb[23].mxu0 }
 0xe5b   :  { %v5131_v62 = vadd.f32 %v1723_v43, %v1623_v44  ;;  %v1740_v33 = vadd.f32 %v1731_v10, %v1730_v2 }
 0xe5c   :  { %v1732_v52 = vmul.f32 %v5129_v45, %v4116_v34 }
 0xe5d   :  { %v1733_v47 = vmul.f32 %v5131_v62, %v4119_v35  ;;  %1741 = vadd.xlane.f32.xlu0 %v1740_v33 }
 0xe5f   :  { %v1743_v19 = vadd.f32 %v1733_v47, %v1732_v52 }
 0xe61   :  { %1744 = vadd.xlane.f32.xlu1 %v1743_v19 }
 0xee2   :  { %v1736_v18 = vpop.xlane.xlu1 %1735 }
 0xee3   :  { %v1746_v32 = vmul.f32 0.03125, %v1736_v18  ;;  %v3409_v18 = vld [vmem:[%s6051_s4 + $0x80] sm:$0xff] }
 0xee5   :  { %v1750_v1 = vsub.f32 %v5105_v55, %v1746_v32  ;;  %v1751_v41 = vsub.f32 %v5107_v36, %v1746_v32 }
 0xee6   :  { %v1739_v53 = vpop.xlane.xlu0 %1738 }
 0xee7   :  { %v5139_v12 = vmul.f32 0.03125, %v1739_v53  ;;  %v1758_v38 = vmul.f32 %v1750_v1, %v4116_v34  ;;  %v1759_v46 = vmul.f32 %v1751_v41, %v4119_v35 }
 0xee9   :  { %v1752_v48 = vsub.f32 %v5113_v13, %v5139_v12  ;;  %v1753_v63 = vsub.f32 %v5115_v14, %v5139_v12  ;;  %v1766_v56 = vmul.f32 %v1758_v38, %v1758_v38  ;;  %v1767_v24 = vmul.f32 %v1759_v46, %v1759_v46  ;;  %v3410_v38 = vld [vmem:[%s6051_s4 + $0x88] sm:$0xff] }
 0xeea   :  { %v1742_v7 = vpop.xlane.xlu0 %1741 }
 0xeeb   :  { %v5147_v4 = vmul.f32 0.03125, %v1742_v7  ;;  %v1774_v49 = vadd.f32 %v1767_v24, %v1766_v56  ;;  %v1760_v60 = vmul.f32 %v1752_v48, %v4116_v34  ;;  %v1761_v26 = vmul.f32 %v1753_v63, %v4119_v35  ;;  %v3413_v56 = vld [vmem:[%s6052_s5 + $0x80] sm:$0xff]  ;;  %v3414_v24 = vld [vmem:[%s6052_s5 + $0x88] sm:$0xff]  ;;  %v3411_v7 = vld [vmem:[%s6051_s4 + $0x90] sm:$0xff] }
 0xeed   :  { %v1754_v27 = vsub.f32 %v5121_v61, %v5147_v4  ;;  %v1755_v42 = vsub.f32 %v5123_v40, %v5147_v4  ;;  %1775 = vadd.xlane.f32.xlu0 %v1774_v49  ;;  %v1768_v29 = vmul.f32 %v1760_v60, %v1760_v60  ;;  %v1769_v17 = vmul.f32 %v1761_v26, %v1761_v26 }
 0xeee   :  { %v1745_v31 = vpop.xlane.xlu1 %1744 }
 0xeef   :  { %v1749_v25 = vmul.f32 0.03125, %v1745_v31  ;;  %v1777_v51 = vadd.f32 %v1769_v17, %v1768_v29  ;;  %v1762_v5 = vmul.f32 %v1754_v27, %v4116_v34  ;;  %v1763_v59 = vmul.f32 %v1755_v42, %v4119_v35 }
 0xef1   :  { %v1756_v20 = vsub.f32 %v5129_v45, %v1749_v25  ;;  %v1757_v0 = vsub.f32 %v5131_v62, %v1749_v25  ;;  %1778 = vadd.xlane.f32.xlu1 %v1777_v51  ;;  %v1770_v3 = vmul.f32 %v1762_v5, %v1762_v5  ;;  %v1771_v39 = vmul.f32 %v1763_v59, %v1763_v59  ;;  %v3415_v51 = vld [vmem:[%s6052_s5 + $0x90] sm:$0xff] }
 0xef3   :  { %v1780_v50 = vadd.f32 %v1771_v39, %v1770_v3  ;;  %v1764_v15 = vmul.f32 %v1756_v20, %v4116_v34  ;;  %v1765_v21 = vmul.f32 %v1757_v0, %v4119_v35 }
 0xef5   :  { %1781 = vadd.xlane.f32.xlu0 %v1780_v50  ;;  %v1772_v28 = vmul.f32 %v1764_v15, %v1764_v15  ;;  %v1773_v58 = vmul.f32 %v1765_v21, %v1765_v21 }
 0xef7   :  { %v1783_v6 = vadd.f32 %v1773_v58, %v1772_v28 }
 0xef9   :  { %1784 = vadd.xlane.f32.xlu1 %v1783_v6 }
 0xf7a   :  { %v1776_v9 = vpop.xlane.xlu0 %1775 }
 0xf7b   :  { %v1786_v30 = vmul.f32 0.03125, %v1776_v9 }
 0xf7d   :  { %v1795_v2 = vadd.f32 1e-05, %v1786_v30 }
 0xf7e   :  { %v1779_v44 = vpop.xlane.xlu1 %1778 }
 0xf7f   :  { %3768 = vrsqrt.f32 %v1795_v2  ;;  %v1787_v10 = vmul.f32 0.03125, %v1779_v44 }
 0xf81   :  { %v1796_v37 = vadd.f32 1e-05, %v1787_v10 }
 0xf82   :  { %v1782_v43 = vpop.xlane.xlu0 %1781 }
 0xf83   :  { %3770 = vrsqrt.f32 %v1796_v37  ;;  %v1788_v33 = vmul.f32 0.03125, %v1782_v43 }
 0xf85   :  { %v1797_v52 = vadd.f32 1e-05, %v1788_v33 }
 0xf86   :  { %v1785_v47 = vpop.xlane.xlu1 %1784 }
 0xf87   :  { %3772 = vrsqrt.f32 %v1797_v52  ;;  %v1789_v19 = vmul.f32 0.03125, %v1785_v47 }
 0xf89   :  { %v3769_v1 = vpop.eup %3768  ;;  %v1798_v41 = vadd.f32 1e-05, %v1789_v19 }
 0xf8a   :  { %v1803_v53 = vmul.f32 %v3769_v1, %v3409_v18 }
 0xf8b   :  { %3774 = vrsqrt.f32 %v1798_v41 }
 0xf8c   :  { %1822 = vperm.xlu0 %3728, %v1803_v53   ;;  %v1812_v63 = vmul.f32 %v1803_v53, %v1746_v32  ;;  %v3412_v32 = vld [vmem:[%s6051_s4 + $0x98] sm:$0xff] }
 0xf8d   :  { %v3771_v46 = vpop.eup %3770 }
 0xf8e   :  { %v1804_v48 = vmul.f32 %v3771_v46, %v3410_v38  ;;  %v1816_v26 = vsub.f32 %v3413_v56, %v1812_v63 }
 0xf90   :  { %1827 = vperm.xlu1 %3729, %v1804_v48   ;;  %v1813_v49 = vmul.f32 %v1804_v48, %v5139_v12  ;;  %v3416_v12 = vld [vmem:[%s6052_s5 + $0x98] sm:$0xff] }
 0xf91   :  { %v3773_v60 = vpop.eup %3772 }
 0xf92   :  { %v1817_v27 = vsub.f32 %v3414_v24, %v1813_v49  ;;  %v1805_v42 = vmul.f32 %v3773_v60, %v3411_v7 }
 0xf94   :  { %1850 = vperm.xlu1 %3729, %v1816_v26   ;;  %1855 = vperm.xlu0 %3728, %v1817_v27   ;;  %v1814_v31 = vmul.f32 %v1805_v42, %v5147_v4  ;;  %v3422_v27 = vld [vmem:[%s6050_s3 + $0xa8] sm:$0xff] }
 0xf95   :  { %v3775_v29 = vpop.eup %3774 }
 0xf96   :  { %v1806_v17 = vmul.f32 %v3775_v29, %v3412_v32  ;;  %v1818_v59 = vsub.f32 %v3415_v51, %v1814_v31  ;;  %v3424_v32 = vld [vmem:[%s6050_s3 + $0xb8] sm:$0xff]  ;;  %v3423_v29 = vld [vmem:[%s6050_s3 + $0xb0] sm:$0xff] }
 0xf98   :  { %1832 = vperm.xlu1 %3729, %v1805_v42   ;;  %1837 = vperm.xlu0 %3728, %v1806_v17   ;;  %v1815_v5 = vmul.f32 %v1806_v17, %v1749_v25  ;;  %v3421_v42 = vld [vmem:[%s6050_s3 + $0xa0] sm:$0xff] }
 0xf9a   :  { %v1819_v20 = vsub.f32 %v3416_v12, %v1815_v5 }
 0xf9c   :  { %1860 = vperm.xlu1 %3729, %v1818_v59   ;;  %1865 = vperm.xlu0 %3728, %v1819_v20  }
0x100b   :  { %v1823_v0 = vpop.permute.xlu0 %1822 }
0x100c   :  { %v1840_v39 = vmul.f32 %v1823_v0, %v5105_v55  ;;  %v1841_v4 = vmul.f32 %v1823_v0, %v5107_v36 }
0x100f   :  { %v1828_v3 = vpop.permute.xlu1 %1827 }
0x1010   :  { %v1842_v50 = vmul.f32 %v1828_v3, %v5113_v13  ;;  %v1843_v15 = vmul.f32 %v1828_v3, %v5115_v14 }
0x1013   :  { %v1856_v21 = vpop.permute.xlu0 %1855  ;;  %v1851_v28 = vpop.permute.xlu1 %1850 }
0x1014   :  { %v1870_v58 = vadd.f32 %v1856_v21, %v1842_v50  ;;  %v1871_v6 = vadd.f32 %v1856_v21, %v1843_v15  ;;  %v1868_v9 = vadd.f32 %v1851_v28, %v1840_v39  ;;  %v1869_v25 = vadd.f32 %v1851_v28, %v1841_v4 }
0x1016   :  { %v1878_v30 = vmax.f32 %v1870_v58, 0.0  ;;  %v1879_v2 = vmax.f32 %v1871_v6, 0.0  ;;  %v1876_v44 = vmax.f32 %v1868_v9, 0.0  ;;  %v1877_v10 = vmax.f32 %v1869_v25, 0.0 }
0x1017   :  { %v1838_v37 = vpop.permute.xlu0 %1837  ;;  %v1833_v43 = vpop.permute.xlu1 %1832 }
0x1018   :  { %v5192_v55 = vmul.f32 %v1878_v30, %v4116_v34  ;;  %v5195_v36 = vmul.f32 %v1879_v2, %v4119_v35  ;;  %v5198_v13 = vmul.f32 %v1876_v44, %v4116_v34  ;;  %v5201_v14 = vmul.f32 %v1877_v10, %v4119_v35 }
0x1019   :  { %v1846_v33 = vmul.f32 %v1838_v37, %v5129_v45  ;;  %v1847_v52 = vmul.f32 %v1838_v37, %v5131_v62  ;;  %v1844_v47 = vmul.f32 %v1833_v43, %v5121_v61  ;;  %v1845_v19 = vmul.f32 %v1833_v43, %v5123_v40 }
0x101a   :  { %1894 = vrot.lane.b32.xlu0 %v5192_v55, %s3852_s21  ;;  %1892 = vrot.lane.b32.xlu1 %v5198_v13, %s3852_s21  ;;  %v3644_v18 = vpack.c.bf16 %v5195_v36, %v5201_v14  ;;  %v3646_v1 = vpack.c.bf16 %v5192_v55, %v5198_v13 }
0x101b   :  { %v1866_v41 = vpop.permute.xlu0 %1865  ;;  %v1861_v45 = vpop.permute.xlu1 %1860 }
0x101c   :  { %v1874_v53 = vadd.f32 %v1866_v41, %v1846_v33  ;;  %v1875_v62 = vadd.f32 %v1866_v41, %v1847_v52  ;;  %v1872_v38 = vadd.f32 %v1861_v45, %v1844_v47  ;;  %v1873_v61 = vadd.f32 %v1861_v45, %v1845_v19 }
0x101e   :  { %v1882_v46 = vmax.f32 %v1874_v53, 0.0  ;;  %v1883_v40 = vmax.f32 %v1875_v62, 0.0  ;;  %v1880_v48 = vmax.f32 %v1872_v38, 0.0  ;;  %v1881_v63 = vmax.f32 %v1873_v61, 0.0  ;;  %1902 = vrot.lane.b32.xlu0 %v5195_v36, %s3852_s21  ;;  %1900 = vrot.lane.b32.xlu1 %v5201_v14, %s3852_s21 }
0x1020   :  { %v5220_v56 = vmul.f32 %v1882_v46, %v4116_v34  ;;  %v5223_v24 = vmul.f32 %v1883_v40, %v4119_v35  ;;  %v5226_v7 = vmul.f32 %v1880_v48, %v4116_v34  ;;  %v5229_v49 = vmul.f32 %v1881_v63, %v4119_v35 }
0x1022   :  { %1898 = vrot.lane.b32.xlu0 %v5220_v56, %s3852_s21  ;;  %1896 = vrot.lane.b32.xlu1 %v5226_v7, %s3852_s21  ;;  %v3648_v60 = vpack.c.bf16 %v5223_v24, %v5229_v49  ;;  %v3650_v26 = vpack.c.bf16 %v5220_v56, %v5226_v7 }
0x1026   :  { %1906 = vrot.lane.b32.xlu0 %v5223_v24, %s3852_s21  ;;  %1904 = vrot.lane.b32.xlu1 %v5229_v49, %s3852_s21 }
0x102a   :  { %1926 = vrot.lane.b32.xlu0 %v5192_v55, %s3853_s15  ;;  %1924 = vrot.lane.b32.xlu1 %v5198_v13, %s3853_s15 }
0x102e   :  { %1934 = vrot.lane.b32.xlu0 %v5195_v36, %s3853_s15  ;;  %1932 = vrot.lane.b32.xlu1 %v5201_v14, %s3853_s15 }
0x1032   :  { %1930 = vrot.lane.b32.xlu0 %v5220_v56, %s3853_s15  ;;  %1928 = vrot.lane.b32.xlu1 %v5226_v7, %s3853_s15 }
0x1036   :  { %1938 = vrot.lane.b32.xlu0 %v5223_v24, %s3853_s15  ;;  %1936 = vrot.lane.b32.xlu1 %v5229_v49, %s3853_s15 }
0x103a   :  { %1973 = vperm.xlu0 %3728, %v3422_v27   ;;  %1968 = vperm.xlu1 %3729, %v3421_v42  }
0x103e   :  { %1983 = vperm.xlu0 %3728, %v3424_v32   ;;  %1978 = vperm.xlu1 %3729, %v3423_v29  }
0x108c   :  { %v1895_v17 = vpop.permute.xlu0 %1894  ;;  %v1893_v31 = vpop.permute.xlu1 %1892 }
0x1090   :  { %v1903_v51 = vpop.permute.xlu0 %1902  ;;  %v1901_v12 = vpop.permute.xlu1 %1900 }
0x1091   :  { %v1909_v5 = vsel %vm71_vm0, %v1895_v17, %v1903_v51  ;;  %v1913_v59 = vsel %vm71_vm0, %v1903_v51, %v1895_v17  ;;  %v1908_v20 = vsel %vm71_vm0, %v1893_v31, %v1901_v12  ;;  %v1912_v0 = vsel %vm71_vm0, %v1901_v12, %v1893_v31  ;;  %v3417_v31 = vld [vmem:[%s6049_s2 + $0xa0] sm:$0xff]  ;;  %v3418_v51 = vld [vmem:[%s6049_s2 + $0xa8] sm:$0xff]  ;;  %v3419_v12 = vld [vmem:[%s6049_s2 + $0xb0] sm:$0xff] }
0x1092   :  { %v1918_v3 = vmul.f32 %v1913_v59, %v4024_v23  ;;  %v1919_v39 = vmul.f32 %v1909_v5, %v4021_v22  ;;  %v1916_v4 = vmul.f32 %v1912_v0, %v4024_v23  ;;  %v1917_v50 = vmul.f32 %v1908_v20, %v4021_v22  ;;  %v3420_v5 = vld [vmem:[%s6049_s2 + $0xb8] sm:$0xff] }
0x1094   :  { %v3638_v15 = vpack.c.bf16 %v1918_v3, %v1916_v4  ;;  %v1899_v21 = vpop.permute.xlu0 %1898  ;;  %v1897_v28 = vpop.permute.xlu1 %1896  ;;  %v3636_v58 = vpack.c.bf16 %v1919_v39, %v1917_v50 }
0x1096   :  { %3637 = vmatprep.subr.bf16.mxu1 %v3636_v58 }
0x1097   :  { %3639 = vmatpush1.bf16.msra.mxu1 %v3638_v15 }
0x1098   :  { %v1907_v6 = vpop.permute.xlu0 %1906  ;;  %v1905_v9 = vpop.permute.xlu1 %1904 }
0x1099   :  { %v1911_v25 = vsel %vm71_vm0, %v1899_v21, %v1907_v6  ;;  %v1915_v30 = vsel %vm71_vm0, %v1907_v6, %v1899_v21  ;;  %v1910_v2 = vsel %vm71_vm0, %v1897_v28, %v1905_v9  ;;  %v1914_v44 = vsel %vm71_vm0, %v1905_v9, %v1897_v28 }
0x109a   :  { %v1922_v10 = vmul.f32 %v1915_v30, %v4024_v23  ;;  %v1923_v37 = vmul.f32 %v1911_v25, %v4021_v22  ;;  %v1920_v43 = vmul.f32 %v1914_v44, %v4024_v23  ;;  %v1921_v33 = vmul.f32 %v1910_v2, %v4021_v22 }
0x109c   :  { %v3642_v52 = vpack.c.bf16 %v1922_v10, %v1920_v43  ;;  %v1927_v47 = vpop.permute.xlu0 %1926  ;;  %v1925_v19 = vpop.permute.xlu1 %1924  ;;  %v3640_v41 = vpack.c.bf16 %v1923_v37, %v1921_v33 }
0x109e   :  { %3641 = vmatprep.subr.bf16.mxu1 %v3640_v41 }
0x109f   :  { %3643 = vmatpush1.bf16.msra.mxu1 %v3642_v52 }
0x10a0   :  { %v1935_v45 = vpop.permute.xlu0 %1934  ;;  %3645 = vmatprep.subr.bf16.mxu1 %v3644_v18  ;;  %v1933_v53 = vpop.permute.xlu1 %1932 }
0x10a1   :  { %v1941_v62 = vsel %vm115_vm1, %v1927_v47, %v1935_v45  ;;  %v1945_v38 = vsel %vm115_vm1, %v1935_v45, %v1927_v47  ;;  %v1940_v61 = vsel %vm115_vm1, %v1925_v19, %v1933_v53  ;;  %v1944_v46 = vsel %vm115_vm1, %v1933_v53, %v1925_v19 }
0x10a2   :  { %v1951_v40 = vmul.f32 %v1945_v38, %v4057_v54  ;;  %v1949_v48 = vmul.f32 %v1944_v46, %v4057_v54  ;;  %v1950_v36 = vmul.f32 %v1941_v62, %v4062_v57  ;;  %v1948_v14 = vmul.f32 %v1940_v61, %v4062_v57 }
0x10a3   :  { %3647 = vmatpush1.bf16.msra.mxu1 %v3646_v1 }
0x10a4   :  { %v1931_v18 = vpop.permute.xlu0 %1930  ;;  %3649 = vmatprep.subr.bf16.mxu1 %v3648_v60  ;;  %v1929_v63 = vpop.permute.xlu1 %1928  ;;  %v3652_v27 = vpack.c.bf16 %v1951_v40, %v1949_v48  ;;  %v3654_v42 = vpack.c.bf16 %v1950_v36, %v1948_v14 }
0x10a7   :  { %3651 = vmatpush1.bf16.msra.mxu1 %v3650_v26 }
0x10a8   :  { %v1939_v32 = vpop.permute.xlu0 %1938  ;;  %3653 = vmatprep.subr.bf16.mxu1 %v3652_v27  ;;  %v1937_v55 = vpop.permute.xlu1 %1936 }
0x10a9   :  { %v1943_v13 = vsel %vm115_vm1, %v1931_v18, %v1939_v32  ;;  %v1947_v1 = vsel %vm115_vm1, %v1939_v32, %v1931_v18  ;;  %v1942_v24 = vsel %vm115_vm1, %v1929_v63, %v1937_v55  ;;  %v1946_v49 = vsel %vm115_vm1, %v1937_v55, %v1929_v63 }
0x10aa   :  { %v1954_v60 = vmul.f32 %v1943_v13, %v4062_v57  ;;  %v1955_v56 = vmul.f32 %v1947_v1, %v4057_v54  ;;  %v1952_v7 = vmul.f32 %v1942_v24, %v4062_v57  ;;  %v1953_v26 = vmul.f32 %v1946_v49, %v4057_v54 }
0x10ab   :  { %3655 = vmatpush1.bf16.msra.mxu1 %v3654_v42 }
0x10ac   :  { %v3658_v29 = vpack.c.bf16 %v1954_v60, %v1952_v7  ;;  %v3656_v17 = vpack.c.bf16 %v1955_v56, %v1953_v26 }
0x10ae   :  { %3657 = vmatprep.subr.bf16.mxu1 %v3656_v17 }
0x10af   :  { %3659 = vmatpush1.bf16.msra.mxu1 %v3658_v29 }
0x10b2   :  { %3425 = vmatmul.mubr.msk.f32.vlgmr.msra.gmra.mrb[16].mxu1 %vm171_vm2, %v3417_v31 }
0x10b3   :  { %2068 = vmatprep.mubr.f32.mxu1 %v3854_v8 }
0x10b6   :  { %3426 = vmatmul.mubr.msk.f32.gmra.mrb[18].mxu1 %vm171_vm2, %v3418_v51 }
0x10b7   :  { %2074 = vmatprep.mubr.f32.mxu1 %v3854_v8 }
0x10b9   :  { %v1969_v59 = vpop.permute.xlu1 %1968  ;;  %v1974_v50 = vpop.permute.xlu0 %1973 }
0x10ba   :  { %3427 = vmatmul.mubr.msk.f32.gmra.mrb[20].mxu1 %vm171_vm2, %v3419_v12 }
0x10bb   :  { %2080 = vmatprep.mubr.f32.mxu1 %v3854_v8 }
0x10bd   :  { %v1979_v30 = vpop.permute.xlu1 %1978  ;;  %v1984_v47 = vpop.permute.xlu0 %1983 }
0x10be   :  { %3428 = vmatmul.mubr.msk.f32.gmra.mrb[22].mxu1 %vm171_vm2, %v3420_v5 }
0x10bf   :  { %2784 = vmatprep.mubr.f32.mxu1 %v3854_v8 }
0x1185   :  { %v2064_v20 = vpop.f32.mrb[16].mxu1 }
0x1186   :  { %v5351_v0 = vadd.f32 %v2064_v20, %v1969_v59  ;;  %v2066_v3 = vpop.f32.mrb[17].mxu1 }
0x1187   :  { %v5353_v39 = vadd.f32 %v2066_v3, %v1969_v59 }
0x1188   :  { %v2087_v4 = vmul.f32 %v5351_v0, %v4116_v34 }
0x1189   :  { %v2088_v15 = vmul.f32 %v5353_v39, %v4119_v35  ;;  %v2070_v21 = vpop.f32.mrb[18].mxu1 }
0x118a   :  { %v5359_v28 = vadd.f32 %v2070_v21, %v1974_v50  ;;  %v2072_v58 = vpop.f32.mrb[19].mxu1 }
0x118b   :  { %v5361_v6 = vadd.f32 %v2072_v58, %v1974_v50  ;;  %v2095_v9 = vadd.f32 %v2088_v15, %v2087_v4 }
0x118c   :  { %v2089_v25 = vmul.f32 %v5359_v28, %v4116_v34 }
0x118d   :  { %v2090_v2 = vmul.f32 %v5361_v6, %v4119_v35  ;;  %v2076_v44 = vpop.f32.mrb[20].mxu1  ;;  %2096 = vadd.xlane.f32.xlu1 %v2095_v9 }
0x118e   :  { %v5367_v10 = vadd.f32 %v2076_v44, %v1979_v30  ;;  %v2078_v37 = vpop.f32.mrb[21].mxu1 }
0x118f   :  { %v5369_v43 = vadd.f32 %v2078_v37, %v1979_v30  ;;  %v2098_v33 = vadd.f32 %v2090_v2, %v2089_v25 }
0x1190   :  { %v2091_v52 = vmul.f32 %v5367_v10, %v4116_v34 }
0x1191   :  { %v2092_v19 = vmul.f32 %v5369_v43, %v4119_v35  ;;  %v2082_v41 = vpop.f32.mrb[22].mxu1  ;;  %2099 = vadd.xlane.f32.xlu0 %v2098_v33 }
0x1192   :  { %v5375_v45 = vadd.f32 %v2082_v41, %v1984_v47  ;;  %v2084_v53 = vpop.f32.mrb[23].mxu1 }
0x1193   :  { %v5377_v62 = vadd.f32 %v2084_v53, %v1984_v47  ;;  %v2101_v38 = vadd.f32 %v2092_v19, %v2091_v52 }
0x1194   :  { %v2093_v61 = vmul.f32 %v5375_v45, %v4116_v34 }
0x1195   :  { %v2094_v46 = vmul.f32 %v5377_v62, %v4119_v35  ;;  %2102 = vadd.xlane.f32.xlu0 %v2101_v38 }
0x1197   :  { %v2104_v40 = vadd.f32 %v2094_v46, %v2093_v61 }
0x1199   :  { %2105 = vadd.xlane.f32.xlu1 %v2104_v40 }
0x121a   :  { %v2097_v48 = vpop.xlane.xlu1 %2096 }
0x121b   :  { %v2107_v36 = vmul.f32 0.03125, %v2097_v48  ;;  %v3429_v48 = vld [vmem:[%s6051_s4 + $0xa0] sm:$0xff] }
0x121d   :  { %v2111_v14 = vsub.f32 %v5351_v0, %v2107_v36  ;;  %v2112_v18 = vsub.f32 %v5353_v39, %v2107_v36 }
0x121e   :  { %v2100_v63 = vpop.xlane.xlu0 %2099 }
0x121f   :  { %v5385_v27 = vmul.f32 0.03125, %v2100_v63  ;;  %v2119_v42 = vmul.f32 %v2111_v14, %v4116_v34  ;;  %v2120_v32 = vmul.f32 %v2112_v18, %v4119_v35 }
0x1221   :  { %v2113_v55 = vsub.f32 %v5359_v28, %v5385_v27  ;;  %v2114_v13 = vsub.f32 %v5361_v6, %v5385_v27  ;;  %v2127_v1 = vmul.f32 %v2119_v42, %v2119_v42  ;;  %v2128_v24 = vmul.f32 %v2120_v32, %v2120_v32  ;;  %v3430_v42 = vld [vmem:[%s6051_s4 + $0xa8] sm:$0xff] }
0x1222   :  { %v2103_v49 = vpop.xlane.xlu0 %2102 }
0x1223   :  { %v5393_v60 = vmul.f32 0.03125, %v2103_v49  ;;  %v2135_v56 = vadd.f32 %v2128_v24, %v2127_v1  ;;  %v2121_v7 = vmul.f32 %v2113_v55, %v4116_v34  ;;  %v2122_v26 = vmul.f32 %v2114_v13, %v4119_v35  ;;  %v3433_v1 = vld [vmem:[%s6052_s5 + $0xa0] sm:$0xff]  ;;  %v3434_v24 = vld [vmem:[%s6052_s5 + $0xa8] sm:$0xff]  ;;  %v3431_v49 = vld [vmem:[%s6051_s4 + $0xb0] sm:$0xff] }
0x1225   :  { %v2115_v29 = vsub.f32 %v5367_v10, %v5393_v60  ;;  %v2116_v17 = vsub.f32 %v5369_v43, %v5393_v60  ;;  %2136 = vadd.xlane.f32.xlu0 %v2135_v56  ;;  %v2129_v31 = vmul.f32 %v2121_v7, %v2121_v7  ;;  %v2130_v51 = vmul.f32 %v2122_v26, %v2122_v26 }
0x1226   :  { %v2106_v12 = vpop.xlane.xlu1 %2105 }
0x1227   :  { %v2110_v5 = vmul.f32 0.03125, %v2106_v12  ;;  %v2138_v59 = vadd.f32 %v2130_v51, %v2129_v31  ;;  %v2123_v20 = vmul.f32 %v2115_v29, %v4116_v34  ;;  %v2124_v3 = vmul.f32 %v2116_v17, %v4119_v35 }
0x1229   :  { %v2117_v4 = vsub.f32 %v5375_v45, %v2110_v5  ;;  %v2118_v50 = vsub.f32 %v5377_v62, %v2110_v5  ;;  %2139 = vadd.xlane.f32.xlu1 %v2138_v59  ;;  %v2131_v15 = vmul.f32 %v2123_v20, %v2123_v20  ;;  %v2132_v21 = vmul.f32 %v2124_v3, %v2124_v3  ;;  %v3435_v59 = vld [vmem:[%s6052_s5 + $0xb0] sm:$0xff] }
0x122b   :  { %v2141_v58 = vadd.f32 %v2132_v21, %v2131_v15  ;;  %v2125_v9 = vmul.f32 %v2117_v4, %v4116_v34  ;;  %v2126_v25 = vmul.f32 %v2118_v50, %v4119_v35 }
0x122d   :  { %2142 = vadd.xlane.f32.xlu0 %v2141_v58  ;;  %v2133_v30 = vmul.f32 %v2125_v9, %v2125_v9  ;;  %v2134_v2 = vmul.f32 %v2126_v25, %v2126_v25 }
0x122f   :  { %v2144_v44 = vadd.f32 %v2134_v2, %v2133_v30 }
0x1231   :  { %2145 = vadd.xlane.f32.xlu1 %v2144_v44 }
0x12b2   :  { %v2137_v37 = vpop.xlane.xlu0 %2136 }
0x12b3   :  { %v2147_v33 = vmul.f32 0.03125, %v2137_v37 }
0x12b5   :  { %v2156_v52 = vadd.f32 1e-05, %v2147_v33 }
0x12b6   :  { %v2140_v47 = vpop.xlane.xlu1 %2139 }
0x12b7   :  { %3776 = vrsqrt.f32 %v2156_v52  ;;  %v2148_v19 = vmul.f32 0.03125, %v2140_v47 }
0x12b9   :  { %v2157_v41 = vadd.f32 1e-05, %v2148_v19 }
0x12ba   :  { %v2143_v53 = vpop.xlane.xlu0 %2142 }
0x12bb   :  { %3778 = vrsqrt.f32 %v2157_v41  ;;  %v2149_v38 = vmul.f32 0.03125, %v2143_v53 }
0x12bd   :  { %v2158_v61 = vadd.f32 1e-05, %v2149_v38 }
0x12be   :  { %v2146_v46 = vpop.xlane.xlu1 %2145 }
0x12bf   :  { %3780 = vrsqrt.f32 %v2158_v61  ;;  %v2150_v40 = vmul.f32 0.03125, %v2146_v46 }
0x12c1   :  { %v3777_v14 = vpop.eup %3776  ;;  %v2159_v18 = vadd.f32 1e-05, %v2150_v40 }
0x12c2   :  { %v2164_v63 = vmul.f32 %v3777_v14, %v3429_v48 }
0x12c3   :  { %3782 = vrsqrt.f32 %v2159_v18 }
0x12c4   :  { %2183 = vperm.xlu0 %3728, %v2164_v63   ;;  %v2173_v13 = vmul.f32 %v2164_v63, %v2107_v36  ;;  %v3432_v36 = vld [vmem:[%s6051_s4 + $0xb8] sm:$0xff] }
0x12c5   :  { %v3779_v32 = vpop.eup %3778 }
0x12c6   :  { %v2165_v55 = vmul.f32 %v3779_v32, %v3430_v42  ;;  %v2177_v26 = vsub.f32 %v3433_v1, %v2173_v13 }
0x12c8   :  { %2188 = vperm.xlu1 %3729, %v2165_v55   ;;  %v2174_v56 = vmul.f32 %v2165_v55, %v5385_v27  ;;  %v3436_v27 = vld [vmem:[%s6052_s5 + $0xb8] sm:$0xff] }
0x12c9   :  { %v3781_v7 = vpop.eup %3780 }
0x12ca   :  { %v2178_v29 = vsub.f32 %v3434_v24, %v2174_v56  ;;  %v2166_v17 = vmul.f32 %v3781_v7, %v3431_v49 }
0x12cc   :  { %2211 = vperm.xlu1 %3729, %v2177_v26   ;;  %2216 = vperm.xlu0 %3728, %v2178_v29   ;;  %v2175_v12 = vmul.f32 %v2166_v17, %v5393_v60  ;;  %v3442_v29 = vld [vmem:[%s6050_s3 + $0xc8] sm:$0xff] }
0x12cd   :  { %v3783_v31 = vpop.eup %3782 }
0x12ce   :  { %v2167_v51 = vmul.f32 %v3783_v31, %v3432_v36  ;;  %v2179_v3 = vsub.f32 %v3435_v59, %v2175_v12  ;;  %v3444_v36 = vld [vmem:[%s6050_s3 + $0xd8] sm:$0xff]  ;;  %v3443_v31 = vld [vmem:[%s6050_s3 + $0xd0] sm:$0xff] }
0x12d0   :  { %2193 = vperm.xlu1 %3729, %v2166_v17   ;;  %2198 = vperm.xlu0 %3728, %v2167_v51   ;;  %v2176_v20 = vmul.f32 %v2167_v51, %v2110_v5  ;;  %v3441_v17 = vld [vmem:[%s6050_s3 + $0xc0] sm:$0xff] }
0x12d2   :  { %v2180_v4 = vsub.f32 %v3436_v27, %v2176_v20 }
0x12d4   :  { %2221 = vperm.xlu1 %3729, %v2179_v3   ;;  %2226 = vperm.xlu0 %3728, %v2180_v4  }
0x1343   :  { %v2184_v50 = vpop.permute.xlu0 %2183 }
0x1344   :  { %v2201_v21 = vmul.f32 %v2184_v50, %v5351_v0  ;;  %v2202_v60 = vmul.f32 %v2184_v50, %v5353_v39 }
0x1347   :  { %v2189_v15 = vpop.permute.xlu1 %2188 }
0x1348   :  { %v2203_v58 = vmul.f32 %v2189_v15, %v5359_v28  ;;  %v2204_v9 = vmul.f32 %v2189_v15, %v5361_v6 }
0x134b   :  { %v2217_v25 = vpop.permute.xlu0 %2216  ;;  %v2212_v30 = vpop.permute.xlu1 %2211 }
0x134c   :  { %v2231_v2 = vadd.f32 %v2217_v25, %v2203_v58  ;;  %v2232_v44 = vadd.f32 %v2217_v25, %v2204_v9  ;;  %v2229_v37 = vadd.f32 %v2212_v30, %v2201_v21  ;;  %v2230_v5 = vadd.f32 %v2212_v30, %v2202_v60 }
0x134e   :  { %v2239_v33 = vmax.f32 %v2231_v2, 0.0  ;;  %v2240_v52 = vmax.f32 %v2232_v44, 0.0  ;;  %v2237_v47 = vmax.f32 %v2229_v37, 0.0  ;;  %v2238_v19 = vmax.f32 %v2230_v5, 0.0 }
0x134f   :  { %v2199_v41 = vpop.permute.xlu0 %2198  ;;  %v2194_v53 = vpop.permute.xlu1 %2193 }
0x1350   :  { %v5438_v0 = vmul.f32 %v2239_v33, %v4116_v34  ;;  %v5441_v39 = vmul.f32 %v2240_v52, %v4119_v35  ;;  %v5444_v28 = vmul.f32 %v2237_v47, %v4116_v34  ;;  %v5447_v6 = vmul.f32 %v2238_v19, %v4119_v35 }
0x1351   :  { %v2207_v38 = vmul.f32 %v2199_v41, %v5375_v45  ;;  %v2208_v61 = vmul.f32 %v2199_v41, %v5377_v62  ;;  %v2205_v46 = vmul.f32 %v2194_v53, %v5367_v10  ;;  %v2206_v40 = vmul.f32 %v2194_v53, %v5369_v43 }
0x1352   :  { %2255 = vrot.lane.b32.xlu0 %v5438_v0, %s3852_s21  ;;  %2253 = vrot.lane.b32.xlu1 %v5444_v28, %s3852_s21  ;;  %v3668_v48 = vpack.c.bf16 %v5441_v39, %v5447_v6  ;;  %v3670_v14 = vpack.c.bf16 %v5438_v0, %v5444_v28 }
0x1353   :  { %v2227_v18 = vpop.permute.xlu0 %2226  ;;  %v2222_v45 = vpop.permute.xlu1 %2221 }
0x1354   :  { %v2235_v63 = vadd.f32 %v2227_v18, %v2207_v38  ;;  %v2236_v62 = vadd.f32 %v2227_v18, %v2208_v61  ;;  %v2233_v42 = vadd.f32 %v2222_v45, %v2205_v46  ;;  %v2234_v10 = vadd.f32 %v2222_v45, %v2206_v40 }
0x1356   :  { %v2243_v32 = vmax.f32 %v2235_v63, 0.0  ;;  %v2244_v43 = vmax.f32 %v2236_v62, 0.0  ;;  %v2241_v55 = vmax.f32 %v2233_v42, 0.0  ;;  %v2242_v13 = vmax.f32 %v2234_v10, 0.0  ;;  %2263 = vrot.lane.b32.xlu0 %v5441_v39, %s3852_s21  ;;  %2261 = vrot.lane.b32.xlu1 %v5447_v6, %s3852_s21 }
0x1358   :  { %v5466_v1 = vmul.f32 %v2243_v32, %v4116_v34  ;;  %v5469_v24 = vmul.f32 %v2244_v43, %v4119_v35  ;;  %v5472_v49 = vmul.f32 %v2241_v55, %v4116_v34  ;;  %v5475_v56 = vmul.f32 %v2242_v13, %v4119_v35 }
0x135a   :  { %2259 = vrot.lane.b32.xlu0 %v5466_v1, %s3852_s21  ;;  %2257 = vrot.lane.b32.xlu1 %v5472_v49, %s3852_s21  ;;  %v3672_v7 = vpack.c.bf16 %v5469_v24, %v5475_v56  ;;  %v3674_v26 = vpack.c.bf16 %v5466_v1, %v5472_v49 }
0x135e   :  { %2267 = vrot.lane.b32.xlu0 %v5469_v24, %s3852_s21  ;;  %2265 = vrot.lane.b32.xlu1 %v5475_v56, %s3852_s21 }
0x1362   :  { %2287 = vrot.lane.b32.xlu0 %v5438_v0, %s3853_s15  ;;  %2285 = vrot.lane.b32.xlu1 %v5444_v28, %s3853_s15 }
0x1366   :  { %2295 = vrot.lane.b32.xlu0 %v5441_v39, %s3853_s15  ;;  %2293 = vrot.lane.b32.xlu1 %v5447_v6, %s3853_s15 }
0x136a   :  { %2291 = vrot.lane.b32.xlu0 %v5466_v1, %s3853_s15  ;;  %2289 = vrot.lane.b32.xlu1 %v5472_v49, %s3853_s15 }
0x136e   :  { %2299 = vrot.lane.b32.xlu0 %v5469_v24, %s3853_s15  ;;  %2297 = vrot.lane.b32.xlu1 %v5475_v56, %s3853_s15 }
0x1372   :  { %2334 = vperm.xlu0 %3728, %v3442_v29   ;;  %2329 = vperm.xlu1 %3729, %v3441_v17  }
0x1376   :  { %2344 = vperm.xlu0 %3728, %v3444_v36   ;;  %2339 = vperm.xlu1 %3729, %v3443_v31  }
0x13c4   :  { %v2256_v51 = vpop.permute.xlu0 %2255  ;;  %v2254_v12 = vpop.permute.xlu1 %2253 }
0x13c8   :  { %v2264_v59 = vpop.permute.xlu0 %2263  ;;  %v2262_v27 = vpop.permute.xlu1 %2261 }
0x13c9   :  { %v2270_v20 = vsel %vm71_vm0, %v2256_v51, %v2264_v59  ;;  %v2274_v3 = vsel %vm71_vm0, %v2264_v59, %v2256_v51  ;;  %v2269_v4 = vsel %vm71_vm0, %v2254_v12, %v2262_v27  ;;  %v2273_v50 = vsel %vm71_vm0, %v2262_v27, %v2254_v12  ;;  %v3437_v12 = vld [vmem:[%s6049_s2 + $0xc0] sm:$0xff]  ;;  %v3438_v59 = vld [vmem:[%s6049_s2 + $0xc8] sm:$0xff]  ;;  %v3439_v27 = vld [vmem:[%s6049_s2 + $0xd0] sm:$0xff] }
0x13ca   :  { %v2279_v15 = vmul.f32 %v2274_v3, %v4024_v23  ;;  %v2280_v21 = vmul.f32 %v2270_v20, %v4021_v22  ;;  %v2277_v60 = vmul.f32 %v2273_v50, %v4024_v23  ;;  %v2278_v58 = vmul.f32 %v2269_v4, %v4021_v22  ;;  %v3440_v20 = vld [vmem:[%s6049_s2 + $0xd8] sm:$0xff] }
0x13cc   :  { %v3662_v9 = vpack.c.bf16 %v2279_v15, %v2277_v60  ;;  %v2260_v25 = vpop.permute.xlu0 %2259  ;;  %v2258_v30 = vpop.permute.xlu1 %2257  ;;  %v3660_v2 = vpack.c.bf16 %v2280_v21, %v2278_v58 }
0x13ce   :  { %3661 = vmatprep.subr.bf16.mxu0 %v3660_v2 }
0x13cf   :  { %3663 = vmatpush1.bf16.msra.mxu0 %v3662_v9 }
0x13d0   :  { %v2268_v44 = vpop.permute.xlu0 %2267  ;;  %v2266_v37 = vpop.permute.xlu1 %2265 }
0x13d1   :  { %v2272_v5 = vsel %vm71_vm0, %v2260_v25, %v2268_v44  ;;  %v2276_v33 = vsel %vm71_vm0, %v2268_v44, %v2260_v25  ;;  %v2271_v52 = vsel %vm71_vm0, %v2258_v30, %v2266_v37  ;;  %v2275_v47 = vsel %vm71_vm0, %v2266_v37, %v2258_v30 }
0x13d2   :  { %v2283_v19 = vmul.f32 %v2276_v33, %v4024_v23  ;;  %v2284_v41 = vmul.f32 %v2272_v5, %v4021_v22  ;;  %v2281_v53 = vmul.f32 %v2275_v47, %v4024_v23  ;;  %v2282_v38 = vmul.f32 %v2271_v52, %v4021_v22 }
0x13d4   :  { %v3666_v61 = vpack.c.bf16 %v2283_v19, %v2281_v53  ;;  %v2288_v46 = vpop.permute.xlu0 %2287  ;;  %v2286_v40 = vpop.permute.xlu1 %2285  ;;  %v3664_v18 = vpack.c.bf16 %v2284_v41, %v2282_v38 }
0x13d6   :  { %3665 = vmatprep.subr.bf16.mxu0 %v3664_v18 }
0x13d7   :  { %3667 = vmatpush1.bf16.msra.mxu0 %v3666_v61 }
0x13d8   :  { %v2296_v45 = vpop.permute.xlu0 %2295  ;;  %3669 = vmatprep.subr.bf16.mxu0 %v3668_v48  ;;  %v2294_v63 = vpop.permute.xlu1 %2293 }
0x13d9   :  { %v2302_v62 = vsel %vm115_vm1, %v2288_v46, %v2296_v45  ;;  %v2306_v42 = vsel %vm115_vm1, %v2296_v45, %v2288_v46  ;;  %v2301_v10 = vsel %vm115_vm1, %v2286_v40, %v2294_v63  ;;  %v2305_v32 = vsel %vm115_vm1, %v2294_v63, %v2286_v40 }
0x13da   :  { %v2312_v43 = vmul.f32 %v2306_v42, %v4057_v54  ;;  %v2310_v55 = vmul.f32 %v2305_v32, %v4057_v54  ;;  %v2311_v39 = vmul.f32 %v2302_v62, %v4062_v57  ;;  %v2309_v6 = vmul.f32 %v2301_v10, %v4062_v57 }
0x13db   :  { %3671 = vmatpush1.bf16.msra.mxu0 %v3670_v14 }
0x13dc   :  { %v2292_v48 = vpop.permute.xlu0 %2291  ;;  %3673 = vmatprep.subr.bf16.mxu0 %v3672_v7  ;;  %v2290_v13 = vpop.permute.xlu1 %2289  ;;  %v3676_v29 = vpack.c.bf16 %v2312_v43, %v2310_v55  ;;  %v3678_v17 = vpack.c.bf16 %v2311_v39, %v2309_v6 }
0x13df   :  { %3675 = vmatpush1.bf16.msra.mxu0 %v3674_v26 }
0x13e0   :  { %v2300_v36 = vpop.permute.xlu0 %2299  ;;  %3677 = vmatprep.subr.bf16.mxu0 %v3676_v29  ;;  %v2298_v0 = vpop.permute.xlu1 %2297 }
0x13e1   :  { %v2304_v28 = vsel %vm115_vm1, %v2292_v48, %v2300_v36  ;;  %v2308_v14 = vsel %vm115_vm1, %v2300_v36, %v2292_v48  ;;  %v2303_v24 = vsel %vm115_vm1, %v2290_v13, %v2298_v0  ;;  %v2307_v56 = vsel %vm115_vm1, %v2298_v0, %v2290_v13 }
0x13e2   :  { %v2315_v7 = vmul.f32 %v2304_v28, %v4062_v57  ;;  %v2316_v1 = vmul.f32 %v2308_v14, %v4057_v54  ;;  %v2313_v49 = vmul.f32 %v2303_v24, %v4062_v57  ;;  %v2314_v26 = vmul.f32 %v2307_v56, %v4057_v54 }
0x13e3   :  { %3679 = vmatpush1.bf16.msra.mxu0 %v3678_v17 }
0x13e4   :  { %v3682_v31 = vpack.c.bf16 %v2315_v7, %v2313_v49  ;;  %v3680_v51 = vpack.c.bf16 %v2316_v1, %v2314_v26 }
0x13e6   :  { %3681 = vmatprep.subr.bf16.mxu0 %v3680_v51 }
0x13e7   :  { %3683 = vmatpush1.bf16.msra.mxu0 %v3682_v31 }
0x13ea   :  { %3445 = vmatmul.mubr.msk.f32.vlgmr.msra.gmra.mrb[24].mxu0 %vm171_vm2, %v3437_v12 }
0x13eb   :  { %2429 = vmatprep.mubr.f32.mxu0 %v3854_v8 }
0x13ee   :  { %3446 = vmatmul.mubr.msk.f32.gmra.mrb[26].mxu0 %vm171_vm2, %v3438_v59 }
0x13ef   :  { %2435 = vmatprep.mubr.f32.mxu0 %v3854_v8 }
0x13f1   :  { %v2330_v3 = vpop.permute.xlu1 %2329  ;;  %v2335_v58 = vpop.permute.xlu0 %2334 }
0x13f2   :  { %3447 = vmatmul.mubr.msk.f32.gmra.mrb[28].mxu0 %vm171_vm2, %v3439_v27 }
0x13f3   :  { %2441 = vmatprep.mubr.f32.mxu0 %v3854_v8 }
0x13f5   :  { %v2340_v33 = vpop.permute.xlu1 %2339  ;;  %v2345_v46 = vpop.permute.xlu0 %2344 }
0x13f6   :  { %3448 = vmatmul.mubr.msk.f32.gmra.mrb[30].mxu0 %vm171_vm2, %v3440_v20 }
0x13f7   :  { %3505 = vmatprep.mubr.msk.f32.mxu0 %vm3857_vm3, %v3854_v8 }
0x14bd   :  { %v2425_v4 = vpop.f32.mrb[24].mxu0 }
0x14be   :  { %v5596_v50 = vadd.f32 %v2425_v4, %v2330_v3  ;;  %v2427_v15 = vpop.f32.mrb[25].mxu0 }
0x14bf   :  { %v5598_v21 = vadd.f32 %v2427_v15, %v2330_v3 }
0x14c0   :  { %v2448_v60 = vmul.f32 %v5596_v50, %v4116_v34 }
0x14c1   :  { %v2449_v9 = vmul.f32 %v5598_v21, %v4119_v35  ;;  %v2431_v25 = vpop.f32.mrb[26].mxu0 }
0x14c2   :  { %v5604_v30 = vadd.f32 %v2431_v25, %v2335_v58  ;;  %v2433_v2 = vpop.f32.mrb[27].mxu0 }
0x14c3   :  { %v5606_v44 = vadd.f32 %v2433_v2, %v2335_v58  ;;  %v2456_v37 = vadd.f32 %v2449_v9, %v2448_v60 }
0x14c4   :  { %v2450_v5 = vmul.f32 %v5604_v30, %v4116_v34 }
0x14c5   :  { %v2451_v52 = vmul.f32 %v5606_v44, %v4119_v35  ;;  %v2437_v47 = vpop.f32.mrb[28].mxu0  ;;  %2457 = vadd.xlane.f32.xlu1 %v2456_v37 }
0x14c6   :  { %v5612_v19 = vadd.f32 %v2437_v47, %v2340_v33  ;;  %v2439_v41 = vpop.f32.mrb[29].mxu0 }
0x14c7   :  { %v5614_v53 = vadd.f32 %v2439_v41, %v2340_v33  ;;  %v2459_v38 = vadd.f32 %v2451_v52, %v2450_v5 }
0x14c8   :  { %v2452_v61 = vmul.f32 %v5612_v19, %v4116_v34 }
0x14c9   :  { %v2453_v40 = vmul.f32 %v5614_v53, %v4119_v35  ;;  %v2443_v18 = vpop.f32.mrb[30].mxu0  ;;  %2460 = vadd.xlane.f32.xlu0 %v2459_v38 }
0x14ca   :  { %v5620_v45 = vadd.f32 %v2443_v18, %v2345_v46  ;;  %v2445_v63 = vpop.f32.mrb[31].mxu0 }
0x14cb   :  { %v5622_v62 = vadd.f32 %v2445_v63, %v2345_v46  ;;  %v2462_v42 = vadd.f32 %v2453_v40, %v2452_v61 }
0x14cc   :  { %v2454_v10 = vmul.f32 %v5620_v45, %v4116_v34 }
0x14cd   :  { %v2455_v32 = vmul.f32 %v5622_v62, %v4119_v35  ;;  %2463 = vadd.xlane.f32.xlu0 %v2462_v42 }
0x14cf   :  { %v2465_v43 = vadd.f32 %v2455_v32, %v2454_v10 }
0x14d1   :  { %2466 = vadd.xlane.f32.xlu1 %v2465_v43 }
0x1552   :  { %v2458_v55 = vpop.xlane.xlu1 %2457 }
0x1553   :  { %v2468_v39 = vmul.f32 0.03125, %v2458_v55  ;;  %v3449_v55 = vld [vmem:[%s6051_s4 + $0xc0] sm:$0xff] }
0x1555   :  { %v2472_v6 = vsub.f32 %v5596_v50, %v2468_v39  ;;  %v2473_v48 = vsub.f32 %v5598_v21, %v2468_v39 }
0x1556   :  { %v2461_v13 = vpop.xlane.xlu0 %2460 }
0x1557   :  { %v5630_v29 = vmul.f32 0.03125, %v2461_v13  ;;  %v2480_v17 = vmul.f32 %v2472_v6, %v4116_v34  ;;  %v2481_v36 = vmul.f32 %v2473_v48, %v4119_v35 }
0x1559   :  { %v2474_v0 = vsub.f32 %v5604_v30, %v5630_v29  ;;  %v2475_v28 = vsub.f32 %v5606_v44, %v5630_v29  ;;  %v2488_v14 = vmul.f32 %v2480_v17, %v2480_v17  ;;  %v2489_v24 = vmul.f32 %v2481_v36, %v2481_v36  ;;  %v3450_v17 = vld [vmem:[%s6051_s4 + $0xc8] sm:$0xff] }
0x155a   :  { %v2464_v56 = vpop.xlane.xlu0 %2463 }
0x155b   :  { %v5638_v7 = vmul.f32 0.03125, %v2464_v56  ;;  %v2496_v1 = vadd.f32 %v2489_v24, %v2488_v14  ;;  %v2482_v49 = vmul.f32 %v2474_v0, %v4116_v34  ;;  %v2483_v26 = vmul.f32 %v2475_v28, %v4119_v35  ;;  %v3453_v14 = vld [vmem:[%s6052_s5 + $0xc0] sm:$0xff]  ;;  %v3454_v24 = vld [vmem:[%s6052_s5 + $0xc8] sm:$0xff]  ;;  %v3451_v56 = vld [vmem:[%s6051_s4 + $0xd0] sm:$0xff] }
0x155d   :  { %v2476_v31 = vsub.f32 %v5612_v19, %v5638_v7  ;;  %v2477_v51 = vsub.f32 %v5614_v53, %v5638_v7  ;;  %2497 = vadd.xlane.f32.xlu0 %v2496_v1  ;;  %v2490_v12 = vmul.f32 %v2482_v49, %v2482_v49  ;;  %v2491_v59 = vmul.f32 %v2483_v26, %v2483_v26 }
0x155e   :  { %v2467_v27 = vpop.xlane.xlu1 %2466 }
0x155f   :  { %v2471_v20 = vmul.f32 0.03125, %v2467_v27  ;;  %v2499_v3 = vadd.f32 %v2491_v59, %v2490_v12  ;;  %v2484_v4 = vmul.f32 %v2476_v31, %v4116_v34  ;;  %v2485_v15 = vmul.f32 %v2477_v51, %v4119_v35 }
0x1561   :  { %v2478_v60 = vsub.f32 %v5620_v45, %v2471_v20  ;;  %v2479_v58 = vsub.f32 %v5622_v62, %v2471_v20  ;;  %2500 = vadd.xlane.f32.xlu1 %v2499_v3  ;;  %v2492_v9 = vmul.f32 %v2484_v4, %v2484_v4  ;;  %v2493_v25 = vmul.f32 %v2485_v15, %v2485_v15  ;;  %v3455_v3 = vld [vmem:[%s6052_s5 + $0xd0] sm:$0xff] }
0x1563   :  { %v2502_v2 = vadd.f32 %v2493_v25, %v2492_v9  ;;  %v2486_v37 = vmul.f32 %v2478_v60, %v4116_v34  ;;  %v2487_v5 = vmul.f32 %v2479_v58, %v4119_v35 }
0x1565   :  { %2503 = vadd.xlane.f32.xlu0 %v2502_v2  ;;  %v2494_v33 = vmul.f32 %v2486_v37, %v2486_v37  ;;  %v2495_v52 = vmul.f32 %v2487_v5, %v2487_v5 }
0x1567   :  { %v2505_v47 = vadd.f32 %v2495_v52, %v2494_v33 }
0x1569   :  { %2506 = vadd.xlane.f32.xlu1 %v2505_v47 }
0x15ea   :  { %v2498_v41 = vpop.xlane.xlu0 %2497 }
0x15eb   :  { %v2508_v38 = vmul.f32 0.03125, %v2498_v41 }
0x15ed   :  { %v2517_v61 = vadd.f32 1e-05, %v2508_v38 }
0x15ee   :  { %v2501_v46 = vpop.xlane.xlu1 %2500 }
0x15ef   :  { %3784 = vrsqrt.f32 %v2517_v61  ;;  %v2509_v40 = vmul.f32 0.03125, %v2501_v46 }
0x15f1   :  { %v2518_v18 = vadd.f32 1e-05, %v2509_v40 }
0x15f2   :  { %v2504_v63 = vpop.xlane.xlu0 %2503 }
0x15f3   :  { %3786 = vrsqrt.f32 %v2518_v18  ;;  %v2510_v42 = vmul.f32 0.03125, %v2504_v63 }
0x15f5   :  { %v2519_v10 = vadd.f32 1e-05, %v2510_v42 }
0x15f6   :  { %v2507_v32 = vpop.xlane.xlu1 %2506 }
0x15f7   :  { %3788 = vrsqrt.f32 %v2519_v10  ;;  %v2511_v43 = vmul.f32 0.03125, %v2507_v32 }
0x15f9   :  { %v3785_v6 = vpop.eup %3784  ;;  %v2520_v48 = vadd.f32 1e-05, %v2511_v43 }
0x15fa   :  { %v2525_v13 = vmul.f32 %v3785_v6, %v3449_v55 }
0x15fb   :  { %3790 = vrsqrt.f32 %v2520_v48 }
0x15fc   :  { %2544 = vperm.xlu0 %3728, %v2525_v13   ;;  %v2534_v28 = vmul.f32 %v2525_v13, %v2468_v39  ;;  %v3452_v39 = vld [vmem:[%s6051_s4 + $0xd8] sm:$0xff] }
0x15fd   :  { %v3787_v36 = vpop.eup %3786 }
0x15fe   :  { %v2526_v0 = vmul.f32 %v3787_v36, %v3450_v17  ;;  %v2538_v26 = vsub.f32 %v3453_v14, %v2534_v28 }
0x1600   :  { %2549 = vperm.xlu1 %3729, %v2526_v0   ;;  %v2535_v1 = vmul.f32 %v2526_v0, %v5630_v29  ;;  %v3456_v29 = vld [vmem:[%s6052_s5 + $0xd8] sm:$0xff] }
0x1601   :  { %v3789_v49 = vpop.eup %3788 }
0x1602   :  { %v2539_v31 = vsub.f32 %v3454_v24, %v2535_v1  ;;  %v2527_v51 = vmul.f32 %v3789_v49, %v3451_v56 }
0x1604   :  { %2572 = vperm.xlu1 %3729, %v2538_v26   ;;  %2577 = vperm.xlu0 %3728, %v2539_v31   ;;  %v2536_v27 = vmul.f32 %v2527_v51, %v5638_v7  ;;  %v3462_v31 = vld [vmem:[%s6050_s3 + $0xe8] sm:$0xff] }
0x1605   :  { %v3791_v12 = vpop.eup %3790 }
0x1606   :  { %v2528_v59 = vmul.f32 %v3791_v12, %v3452_v39  ;;  %v2540_v15 = vsub.f32 %v3455_v3, %v2536_v27  ;;  %v3464_v39 = vld [vmem:[%s6050_s3 + $0xf8] sm:$0xff]  ;;  %v3463_v12 = vld [vmem:[%s6050_s3 + $0xf0] sm:$0xff] }
0x1608   :  { %2554 = vperm.xlu1 %3729, %v2527_v51   ;;  %2559 = vperm.xlu0 %3728, %v2528_v59   ;;  %v2537_v4 = vmul.f32 %v2528_v59, %v2471_v20  ;;  %v3461_v51 = vld [vmem:[%s6050_s3 + $0xe0] sm:$0xff] }
0x160a   :  { %v2541_v60 = vsub.f32 %v3456_v29, %v2537_v4 }
0x160c   :  { %2582 = vperm.xlu1 %3729, %v2540_v15   ;;  %2587 = vperm.xlu0 %3728, %v2541_v60  }
0x167b   :  { %v2545_v58 = vpop.permute.xlu0 %2544 }
0x167c   :  { %v2562_v25 = vmul.f32 %v2545_v58, %v5596_v50  ;;  %v2563_v7 = vmul.f32 %v2545_v58, %v5598_v21 }
0x167f   :  { %v2550_v9 = vpop.permute.xlu1 %2549 }
0x1680   :  { %v2564_v2 = vmul.f32 %v2550_v9, %v5604_v30  ;;  %v2565_v37 = vmul.f32 %v2550_v9, %v5606_v44 }
0x1683   :  { %v2578_v5 = vpop.permute.xlu0 %2577  ;;  %v2573_v33 = vpop.permute.xlu1 %2572 }
0x1684   :  { %v2592_v52 = vadd.f32 %v2578_v5, %v2564_v2  ;;  %v2593_v47 = vadd.f32 %v2578_v5, %v2565_v37  ;;  %v2590_v41 = vadd.f32 %v2573_v33, %v2562_v25  ;;  %v2591_v20 = vadd.f32 %v2573_v33, %v2563_v7 }
0x1686   :  { %v2600_v38 = vmax.f32 %v2592_v52, 0.0  ;;  %v2601_v61 = vmax.f32 %v2593_v47, 0.0  ;;  %v2598_v46 = vmax.f32 %v2590_v41, 0.0  ;;  %v2599_v40 = vmax.f32 %v2591_v20, 0.0 }
0x1687   :  { %v2560_v18 = vpop.permute.xlu0 %2559  ;;  %v2555_v63 = vpop.permute.xlu1 %2554 }
0x1688   :  { %v5683_v50 = vmul.f32 %v2600_v38, %v4116_v34  ;;  %v5686_v21 = vmul.f32 %v2601_v61, %v4119_v35  ;;  %v5689_v30 = vmul.f32 %v2598_v46, %v4116_v34  ;;  %v5692_v44 = vmul.f32 %v2599_v40, %v4119_v35 }
0x1689   :  { %v2568_v42 = vmul.f32 %v2560_v18, %v5620_v45  ;;  %v2569_v10 = vmul.f32 %v2560_v18, %v5622_v62  ;;  %v2566_v32 = vmul.f32 %v2555_v63, %v5612_v19  ;;  %v2567_v43 = vmul.f32 %v2555_v63, %v5614_v53 }
0x168a   :  { %2616 = vrot.lane.b32.xlu0 %v5683_v50, %s3852_s21  ;;  %2614 = vrot.lane.b32.xlu1 %v5689_v30, %s3852_s21  ;;  %v3692_v55 = vpack.c.bf16 %v5686_v21, %v5692_v44  ;;  %v3694_v6 = vpack.c.bf16 %v5683_v50, %v5689_v30 }
0x168b   :  { %v2588_v48 = vpop.permute.xlu0 %2587  ;;  %v2583_v45 = vpop.permute.xlu1 %2582 }
0x168c   :  { %v2596_v13 = vadd.f32 %v2588_v48, %v2568_v42  ;;  %v2597_v62 = vadd.f32 %v2588_v48, %v2569_v10  ;;  %v2594_v17 = vadd.f32 %v2583_v45, %v2566_v32  ;;  %v2595_v19 = vadd.f32 %v2583_v45, %v2567_v43 }
0x168e   :  { %v2604_v36 = vmax.f32 %v2596_v13, 0.0  ;;  %v2605_v53 = vmax.f32 %v2597_v62, 0.0  ;;  %v2602_v0 = vmax.f32 %v2594_v17, 0.0  ;;  %v2603_v28 = vmax.f32 %v2595_v19, 0.0  ;;  %2624 = vrot.lane.b32.xlu0 %v5686_v21, %s3852_s21  ;;  %2622 = vrot.lane.b32.xlu1 %v5692_v44, %s3852_s21 }
0x1690   :  { %v5711_v14 = vmul.f32 %v2604_v36, %v4116_v34  ;;  %v5714_v24 = vmul.f32 %v2605_v53, %v4119_v35  ;;  %v5717_v56 = vmul.f32 %v2602_v0, %v4116_v34  ;;  %v5720_v1 = vmul.f32 %v2603_v28, %v4119_v35 }
0x1692   :  { %2620 = vrot.lane.b32.xlu0 %v5711_v14, %s3852_s21  ;;  %2618 = vrot.lane.b32.xlu1 %v5717_v56, %s3852_s21  ;;  %v3696_v49 = vpack.c.bf16 %v5714_v24, %v5720_v1  ;;  %v3698_v26 = vpack.c.bf16 %v5711_v14, %v5717_v56 }
0x1696   :  { %2628 = vrot.lane.b32.xlu0 %v5714_v24, %s3852_s21  ;;  %2626 = vrot.lane.b32.xlu1 %v5720_v1, %s3852_s21 }
0x169a   :  { %2648 = vrot.lane.b32.xlu0 %v5683_v50, %s3853_s15  ;;  %2646 = vrot.lane.b32.xlu1 %v5689_v30, %s3853_s15 }
0x169e   :  { %2656 = vrot.lane.b32.xlu0 %v5686_v21, %s3853_s15  ;;  %2654 = vrot.lane.b32.xlu1 %v5692_v44, %s3853_s15 }
0x16a2   :  { %2652 = vrot.lane.b32.xlu0 %v5711_v14, %s3853_s15  ;;  %2650 = vrot.lane.b32.xlu1 %v5717_v56, %s3853_s15 }
0x16a6   :  { %2660 = vrot.lane.b32.xlu0 %v5714_v24, %s3853_s15  ;;  %2658 = vrot.lane.b32.xlu1 %v5720_v1, %s3853_s15 }
0x16aa   :  { %2695 = vperm.xlu0 %3728, %v3462_v31   ;;  %2690 = vperm.xlu1 %3729, %v3461_v51  }
0x16ae   :  { %2705 = vperm.xlu0 %3728, %v3464_v39   ;;  %2700 = vperm.xlu1 %3729, %v3463_v12   ;;  %v3457_v12 = vld [vmem:[%s6049_s2 + $0xe0] sm:$0xff] }
0x16fc   :  { %v2617_v59 = vpop.permute.xlu0 %2616  ;;  %v2615_v27 = vpop.permute.xlu1 %2614 }
0x1700   :  { %v2625_v3 = vpop.permute.xlu0 %2624  ;;  %v2623_v29 = vpop.permute.xlu1 %2622 }
0x1701   :  { %v2631_v4 = vsel %vm71_vm0, %v2617_v59, %v2625_v3  ;;  %v2635_v15 = vsel %vm71_vm0, %v2625_v3, %v2617_v59  ;;  %v2630_v60 = vsel %vm71_vm0, %v2615_v27, %v2623_v29  ;;  %v2634_v58 = vsel %vm71_vm0, %v2623_v29, %v2615_v27 }
0x1702   :  { %v2640_v9 = vmul.f32 %v2635_v15, %v4024_v23  ;;  %v2641_v25 = vmul.f32 %v2631_v4, %v4021_v22  ;;  %v2638_v7 = vmul.f32 %v2634_v58, %v4024_v23  ;;  %v2639_v2 = vmul.f32 %v2630_v60, %v4021_v22 }
0x1704   :  { %v3686_v37 = vpack.c.bf16 %v2640_v9, %v2638_v7  ;;  %v2621_v5 = vpop.permute.xlu0 %2620  ;;  %v2619_v33 = vpop.permute.xlu1 %2618  ;;  %v3684_v52 = vpack.c.bf16 %v2641_v25, %v2639_v2 }
0x1706   :  { %3685 = vmatprep.subr.bf16.mxu1 %v3684_v52 }
0x1707   :  { %3687 = vmatpush1.bf16.msra.mxu1 %v3686_v37 }
0x1708   :  { %v2629_v47 = vpop.permute.xlu0 %2628  ;;  %v2627_v41 = vpop.permute.xlu1 %2626 }
0x1709   :  { %v2633_v20 = vsel %vm71_vm0, %v2621_v5, %v2629_v47  ;;  %v2637_v38 = vsel %vm71_vm0, %v2629_v47, %v2621_v5  ;;  %v2632_v61 = vsel %vm71_vm0, %v2619_v33, %v2627_v41  ;;  %v2636_v46 = vsel %vm71_vm0, %v2627_v41, %v2619_v33 }
0x170a   :  { %v2644_v40 = vmul.f32 %v2637_v38, %v4024_v23  ;;  %v2645_v18 = vmul.f32 %v2633_v20, %v4021_v22  ;;  %v2642_v63 = vmul.f32 %v2636_v46, %v4024_v23  ;;  %v2643_v42 = vmul.f32 %v2632_v61, %v4021_v22 }
0x170c   :  { %v3690_v10 = vpack.c.bf16 %v2644_v40, %v2642_v63  ;;  %v2649_v32 = vpop.permute.xlu0 %2648  ;;  %v2647_v43 = vpop.permute.xlu1 %2646  ;;  %v3688_v48 = vpack.c.bf16 %v2645_v18, %v2643_v42 }
0x170e   :  { %3689 = vmatprep.subr.bf16.mxu1 %v3688_v48 }
0x170f   :  { %3691 = vmatpush1.bf16.msra.mxu1 %v3690_v10 }
0x1710   :  { %v2657_v45 = vpop.permute.xlu0 %2656  ;;  %3693 = vmatprep.subr.bf16.mxu1 %v3692_v55  ;;  %v2655_v13 = vpop.permute.xlu1 %2654 }
0x1711   :  { %v2663_v62 = vsel %vm115_vm1, %v2649_v32, %v2657_v45  ;;  %v2667_v23 = vsel %vm115_vm1, %v2657_v45, %v2649_v32  ;;  %v2662_v22 = vsel %vm115_vm1, %v2647_v43, %v2655_v13  ;;  %v2666_v17 = vsel %vm115_vm1, %v2655_v13, %v2647_v43 }
0x1712   :  { %v2673_v19 = vmul.f32 %v2667_v23, %v4057_v54  ;;  %v2671_v36 = vmul.f32 %v2666_v17, %v4057_v54  ;;  %v2672_v21 = vmul.f32 %v2663_v62, %v4062_v57  ;;  %v2670_v44 = vmul.f32 %v2662_v22, %v4062_v57 }
0x1713   :  { %3695 = vmatpush1.bf16.msra.mxu1 %v3694_v6 }
0x1714   :  { %v2653_v55 = vpop.permute.xlu0 %2652  ;;  %3697 = vmatprep.subr.bf16.mxu1 %v3696_v49  ;;  %v2651_v53 = vpop.permute.xlu1 %2650  ;;  %v3700_v0 = vpack.c.bf16 %v2673_v19, %v2671_v36  ;;  %v3702_v28 = vpack.c.bf16 %v2672_v21, %v2670_v44 }
0x1717   :  { %3699 = vmatpush1.bf16.msra.mxu1 %v3698_v26 }
0x1718   :  { %v2661_v31 = vpop.permute.xlu0 %2660  ;;  %3701 = vmatprep.subr.bf16.mxu1 %v3700_v0  ;;  %v2659_v50 = vpop.permute.xlu1 %2658 }
0x1719   :  { %v2665_v30 = vsel %vm115_vm1, %v2653_v55, %v2661_v31  ;;  %v2669_v6 = vsel %vm115_vm1, %v2661_v31, %v2653_v55  ;;  %v2664_v24 = vsel %vm115_vm1, %v2651_v53, %v2659_v50  ;;  %v2668_v1 = vsel %vm115_vm1, %v2659_v50, %v2651_v53 }
0x171a   :  { %v2676_v49 = vmul.f32 %v2665_v30, %v4062_v57  ;;  %v2677_v14 = vmul.f32 %v2669_v6, %v4057_v54  ;;  %v2674_v56 = vmul.f32 %v2664_v24, %v4062_v57  ;;  %v2675_v26 = vmul.f32 %v2668_v1, %v4057_v54  ;;  %v3459_v54 = vld [vmem:[%s6049_s2 + $0xf0] sm:$0xff]  ;;  %v3460_v57 = vld [vmem:[%s6049_s2 + $0xf8] sm:$0xff] }
0x171b   :  { %3703 = vmatpush1.bf16.msra.mxu1 %v3702_v28 }
0x171c   :  { %v3706_v51 = vpack.c.bf16 %v2676_v49, %v2674_v56  ;;  %v3704_v39 = vpack.c.bf16 %v2677_v14, %v2675_v26 }
0x171e   :  { %3705 = vmatprep.subr.bf16.mxu1 %v3704_v39 }
0x171f   :  { %3707 = vmatpush1.bf16.msra.mxu1 %v3706_v51 }
0x1722   :  { %3465 = vmatmul.mubr.msk.f32.vlgmr.msra.gmra.mrb[24].mxu1 %vm171_vm2, %v3457_v12 }
0x1723   :  { %2790 = vmatprep.mubr.f32.mxu1 %v3854_v8 }
0x1726   :  { %3466 = vmatmul.mubr.msk.f32.gmra.mrb[26].mxu1 %vm171_vm2, %v3458_v16 }
0x1727   :  { %2796 = vmatprep.mubr.f32.mxu1 %v3854_v8 }
0x1729   :  { %v2691_v59 = vpop.permute.xlu1 %2690  ;;  %v2696_v60 = vpop.permute.xlu0 %2695 }
0x172a   :  { %3467 = vmatmul.mubr.msk.f32.gmra.mrb[28].mxu1 %vm171_vm2, %v3459_v54 }
0x172b   :  { %2802 = vmatprep.mubr.f32.mxu1 %v3854_v8 }
0x172d   :  { %v2701_v33 = vpop.permute.xlu1 %2700  ;;  %v2706_v40 = vpop.permute.xlu0 %2705 }
0x172e   :  { %3468 = vmatmul.mubr.msk.f32.gmra.mrb[30].mxu1 %vm171_vm2, %v3460_v57 }
0x17f5   :  { %v2786_v27 = vpop.f32.mrb[24].mxu1 }
0x17f6   :  { %v5841_v3 = vadd.f32 %v2786_v27, %v2691_v59  ;;  %v2788_v29 = vpop.f32.mrb[25].mxu1 }
0x17f7   :  { %v5843_v4 = vadd.f32 %v2788_v29, %v2691_v59 }
0x17f8   :  { %v2809_v15 = vmul.f32 %v5841_v3, %v4116_v34 }
0x17f9   :  { %v2810_v58 = vmul.f32 %v5843_v4, %v4119_v35  ;;  %v2792_v9 = vpop.f32.mrb[26].mxu1 }
0x17fa   :  { %v5849_v25 = vadd.f32 %v2792_v9, %v2696_v60  ;;  %v2794_v7 = vpop.f32.mrb[27].mxu1 }
0x17fb   :  { %v5851_v2 = vadd.f32 %v2794_v7, %v2696_v60  ;;  %v2817_v37 = vadd.f32 %v2810_v58, %v2809_v15 }
0x17fc   :  { %v2811_v5 = vmul.f32 %v5849_v25, %v4116_v34 }
0x17fd   :  { %v2812_v52 = vmul.f32 %v5851_v2, %v4119_v35  ;;  %v2798_v47 = vpop.f32.mrb[28].mxu1  ;;  %2818 = vadd.xlane.f32.xlu1 %v2817_v37 }
0x17fe   :  { %v5857_v41 = vadd.f32 %v2798_v47, %v2701_v33  ;;  %v2800_v20 = vpop.f32.mrb[29].mxu1 }
0x17ff   :  { %v5859_v38 = vadd.f32 %v2800_v20, %v2701_v33  ;;  %v2820_v61 = vadd.f32 %v2812_v52, %v2811_v5 }
0x1800   :  { %v2813_v46 = vmul.f32 %v5857_v41, %v4116_v34 }
0x1801   :  { %v2814_v18 = vmul.f32 %v5859_v38, %v4119_v35  ;;  %v2804_v63 = vpop.f32.mrb[30].mxu1  ;;  %2821 = vadd.xlane.f32.xlu0 %v2820_v61 }
0x1802   :  { %v5865_v42 = vadd.f32 %v2804_v63, %v2706_v40  ;;  %v2806_v10 = vpop.f32.mrb[31].mxu1 }
0x1803   :  { %v5867_v32 = vadd.f32 %v2806_v10, %v2706_v40  ;;  %v2823_v43 = vadd.f32 %v2814_v18, %v2813_v46  ;;  %v3469_v10 = vld [vmem:[%s6051_s4 + $0xe0] sm:$0xff] }
0x1804   :  { %v2815_v48 = vmul.f32 %v5865_v42, %v4116_v34 }
0x1805   :  { %v2816_v45 = vmul.f32 %v5867_v32, %v4119_v35  ;;  %2824 = vadd.xlane.f32.xlu0 %v2823_v43 }
0x1807   :  { %v2826_v13 = vadd.f32 %v2816_v45, %v2815_v48 }
0x1809   :  { %2827 = vadd.xlane.f32.xlu1 %v2826_v13  ;;  %v3470_v13 = vld [vmem:[%s6051_s4 + $0xe8] sm:$0xff] }
0x188a   :  { %v2819_v62 = vpop.xlane.xlu1 %2818 }
0x188b   :  { %v2829_v23 = vmul.f32 0.03125, %v2819_v62 }
0x188d   :  { %v2833_v22 = vsub.f32 %v5841_v3, %v2829_v23  ;;  %v2834_v17 = vsub.f32 %v5843_v4, %v2829_v23 }
0x188e   :  { %v2822_v19 = vpop.xlane.xlu0 %2821 }
0x188f   :  { %v5875_v36 = vmul.f32 0.03125, %v2822_v19  ;;  %v2841_v21 = vmul.f32 %v2833_v22, %v4116_v34  ;;  %v2842_v44 = vmul.f32 %v2834_v17, %v4119_v35  ;;  %v3473_v19 = vld [vmem:[%s6052_s5 + $0xe0] sm:$0xff] }
0x1891   :  { %v2835_v55 = vsub.f32 %v5849_v25, %v5875_v36  ;;  %v2836_v53 = vsub.f32 %v5851_v2, %v5875_v36  ;;  %v2849_v0 = vmul.f32 %v2841_v21, %v2841_v21  ;;  %v2850_v28 = vmul.f32 %v2842_v44, %v2842_v44  ;;  %v3474_v21 = vld [vmem:[%s6052_s5 + $0xe8] sm:$0xff]  ;;  %v3471_v44 = vld [vmem:[%s6051_s4 + $0xf0] sm:$0xff] }
0x1892   :  { %v2825_v31 = vpop.xlane.xlu0 %2824 }
0x1893   :  { %v5883_v50 = vmul.f32 0.03125, %v2825_v31  ;;  %v2857_v30 = vadd.f32 %v2850_v28, %v2849_v0  ;;  %v2843_v6 = vmul.f32 %v2835_v55, %v4116_v34  ;;  %v2844_v24 = vmul.f32 %v2836_v53, %v4119_v35 }
0x1895   :  { %v2837_v1 = vsub.f32 %v5857_v41, %v5883_v50  ;;  %v2838_v49 = vsub.f32 %v5859_v38, %v5883_v50  ;;  %2858 = vadd.xlane.f32.xlu0 %v2857_v30  ;;  %v2851_v14 = vmul.f32 %v2843_v6, %v2843_v6  ;;  %v2852_v56 = vmul.f32 %v2844_v24, %v2844_v24 }
0x1896   :  { %v2828_v26 = vpop.xlane.xlu1 %2827 }
0x1897   :  { %v2832_v51 = vmul.f32 0.03125, %v2828_v26  ;;  %v2860_v39 = vadd.f32 %v2852_v56, %v2851_v14  ;;  %v2845_v12 = vmul.f32 %v2837_v1, %v4116_v34  ;;  %v2846_v16 = vmul.f32 %v2838_v49, %v4119_v35  ;;  %v3475_v1 = vld [vmem:[%s6052_s5 + $0xf0] sm:$0xff] }
0x1899   :  { %v2839_v54 = vsub.f32 %v5865_v42, %v2832_v51  ;;  %v2840_v57 = vsub.f32 %v5867_v32, %v2832_v51  ;;  %2861 = vadd.xlane.f32.xlu1 %v2860_v39  ;;  %v2853_v59 = vmul.f32 %v2845_v12, %v2845_v12  ;;  %v2854_v27 = vmul.f32 %v2846_v16, %v2846_v16 }
0x189b   :  { %v2863_v29 = vadd.f32 %v2854_v27, %v2853_v59  ;;  %v2847_v15 = vmul.f32 %v2839_v54, %v4116_v34  ;;  %v2848_v60 = vmul.f32 %v2840_v57, %v4119_v35 }
0x189d   :  { %2864 = vadd.xlane.f32.xlu0 %v2863_v29  ;;  %v2855_v58 = vmul.f32 %v2847_v15, %v2847_v15  ;;  %v2856_v9 = vmul.f32 %v2848_v60, %v2848_v60 }
0x189f   :  { %v2866_v7 = vadd.f32 %v2856_v9, %v2855_v58 }
0x18a1   :  { %2867 = vadd.xlane.f32.xlu1 %v2866_v7 }
0x1922   :  { %v2859_v37 = vpop.xlane.xlu0 %2858 }
0x1923   :  { %v2869_v5 = vmul.f32 0.03125, %v2859_v37 }
0x1925   :  { %v2878_v33 = vadd.f32 1e-05, %v2869_v5 }
0x1926   :  { %v2862_v52 = vpop.xlane.xlu1 %2861 }
0x1927   :  { %3792 = vrsqrt.f32 %v2878_v33  ;;  %v2870_v47 = vmul.f32 0.03125, %v2862_v52 }
0x1929   :  { %v2879_v20 = vadd.f32 1e-05, %v2870_v47 }
0x192a   :  { %v2865_v61 = vpop.xlane.xlu0 %2864 }
0x192b   :  { %3794 = vrsqrt.f32 %v2879_v20  ;;  %v2871_v46 = vmul.f32 0.03125, %v2865_v61 }
0x192d   :  { %v2880_v40 = vadd.f32 1e-05, %v2871_v46 }
0x192e   :  { %v2868_v18 = vpop.xlane.xlu1 %2867 }
0x192f   :  { %3796 = vrsqrt.f32 %v2880_v40  ;;  %v2872_v63 = vmul.f32 0.03125, %v2868_v18 }
0x1931   :  { %v3793_v43 = vpop.eup %3792  ;;  %v2881_v48 = vadd.f32 1e-05, %v2872_v63 }
0x1932   :  { %v2886_v45 = vmul.f32 %v3793_v43, %v3469_v10 }
0x1933   :  { %3798 = vrsqrt.f32 %v2881_v48 }
0x1934   :  { %2905 = vperm.xlu0 %3728, %v2886_v45   ;;  %v2895_v17 = vmul.f32 %v2886_v45, %v2829_v23  ;;  %v3472_v23 = vld [vmem:[%s6051_s4 + $0xf8] sm:$0xff] }
0x1935   :  { %v3795_v62 = vpop.eup %3794 }
0x1936   :  { %v2887_v22 = vmul.f32 %v3795_v62, %v3470_v13  ;;  %v2899_v0 = vsub.f32 %v3473_v19, %v2895_v17  ;;  %v3856_v62 = vmov 0.0|0.0   ;;  %v3089_v17 = vld [vmem:[%s6056_s9 + $0x18] sm:$0xff]  ;;  %v3088_v19 = vld [vmem:[%s6056_s9 + $0x10] sm:$0xff] }
0x1937   :  { %3708 = vmatprep.subr.bf16.mxu0 %v3856_v62 }
0x1938   :  { %2910 = vperm.xlu1 %3729, %v2887_v22   ;;  %v2896_v55 = vmul.f32 %v2887_v22, %v5875_v36  ;;  %v3476_v36 = vld [vmem:[%s6052_s5 + $0xf8] sm:$0xff]  ;;  %v3087_v22 = vld [vmem:[%s6056_s9 + $0x8] sm:$0xff] }
0x1939   :  { %v3797_v53 = vpop.eup %3796 }
0x193a   :  { %v2900_v28 = vsub.f32 %v3474_v21, %v2896_v55  ;;  %v2888_v31 = vmul.f32 %v3797_v53, %v3471_v44 }
0x193c   :  { %2933 = vperm.xlu1 %3729, %v2899_v0   ;;  %2938 = vperm.xlu0 %3728, %v2900_v28   ;;  %v2897_v24 = vmul.f32 %v2888_v31, %v5883_v50 }
0x193d   :  { %v3799_v30 = vpop.eup %3798 }
0x193e   :  { %v2889_v6 = vmul.f32 %v3799_v30, %v3472_v23  ;;  %v2901_v14 = vsub.f32 %v3475_v1, %v2897_v24 }
0x1940   :  { %2915 = vperm.xlu1 %3729, %v2888_v31   ;;  %2920 = vperm.xlu0 %3728, %v2889_v6   ;;  %v2898_v49 = vmul.f32 %v2889_v6, %v2832_v51 }
0x1942   :  { %v2902_v56 = vsub.f32 %v3476_v36, %v2898_v49 }
0x1944   :  { %2943 = vperm.xlu1 %3729, %v2901_v14   ;;  %2948 = vperm.xlu0 %3728, %v2902_v56  }
0x19b3   :  { %v2906_v26 = vpop.permute.xlu0 %2905 }
0x19b4   :  { %v2923_v12 = vmul.f32 %v2906_v26, %v5841_v3  ;;  %v2924_v50 = vmul.f32 %v2906_v26, %v5843_v4 }
0x19b7   :  { %v2911_v39 = vpop.permute.xlu1 %2910 }
0x19b8   :  { %v2925_v16 = vmul.f32 %v2911_v39, %v5849_v25  ;;  %v2926_v54 = vmul.f32 %v2911_v39, %v5851_v2  ;;  %v3000_v39 = vld [vmem:[%s6053_s6] sm:$0x3] }
0x19bb   :  { %v2939_v57 = vpop.permute.xlu0 %2938  ;;  %v2934_v59 = vpop.permute.xlu1 %2933 }
0x19bc   :  { %v2951_v27 = vadd.f32 %v2934_v59, %v2923_v12  ;;  %v2952_v29 = vadd.f32 %v2934_v59, %v2924_v50  ;;  %v2953_v15 = vadd.f32 %v2939_v57, %v2925_v16  ;;  %v2954_v51 = vadd.f32 %v2939_v57, %v2926_v54  ;;  %v3082_v12 = vld [vmem:[%s6055_s8] sm:$0xff] }
0x19bd   :  { %3510 = vmatprep.mubr.msk.f32.mxu1 %vm3110_vm6, %v3082_v12 }
0x19be   :  { %v2959_v60 = vmax.f32 %v2951_v27, 0.0  ;;  %v2960_v58 = vmax.f32 %v2952_v29, 0.0  ;;  %v2961_v37 = vmax.f32 %v2953_v15, 0.0  ;;  %v2962_v5 = vmax.f32 %v2954_v51, 0.0  ;;  %v3083_v27 = vld [vmem:[%s6055_s8 + $0x8] sm:$0xff]  ;;  %v3084_v29 = vld [vmem:[%s6055_s8 + $0x10] sm:$0xff] }
0x19bf   :  { %v2921_v9 = vpop.permute.xlu0 %2920  ;;  %v2916_v7 = vpop.permute.xlu1 %2915  ;;  %v3085_v15 = vld [vmem:[%s6055_s8 + $0x18] sm:$0xff]  ;;  %v3238_v51 = vstv %s3237_s17 }
0x19c0   :  { %v5928_v3 = vmul.f32 %v2960_v58, %v4119_v35  ;;  %v5931_v4 = vmul.f32 %v2959_v60, %v4116_v34  ;;  %v2929_v25 = vmul.f32 %v2921_v9, %v5865_v42  ;;  %v2927_v2 = vmul.f32 %v2916_v7, %v5857_v41 }
0x19c1   :  { %v2930_v33 = vmul.f32 %v2921_v9, %v5867_v32  ;;  %v2928_v52 = vmul.f32 %v2916_v7, %v5859_v38  ;;  %v5940_v63 = vmul.f32 %v2961_v37, %v4116_v34  ;;  %v5943_v42 = vmul.f32 %v2962_v5, %v4119_v35 }
0x19c2   :  { %2983 = vadd.xlane.f32.xlu0 %v5928_v3  ;;  %2975 = vadd.xlane.f32.xlu1 %v5931_v4  ;;  %v3239_v60 = vmul.f32 1.442695, %v3238_v51 }
0x19c3   :  { %v2949_v47 = vpop.permute.xlu0 %2948  ;;  %v2944_v20 = vpop.permute.xlu1 %2943 }
0x19c4   :  { %v2957_v61 = vadd.f32 %v2949_v47, %v2929_v25  ;;  %v2955_v46 = vadd.f32 %v2944_v20, %v2927_v2  ;;  %v2958_v40 = vadd.f32 %v2949_v47, %v2930_v33  ;;  %v2956_v18 = vadd.f32 %v2944_v20, %v2928_v52 }
0x19c5   :  { %3800 = vpow2.f32 %v3239_v60  ;;  %v3824_v60 = vld [vmem:[%s6047_s0 + $0x30] sm:$0xff] }
0x19c6   :  { %v2965_v41 = vmax.f32 %v2957_v61, 0.0  ;;  %v2963_v32 = vmax.f32 %v2955_v46, 0.0  ;;  %2977 = vadd.xlane.f32.xlu0 %v5940_v63  ;;  %2985 = vadd.xlane.f32.xlu1 %v5943_v42  ;;  %v2966_v43 = vmax.f32 %v2958_v40, 0.0  ;;  %v2964_v48 = vmax.f32 %v2956_v18, 0.0 }
0x19c8   :  { %v5948_v38 = vmul.f32 %v2965_v41, %v4116_v34  ;;  %v5951_v10 = vmul.f32 %v2963_v32, %v4116_v34  ;;  %v5956_v45 = vmul.f32 %v2966_v43, %v4119_v35  ;;  %v5959_v13 = vmul.f32 %v2964_v48, %v4119_v35  ;;  %v3086_v34 = vld [vmem:[%s6056_s9] sm:$0xff] }
0x19c9   :  { %v3001_v35 = vld [vmem:[%s6054_s7] sm:$0x3]  ;;  %s3320_s7 = sshll.u32 %s3859_s26, 4  ;;  %s3321_s7 = int_to_ptr.vmem [resolvable:$true] %s3320_s7 }
0x19ca   :  { %2981 = vadd.xlane.f32.xlu1 %v5948_v38  ;;  %2979 = vadd.xlane.f32.xlu0 %v5951_v10  ;;  %s3828_s30 = scalar_lea.vmem %s3321_s7, 1024  ;;  %p3833_p1 = scmp.lt.s32.totalorder %s3321_s7, %s3321_s7 }
0x19cb   :  { %p3829_p0 = scmp.ne.s32.totalorder %s3321_s7, %s3828_s30  ;;  %p3834_p2 = scmp.lt.s32.totalorder %s3828_s30, %s3828_s30 }
0x19cd   :  { %p3835_p3 = por %p3834_p2, %p3833_p1 }
0x19ce   :  { %2989 = vadd.xlane.f32.xlu1 %v5956_v45  ;;  %2987 = vadd.xlane.f32.xlu0 %v5959_v13 }
0x19cf   :  { %v3801_v58 = vpop.eup %3800  ;;  %p3836_p4 = pnand %p3835_p3, %p3829_p0 }
0x19d0   :  { %3714 = vpush %v3801_v58 }
0x19df   :  { %3092 = vperm.xlu1 %3729, %v3086_v34  }
0x19e3   :  { %3097 = vperm.xlu1 %3729, %v3087_v22  }
0x19e4   :  { %3004 = vperm.xlu0 %3728, %v3001_v35  }
0x19e7   :  { %3107 = vperm.xlu1 %3729, %v3089_v17  }
0x19e8   :  { %3102 = vperm.xlu0 %3728, %v3088_v19  }
0x1a01   :  { %s3715_s18 = spop %3714 }
0x1a02   :  { %s3242_s19 = sadd.f32 1.0, %s3715_s18 }
0x1a04   :  { %v3243_v9 = vstv %s3242_s19 }
0x1a05   :  { %3802 = vrcp.f32 %v3243_v9 }
0x1a0f   :  { %v3803_v7 = vpop.eup %3802 }
0x1a10   :  { %3716 = vpush %v3803_v7  ;;  %v3825_v7 = vld [vmem:[%s6047_s0 + $0x20] sm:$0xff] }
0x1a41   :  { %s3717_s8 = spop %3716 }
0x1a4f   :  { %v2984_v21 = vpop.xlane.xlu0 %2983  ;;  %v2976_v44 = vpop.xlane.xlu1 %2975 }
0x1a50   :  { %v2992_v55 = vsel %vm2991_vm4, %v2976_v44, %v2984_v21 }
0x1a51   :  { %v2996_v28 = vmul.f32 0.0625, %v2992_v55 }
0x1a53   :  { %v2978_v53 = vpop.xlane.xlu0 %2977  ;;  %v2986_v0 = vpop.xlane.xlu1 %2985 }
0x1a54   :  { %v2993_v8 = vsel %vm2991_vm4, %v2978_v53, %v2986_v0  ;;  %v3858_v0 = vmov 1  }
0x1a55   :  { %v2997_v31 = vmul.f32 0.0625, %v2993_v8 }
0x1a57   :  { %v3709_v23 = vpack.c.bf16 %v2997_v31, %v2996_v28  ;;  %v2980_v30 = vpop.xlane.xlu0 %2979  ;;  %v2982_v6 = vpop.xlane.xlu1 %2981 }
0x1a59   :  { %3710 = vmatpush3.bf16.msra.mxu0 %v3709_v23  ;;  %v3290_v23 = vstv %s3717_s8 }
0x1a5a   :  { %3711 = vmatprep.subr.bf16.mxu0 %v3856_v62 }
0x1a5b   :  { %v2988_v24 = vpop.xlane.xlu0 %2987  ;;  %v2990_v1 = vpop.xlane.xlu1 %2989 }
0x1a5c   :  { %v2994_v36 = vsel %vm2991_vm4, %v2980_v30, %v2988_v24  ;;  %v2995_v49 = vsel %vm2991_vm4, %v2982_v6, %v2990_v1 }
0x1a5d   :  { %v2998_v14 = vmul.f32 0.0625, %v2994_v36  ;;  %v2999_v56 = vmul.f32 0.0625, %v2995_v49 }
0x1a5f   :  { %v3712_v26 = vpack.c.bf16 %v2999_v56, %v2998_v14  ;;  %v3093_v37 = vpop.permute.xlu1 %3092  ;;  %v3821_v56 = vld [vmem:[%s6047_s0] sm:$0xff] }
0x1a61   :  { %3713 = vmatpush3.bf16.msra.mxu0 %v3712_v26 }
0x1a63   :  { %v3005_v50 = vpop.permute.xlu0 %3004  ;;  %v3098_v5 = vpop.permute.xlu1 %3097 }
0x1a64   :  { %3506 = vmatmul.mubr.msk.f32.vlgmr.msra.gmra.mrb[32].mxu0 %vm3007_vm5, %v3000_v39 }
0x1a67   :  { %v3108_v20 = vpop.permute.xlu1 %3107  ;;  %v3103_v40 = vpop.permute.xlu0 %3102 }
0x1b37   :  { %v3077_v16 = vpop.f32.mrb[32].mxu0 }
0x1b38   :  { %v3078_v54 = vadd.f32 %v3077_v16, %v3005_v50  ;;  %v3507_v57 = vpop.f32.mrb[33].mxu0  ;;  %v3822_v16 = vld [vmem:[%s6047_s0 + $0x18] sm:$0xff] }
0x1b3a   :  { %v3081_v59 = vmax.f32 %v3078_v54, 0.0 }
0x1b3c   :  { %3508 = vmatprep.subr.msk.mxu1 %vm3123_vm7, %v3081_v59 }
0x1b3d   :  { %3509 = vmatpush3.msk.msra.mxu1 %vm3123_vm7, %v3081_v59  ;;  %v3823_v59 = vld [vmem:[%s6047_s0 + $0x8] sm:$0xff] }
0x1b3e   :  { %3511 = vmatmul.mubr.msk.f32.vlgmr.msra.gmra.mrb[32].mxu1 %vm3110_vm6, %v3083_v27 }
0x1b3f   :  { %3513 = vmatprep.mubr.msk.f32.mxu1 %vm3110_vm6, %v3084_v29 }
0x1b42   :  { %3514 = vmatmul.mubr.msk.f32.gmra.mrb[34].mxu1 %vm3110_vm6, %v3085_v15 }
0x1c11   :  { %v3512_v25 = vpop.f32.mrb[32].mxu1 }
0x1c12   :  { %v3199_v2 = vadd.f32 %v3512_v25, %v3098_v5  ;;  %v3193_v33 = vpop.f32.mrb[33].mxu1 }
0x1c13   :  { %v3194_v52 = vadd.f32 %v3193_v33, %v3093_v37  ;;  %v3826_v33 = vld [vmem:[%s6047_s0 + $0x28] sm:$0xff] }
0x1c14   :  { %v3484_v47 = vmul.f32 -1.442695, %v3199_v2 }
0x1c15   :  { %v3483_v61 = vmul.f32 -1.442695, %v3194_v52  ;;  %v3515_v46 = vpop.f32.mrb[34].mxu1 }
0x1c16   :  { %3804 = vpow2.f32 %v3484_v47  ;;  %v3209_v18 = vadd.f32 %v3515_v46, %v3108_v20  ;;  %v3203_v41 = vpop.f32.mrb[35].mxu1  ;;  %v3827_v47 = vld [vmem:[%s6047_s0 + $0x38] sm:$0xff] }
0x1c17   :  { %3806 = vpow2.f32 %v3483_v61  ;;  %v3204_v32 = vadd.f32 %v3203_v41, %v3103_v40 }
0x1c18   :  { %v3486_v43 = vmul.f32 -1.442695, %v3209_v18 }
0x1c19   :  { %v3485_v48 = vmul.f32 -1.442695, %v3204_v32 }
0x1c1a   :  { %3808 = vpow2.f32 %v3486_v43 }
0x1c1b   :  { %3810 = vpow2.f32 %v3485_v48 }
0x1c20   :  { %v3805_v62 = vpop.eup %3804 }
0x1c21   :  { %v3807_v34 = vpop.eup %3806  ;;  %v3225_v22 = vadd.f32 1.0, %v3805_v62 }
0x1c22   :  { %v3224_v35 = vadd.f32 1.0, %v3807_v34 }
0x1c23   :  { %3812 = vrcp.f32 %v3225_v22 }
0x1c24   :  { %3814 = vrcp.f32 %v3224_v35  ;;  %v3809_v17 = vpop.eup %3808 }
0x1c25   :  { %v3811_v19 = vpop.eup %3810  ;;  %v3227_v21 = vadd.f32 1.0, %v3809_v17 }
0x1c26   :  { %v3226_v44 = vadd.f32 1.0, %v3811_v19 }
0x1c27   :  { %3816 = vrcp.f32 %v3227_v21 }
0x1c28   :  { %3818 = vrcp.f32 %v3226_v44 }
0x1c2d   :  { %v3813_v55 = vpop.eup %3812 }
0x1c2e   :  { %v3815_v53 = vpop.eup %3814  ;;  %3253 = vperm.xlu1 %3729, %v3813_v55  }
0x1c2f   :  { %3248 = vperm.xlu0 %3728, %v3815_v53  }
0x1c31   :  { %v3817_v8 = vpop.eup %3816 }
0x1c32   :  { %3730 = vset.pattern.permute.xlu1 %v3858_v0  ;;  %v3819_v28 = vpop.eup %3818 }
0x1c33   :  { %3731 = vset.pattern.permute.xlu0 %v3858_v0  ;;  %3271 = vperm.xlu1 %3730, %v3813_v55  }
0x1c34   :  { %3267 = vperm.xlu0 %3731, %v3815_v53  }
0x1c37   :  { %3732 = vset.pattern.permute.xlu1 %v3855_v11 }
0x1c38   :  { %3733 = vset.pattern.permute.xlu0 %v3855_v11  ;;  %3263 = vperm.xlu1 %3732, %v3817_v8   ;;  %v3820_v11 = vld [vmem:[%s6047_s0 + $0x10] sm:$0xff] }
0x1c39   :  { %3258 = vperm.xlu0 %3733, %v3819_v28  }
0x1c3c   :  { %3734 = vset.pattern.permute.xlu1 %v3858_v0 }
0x1c3d   :  { %3735 = vset.pattern.permute.xlu0 %v3858_v0  ;;  %3275 = vperm.xlu1 %3734, %v3819_v28  }
0x1c3e   :  { %3279 = vperm.xlu0 %3735, %v3817_v8  }
0x1cad   :  { %v3254_v31 = vpop.permute.xlu1 %3253 }
0x1cae   :  { %v3284_v30 = vmul.f32 %v3254_v31, %v5940_v63  ;;  %v3249_v6 = vpop.permute.xlu0 %3248 }
0x1caf   :  { %v3282_v24 = vmul.f32 %v3249_v6, %v5931_v4 }
0x1cb0   :  { %v3293_v1 = vmul.f32 %v3290_v23, %v3284_v30 }
0x1cb1   :  { %v3291_v36 = vmul.f32 %v3290_v23, %v3282_v24 }
0x1cb2   :  { %v3301_v49 = vadd.f32 %v3820_v11, %v3293_v1  ;;  %v3272_v14 = vpop.permute.xlu1 %3271 }
0x1cb3   :  { %v3299_v26 = vadd.f32 %v3821_v56, %v3291_v36  ;;  %v3285_v39 = vmul.f32 %v3272_v14, %v5943_v42  ;;  %v3268_v12 = vpop.permute.xlu0 %3267 }
0x1cb4   :  { %3309 = vst [vmem:[#allocation3 + $0x10] sm:$0xff] %v3301_v49  ;;  %v3283_v63 = vmul.f32 %v3268_v12, %v5928_v3 }
0x1cb5   :  { %3307 = vst [vmem:[#allocation3] sm:$0xff] %v3299_v26  ;;  %v3294_v4 = vmul.f32 %v3290_v23, %v3285_v39 }
0x1cb6   :  { %v3292_v50 = vmul.f32 %v3290_v23, %v3283_v63 }
0x1cb7   :  { %v3302_v54 = vadd.f32 %v3822_v16, %v3294_v4  ;;  %v3264_v57 = vpop.permute.xlu1 %3263 }
0x1cb8   :  { %v3300_v27 = vadd.f32 %v3823_v59, %v3292_v50  ;;  %v3288_v42 = vmul.f32 %v3264_v57, %v5948_v38  ;;  %v3259_v29 = vpop.permute.xlu0 %3258 }
0x1cb9   :  { %3310 = vst [vmem:[#allocation3 + $0x18] sm:$0xff] %v3302_v54  ;;  %v3286_v3 = vmul.f32 %v3259_v29, %v5951_v10 }
0x1cba   :  { %3308 = vst [vmem:[#allocation3 + $0x8] sm:$0xff] %v3300_v27  ;;  %v3297_v15 = vmul.f32 %v3290_v23, %v3288_v42 }
0x1cbb   :  { %v3295_v51 = vmul.f32 %v3290_v23, %v3286_v3 }
0x1cbc   :  { %v3305_v58 = vadd.f32 %v3824_v60, %v3297_v15  ;;  %v3276_v9 = vpop.permute.xlu1 %3275 }
0x1cbd   :  { %v3303_v37 = vadd.f32 %v3825_v7, %v3295_v51  ;;  %v3287_v38 = vmul.f32 %v3276_v9, %v5959_v13  ;;  %v3280_v5 = vpop.permute.xlu0 %3279 }
0x1cbe   :  { %3313 = vst [vmem:[#allocation3 + $0x30] sm:$0xff] %v3305_v58  ;;  %v3289_v10 = vmul.f32 %v3280_v5, %v5956_v45 }
0x1cbf   :  { %3311 = vst [vmem:[#allocation3 + $0x20] sm:$0xff] %v3303_v37  ;;  %v3296_v25 = vmul.f32 %v3290_v23, %v3287_v38 }
0x1cc0   :  { %v3298_v2 = vmul.f32 %v3290_v23, %v3289_v10 }
0x1cc1   :  { %v3304_v52 = vadd.f32 %v3826_v33, %v3296_v25 }
0x1cc2   :  { %v3306_v13 = vadd.f32 %v3827_v47, %v3298_v2 }
0x1cc3   :  { %3312 = vst [vmem:[#allocation3 + $0x28] sm:$0xff] %v3304_v52 }
0x1cc4   :  { %3314 = vst [vmem:[#allocation3 + $0x38] sm:$0xff] %v3306_v13 }
0x1cc5   :  { %3839 = shalt.err (!%p3836_p4)
}
0x1cc6   :  { %s3840_s12 = scalar_lea.hbm %s6058_s11, 1024 }
0x1cc7   :  { %p3841_p5 = scmp.ne.s32.totalorder %s6058_s11, %s3840_s12  ;;  %p3844_p6 = scmp.lt.u32.totalorder %s3840_s12, %s6058_s11 }
0x1cc9   :  { %p3846_p7 = pnand %p3844_p6, %p3841_p5 }
0x1ccb   :  { %3849 = shalt.err (!%p3846_p7)
}
0x1ccc   :  { %s3860_s17 = smov 256   ;;  %s3861_s18 = smov 16  }
0x1ccd   :  { %3326 = dma.vmem_to_hbm [thread:$0]  %s3321_s7, 1024, %s6058_s11, [#allocation4], %s3860_s17, %s3860_s17, %s3861_s18  }
0x1cce   :  { %3850 = dma.done.wait [#allocation4], 1024  }
0x1ccf   :  { %3851 = vsyncadd [#allocation4], 4294966272 }
0x1cd0   :  { %3330 = vsyncpa [#allocation4], 1 }

</bundles_post_ra>
